<compile_context>
chip_gen: v7x
topology: tpu7x:2x2x1
jax: 0.10.0
libtpu: 0.0.40
codegen_flags: <defaults>
</compile_context>

<pallas_src>
import functools

import jax
import jax.numpy as jnp
from jax.experimental import pallas as pl
from jax.experimental.pallas import tpu as pltpu


def kfe_kernel(x_ref, pec_ref, tec_ref, *refs,
               n_fcn_rest, n_mlp, fcn_relu, mlp_relu):
    """Grid = (B tiles, L tiles).

    refs = [W_x, fcn_W[1:], fcn_b[1:], mlp_W, mlp_b, out_ref, acc_ref(scratch)]
    """
    idx = 0
    wx_ref = refs[idx]; idx += 1
    fcn_W = refs[idx:idx + n_fcn_rest]; idx += n_fcn_rest
    fcn_b = refs[idx:idx + n_fcn_rest]; idx += n_fcn_rest
    mlp_W = refs[idx:idx + n_mlp]; idx += n_mlp
    mlp_b = refs[idx:idx + n_mlp]; idx += n_mlp
    out_ref = refs[idx]; idx += 1
    acc_ref = refs[idx]

    li = pl.program_id(1)
    n_l = pl.num_programs(1)
    tB, tL, Dp = x_ref.shape

    # ---- FCN layer 0: x (already in compute dtype, Dx zero-padded to a lane
    #      multiple) against the x-slice of the first conv weight.  The pe/te
    #      contributions were precomputed in the wrapper and enter here as
    #      broadcast biases on the (tB, tL, C1) view -> no per-step K=E MXU
    #      matmuls, no (tB*tL, C1) broadcast temp. ----
    x2d = x_ref[...].reshape(tB * tL, Dp)
    h = jnp.dot(x2d, wx_ref[...], preferred_element_type=jnp.float32)   # (tB*tL, C1)
    c1 = h.shape[-1]
    h = h.reshape(tB, tL, c1) + pec_ref[...][None, :, :] + tec_ref[...][:, None, :]
    if fcn_relu[0]:
        h = jnp.maximum(h, 0.0)
    h = h.reshape(tB * tL, c1)

    # ---- FCN layers 1..n-1: pointwise conv == channel matmul, fused
    #      bias (+ ReLU) epilogue behind the MXU (f32 accumulation). ----
    for W, b, relu in zip(fcn_W, fcn_b, fcn_relu[1:]):
        w = W[...]
        h = jnp.dot(h.astype(w.dtype), w, preferred_element_type=jnp.float32) + b[...]
        if relu:
            h = jnp.maximum(h, 0.0)

    # ---- torch.max over the length axis: vectorized partial max of this
    #      L tile combined with a running max in VMEM scratch. ----
    c_fcn = h.shape[-1]
    part_max = jnp.max(h.reshape(tB, tL, c_fcn), axis=1)                # (tB, c_fcn)

    @pl.when(li == 0)
    def _():
        acc_ref[...] = jnp.full(acc_ref.shape, -jnp.inf, jnp.float32)

    acc_ref[...] = jnp.maximum(acc_ref[...], part_max)

    # ---- MLP head + output store only on the last L step; the output block
    #      index is constant across the "arbitrary" L axis (resident). ----
    @pl.when(li == n_l - 1)
    def _():
        z = acc_ref[...]
        for W, b, relu in zip(mlp_W, mlp_b, mlp_relu):
            w = W[...]
            z = jnp.dot(z.astype(w.dtype), w, preferred_element_type=jnp.float32) + b[...]
            if relu:
                z = jnp.maximum(z, 0.0)
        out_ref[...] = z.astype(out_ref.dtype)


def _pick_tile(dim, align, cap):
    """Largest multiple of `align` that divides `dim` and is <= cap, else the
    full dim (BlockSpec accepts full-extent blocks; only a perf concern)."""
    best = None
    t = align
    while t <= min(dim, cap):
        if dim % t == 0:
            best = t
        t += align
    return best if best is not None else dim


def _default_vmem_limit():
    """~48 MiB on v7x (64 MiB VMEM/TC), ~96 MiB on v5e/v6e (128 MiB VMEM)."""
    try:
        cap = pltpu.get_tpu_info().vmem_capacity_bytes
    except Exception:
        cap = 64 * 1024 * 1024
    return int(min(max(cap - 16 * 1024 * 1024, 32 * 1024 * 1024),
                   96 * 1024 * 1024))


def kfe_m_forward(x, time_range, concept_idx, params, *,
                  tile_b=None, tile_l=None,
                  compute_dtype=jnp.bfloat16,
                  vmem_limit_bytes=None):
    """Embedding gathers, first-layer split (pe_c/te_c precompute), Dx padding
    and BN folding are tiny one-time JAX glue; the whole matmul / pooling /
    MLP hot path runs in one gridded Pallas kernel."""
    pos_emb, con_emb, fcn_Ws, fcn_bs, mlp_Ws, mlp_bs = params
    B, L, Dx = x.shape
    E = pos_emb.shape[1]
    assert fcn_Ws[0].shape[0] == Dx + 2 * E

    if vmem_limit_bytes is None:
        vmem_limit_bytes = _default_vmem_limit()

    # Embedding gathers only (never broadcast to (B, L, E)); the first-layer
    # pe/te contributions depend only on li / bi, so precompute them here
    # (the K=E matmuls are pure MXU waste inside the kernel).  b0 is folded
    # into te_c.
    pe = pos_emb[time_range.astype(jnp.int32)]                   # (L, E)
    te = con_emb[concept_idx.astype(jnp.int32)]                  # (B, E)
    W0, b0 = fcn_Ws[0], fcn_bs[0]
    W_x, W_pe, W_te = W0[:Dx], W0[Dx:Dx + E], W0[Dx + E:]
    pe_c = jnp.dot(pe, W_pe, precision=jax.lax.Precision.HIGHEST)        # (L, C1)
    te_c = jnp.dot(te, W_te, precision=jax.lax.Precision.HIGHEST) + b0   # (B, C1)
    C1 = W0.shape[1]

    # Zero-pad Dx to a multiple of 128: lane-dense x tiles and no ragged
    # final K pass on the first-layer MXU matmul.
    Dp = max(128, ((Dx + 127) // 128) * 128)
    if Dp != Dx:
        x = jnp.pad(x, ((0, 0), (0, 0), (0, Dp - Dx)))
        W_x = jnp.pad(W_x, ((0, Dp - Dx), (0, 0)))

    # Cast the dominant HBM stream (x) and all big matmul weights to the
    # compute dtype in the wrapper; biases / accumulation stay f32.
    x = x.astype(compute_dtype)
    W_x = W_x.astype(compute_dtype)
    fcn_W_rest = [w.astype(compute_dtype) for w in fcn_Ws[1:]]
    fcn_b_rest = list(fcn_bs[1:])
    mlp_W_hidden = [w.astype(compute_dtype) for w in mlp_Ws[:-1]]

    # Pad the final MLP layer to a lane-dense 128-wide output; slice outside.
    out_dim = mlp_Ws[-1].shape[1]
    out_pad = max(128, ((out_dim + 127) // 128) * 128)
    W_last = jnp.zeros((mlp_Ws[-1].shape[0], out_pad),
                       jnp.float32).at[:, :out_dim].set(mlp_Ws[-1])
    b_last = jnp.zeros((1, out_pad), jnp.float32).at[:, :out_dim].set(mlp_bs[-1])
    mlp_W_list = mlp_W_hidden + [W_last]
    mlp_b_list = list(mlp_bs[:-1]) + [b_last]

    c_fcn = fcn_Ws[-1].shape[1]
    n_fcn, n_mlp = len(fcn_Ws), len(mlp_W_list)

    # Tile selection: B in chunks of 8 rows ("parallel"), L in sublane-aligned
    # chunks ("arbitrary" running-max axis).  tL alignment follows the x
    # compute dtype (16 for bf16, 8 for f32) so the (tB,tL,Dp)->(tB*tL,Dp)
    # reshape stays layout-free; larger L caps only when VMEM allows.
    sub = 16 if jnp.dtype(compute_dtype).itemsize < 4 else 8
    cap_l = 256 if vmem_limit_bytes >= 80 * 1024 * 1024 else 128
    tB = tile_b if tile_b is not None else _pick_tile(B, 8, 8)
    tL = tile_l if tile_l is not None else _pick_tile(L, sub, cap_l)
    assert B % tB == 0 and L % tL == 0, "choose tiles that divide B and L"
    grid = (B // tB, L // tL)

    weight_args = [W_x] + fcn_W_rest + fcn_b_rest + mlp_W_list + mlp_b_list

    kernel = functools.partial(
        kfe_kernel,
        n_fcn_rest=n_fcn - 1, n_mlp=n_mlp,
        fcn_relu=tuple([True] * (n_fcn - 1) + [False]),   # last FCN block: BN only
        mlp_relu=tuple([True] * (n_mlp - 1) + [False]),   # last MLP layer: plain Linear
    )

    def resident_spec(shape):
        # Grid-invariant full-extent weight block; request a single buffer to
        # avoid a duplicate VMEM copy of every weight (several MB at real
        # sizes).  Fall back to the default spec if pipeline_mode/Buffered is
        # not available in this Pallas version.
        idx_map = lambda bi, li: (0,) * len(shape)
        try:
            return pl.BlockSpec(shape, idx_map, pipeline_mode=pl.Buffered(1))
        except Exception:
            return pl.BlockSpec(shape, idx_map)

    def plain_spec(shape):
        return pl.BlockSpec(shape, lambda bi, li: (0,) * len(shape))

    def run(weight_spec):
        out = pl.pallas_call(
            kernel,
            out_shape=jax.ShapeDtypeStruct((B, out_pad), jnp.float32),
            grid_spec=pltpu.PrefetchScalarGridSpec(
                num_scalar_prefetch=0,
                grid=grid,
                in_specs=[
                    pl.BlockSpec((tB, tL, Dp), lambda bi, li: (bi, li, 0)),
                    pl.BlockSpec((tL, C1), lambda bi, li: (li, 0)),
                    pl.BlockSpec((tB, C1), lambda bi, li: (bi, 0)),
                ] + [weight_spec(a.shape) for a in weight_args],
                out_specs=pl.BlockSpec((tB, out_pad), lambda bi, li: (bi, 0)),
                scratch_shapes=[pltpu.VMEM((tB, c_fcn), jnp.float32)],
            ),
            compiler_params=pltpu.CompilerParams(
                dimension_semantics=("parallel", "arbitrary"),
                vmem_limit_bytes=vmem_limit_bytes,
            ),
        )(x, pe_c, te_c, *weight_args)
        return jax.block_until_ready(out)

    try:
        out_full = run(resident_spec)
    except Exception:
        # Fallback: default double-buffered weights (still grid-invariant, so
        # never re-DMA'd; only costs extra VMEM).
        out_full = run(plain_spec)

    return out_full[:, :out_dim]


def make_params(key, *, traj_len, concept_len, embed_size,
                fcn_dims, mlp_dims, eps=1e-5):
    """Deterministic synthetic parameters; folds eval-mode BN into each
    preceding matmul (W stored transposed as (cin, cout) for x @ W)."""
    keys = iter(jax.random.split(key, 128))

    def nrm(shape, scale=0.1):
        return jax.random.normal(next(keys), shape, jnp.float32) * scale

    pos_emb = nrm((traj_len, embed_size), 0.5)
    con_emb = nrm((concept_len, embed_size), 0.5)

    def folded_layer(cin, cout, with_bn):
        W = nrm((cout, cin))          # torch Conv1d/Linear weight (out, in)
        b = nrm((cout,))
        if with_bn:
            gamma = 1.0 + nrm((cout,))
            beta = nrm((cout,))
            rm = jnp.zeros((cout,), jnp.float32)
            rv = jnp.ones((cout,), jnp.float32)
            scale = gamma / jnp.sqrt(rv + eps)
            W_eff = W.T * scale[None, :]
            b_eff = (b - rm) * scale + beta
        else:
            W_eff, b_eff = W.T, b
        return W_eff, b_eff.reshape(1, cout)

    fcn_Ws, fcn_bs = [], []
    for cin, cout in zip(fcn_dims[:-1], fcn_dims[1:]):
        W, b = folded_layer(cin, cout, with_bn=True)          # every FCN block has BN
        fcn_Ws.append(W); fcn_bs.append(b)

    mlp_Ws, mlp_bs = [], []
    n_mlp = len(mlp_dims) - 1
    for i, (cin, cout) in enumerate(zip(mlp_dims[:-1], mlp_dims[1:])):
        W, b = folded_layer(cin, cout, with_bn=(i < n_mlp - 1))  # last: Linear only
        mlp_Ws.append(W); mlp_bs.append(b)

    return pos_emb, con_emb, fcn_Ws, fcn_bs, mlp_Ws, mlp_bs


if __name__ == "__main__":
    # Small-shape analog of KFE_m (real model: Dx=758, E=5, FCN widths 768/512,
    # MLP [512,512,256,128,3]); same structure: fcn input = x_dim + 2*embed,
    # 5 FCN conv+BN blocks (last without ReLU), 4 MLP layers (last plain).
    B, L = 16, 16
    traj_len, concept_len, embed_size = 16, 5, 4
    x_dim = 24
    fcn_in = x_dim + 2 * embed_size                  # 32
    fcn_dims = [fcn_in, 32, 32, 32, 32, 32]
    mlp_dims = [32, 32, 16, 8, 3]
    out_dim = mlp_dims[-1]

    key = jax.random.PRNGKey(0)
    k_par, k_x = jax.random.split(key)
    params = make_params(k_par, traj_len=traj_len, concept_len=concept_len,
                         embed_size=embed_size, fcn_dims=fcn_dims,
                         mlp_dims=mlp_dims)
    pos_emb, con_emb, fcn_Ws, fcn_bs, mlp_Ws, mlp_bs = params

    x = jax.random.normal(k_x, (B, L, x_dim), jnp.float32)
    time_range = jnp.arange(L, dtype=jnp.int32) % traj_len
    concept_idx = jnp.arange(B, dtype=jnp.int32) % concept_len

    # Pure-JAX reference (f32, folded params) for a sanity check.
    def reference():
        pe = pos_emb[time_range]
        te = con_emb[concept_idx]
        h = jnp.concatenate(
            [x,
             jnp.broadcast_to(pe[None, :, :], (B, L, embed_size)),
             jnp.broadcast_to(te[:, None, :], (B, L, embed_size))], axis=-1)
        h = h.reshape(B * L, -1)
        for i, (W, b) in enumerate(zip(fcn_Ws, fcn_bs)):
            h = jnp.dot(h, W, precision=jax.lax.Precision.HIGHEST) + b
            if i < len(fcn_Ws) - 1:
                h = jnp.maximum(h, 0.0)
        z = jnp.max(h.reshape(B, L, -1), axis=1)
        for i, (W, b) in enumerate(zip(mlp_Ws, mlp_bs)):
            z = jnp.dot(z, W, precision=jax.lax.Precision.HIGHEST) + b
            if i < len(mlp_Ws) - 1:
                z = jnp.maximum(z, 0.0)
        return z

    ref = jax.block_until_ready(reference())

    # f32 path: tile_l=8 -> 2 L steps (exercises the running-max accumulator);
    # tile_b=8 -> 2 parallel B steps (megacore shard on v7x).
    out_f32 = kfe_m_forward(x, time_range, concept_idx, params,
                            tile_b=8, tile_l=8, compute_dtype=jnp.float32)
    out_f32 = jax.block_until_ready(out_f32)
    assert out_f32.shape == (B, out_dim)
    assert bool(jnp.allclose(out_f32, ref, rtol=1e-2, atol=1e-2)), \
        "f32 kernel output mismatch vs pure-JAX reference"

    # Default bf16 performance path (auto L tile -> 16-aligned for bf16);
    # validated with a looser tolerance as requested by the review.
    out_bf16 = kfe_m_forward(x, time_range, concept_idx, params, tile_b=8)
    out_bf16 = jax.block_until_ready(out_bf16)
    assert out_bf16.shape == (B, out_dim) and out_bf16.dtype == jnp.float32
    assert bool(jnp.allclose(out_bf16, ref, rtol=5e-2, atol=5e-2)), \
        "bf16 kernel output mismatch vs pure-JAX reference"

    print("KERNEL_OK")
</pallas_src>

<mosaic_0001>
module attributes {stable_mosaic.version = 11 : i64} {
  func.func @kfe_kernel(%arg0: i32, %arg1: i32, %arg2: memref<8x8x128xf32, #tpu.memory_space<vmem>>, %arg3: memref<8x32xf32, #tpu.memory_space<vmem>>, %arg4: memref<8x32xf32, #tpu.memory_space<vmem>>, %arg5: memref<128x32xf32, #tpu.memory_space<vmem>>, %arg6: memref<32x32xf32, #tpu.memory_space<vmem>>, %arg7: memref<32x32xf32, #tpu.memory_space<vmem>>, %arg8: memref<32x32xf32, #tpu.memory_space<vmem>>, %arg9: memref<32x32xf32, #tpu.memory_space<vmem>>, %arg10: memref<1x32xf32, #tpu.memory_space<vmem>>, %arg11: memref<1x32xf32, #tpu.memory_space<vmem>>, %arg12: memref<1x32xf32, #tpu.memory_space<vmem>>, %arg13: memref<1x32xf32, #tpu.memory_space<vmem>>, %arg14: memref<32x32xf32, #tpu.memory_space<vmem>>, %arg15: memref<32x16xf32, #tpu.memory_space<vmem>>, %arg16: memref<16x8xf32, #tpu.memory_space<vmem>>, %arg17: memref<8x128xf32, #tpu.memory_space<vmem>>, %arg18: memref<1x32xf32, #tpu.memory_space<vmem>>, %arg19: memref<1x16xf32, #tpu.memory_space<vmem>>, %arg20: memref<1x8xf32, #tpu.memory_space<vmem>>, %arg21: memref<1x128xf32, #tpu.memory_space<vmem>>, %arg22: memref<8x128xf32, #tpu.memory_space<vmem>>, %arg23: memref<8x32xf32, #tpu.memory_space<vmem>>) attributes {dimension_semantics = [#tpu.dimension_semantics<parallel>, #tpu.dimension_semantics<arbitrary>], iteration_bounds = array<i64: 2, 2>, scalar_prefetch = 0 : i64, scratch_operands = 1 : i64, tpu.core_type = #tpu.core_type<tc>, window_params = [{transform_indices = @transform_0, window_bounds = array<i64: 8, 8, 128>}, {transform_indices = @transform_1, window_bounds = array<i64: 8, 32>}, {transform_indices = @transform_2, window_bounds = array<i64: 8, 32>}, {pipeline_mode = #tpu.pipeline_mode<synchronous>, transform_indices = @transform_3, window_bounds = array<i64: 128, 32>}, {pipeline_mode = #tpu.pipeline_mode<synchronous>, transform_indices = @transform_4, window_bounds = array<i64: 32, 32>}, {pipeline_mode = #tpu.pipeline_mode<synchronous>, transform_indices = @transform_5, window_bounds = array<i64: 32, 32>}, {pipeline_mode = #tpu.pipeline_mode<synchronous>, transform_indices = @transform_6, window_bounds = array<i64: 32, 32>}, {pipeline_mode = #tpu.pipeline_mode<synchronous>, transform_indices = @transform_7, window_bounds = array<i64: 32, 32>}, {pipeline_mode = #tpu.pipeline_mode<synchronous>, transform_indices = @transform_8, window_bounds = array<i64: 1, 32>}, {pipeline_mode = #tpu.pipeline_mode<synchronous>, transform_indices = @transform_9, window_bounds = array<i64: 1, 32>}, {pipeline_mode = #tpu.pipeline_mode<synchronous>, transform_indices = @transform_10, window_bounds = array<i64: 1, 32>}, {pipeline_mode = #tpu.pipeline_mode<synchronous>, transform_indices = @transform_11, window_bounds = array<i64: 1, 32>}, {pipeline_mode = #tpu.pipeline_mode<synchronous>, transform_indices = @transform_12, window_bounds = array<i64: 32, 32>}, {pipeline_mode = #tpu.pipeline_mode<synchronous>, transform_indices = @transform_13, window_bounds = array<i64: 32, 16>}, {pipeline_mode = #tpu.pipeline_mode<synchronous>, transform_indices = @transform_14, window_bounds = array<i64: 16, 8>}, {pipeline_mode = #tpu.pipeline_mode<synchronous>, transform_indices = @transform_15, window_bounds = array<i64: 8, 128>}, {pipeline_mode = #tpu.pipeline_mode<synchronous>, transform_indices = @transform_16, window_bounds = array<i64: 1, 32>}, {pipeline_mode = #tpu.pipeline_mode<synchronous>, transform_indices = @transform_17, window_bounds = array<i64: 1, 16>}, {pipeline_mode = #tpu.pipeline_mode<synchronous>, transform_indices = @transform_18, window_bounds = array<i64: 1, 8>}, {pipeline_mode = #tpu.pipeline_mode<synchronous>, transform_indices = @transform_19, window_bounds = array<i64: 1, 128>}, {transform_indices = @transform_20, window_bounds = array<i64: 8, 128>}]} {
    %c0 = arith.constant 0 : index
    %c0_0 = arith.constant 0 : index
    %c0_1 = arith.constant 0 : index
    %0 = vector.load %arg2[%c0, %c0_0, %c0_1] : memref<8x8x128xf32, #tpu.memory_space<vmem>>, vector<8x8x128xf32>
    %1 = vector.shape_cast %0 : vector<8x8x128xf32> to vector<64x128xf32>
    %c0_2 = arith.constant 0 : index
    %c0_3 = arith.constant 0 : index
    %2 = vector.load %arg5[%c0_2, %c0_3] : memref<128x32xf32, #tpu.memory_space<vmem>>, vector<128x32xf32>
    %cst = arith.constant dense<0.000000e+00> : vector<64x32xf32>
    %3 = tpu.matmul %1, %2, %cst {dimension_numbers = #tpu.dot_dimension_numbers<[1], [0], [0], [1], [0, 0, 1, 1], [], []>} : vector<64x128xf32>, vector<128x32xf32>, vector<64x32xf32> -> vector<64x32xf32>
    %4 = vector.shape_cast %3 : vector<64x32xf32> to vector<8x8x32xf32>
    %c0_4 = arith.constant 0 : index
    %c0_5 = arith.constant 0 : index
    %5 = vector.load %arg3[%c0_4, %c0_5] : memref<8x32xf32, #tpu.memory_space<vmem>>, vector<8x32xf32>
    %6 = vector.shape_cast %5 : vector<8x32xf32> to vector<1x8x32xf32>
    %7 = vector.broadcast %6 : vector<1x8x32xf32> to vector<8x8x32xf32>
    %8 = arith.addf %4, %7 : vector<8x8x32xf32>
    %c0_6 = arith.constant 0 : index
    %c0_7 = arith.constant 0 : index
    %9 = vector.load %arg4[%c0_6, %c0_7] : memref<8x32xf32, #tpu.memory_space<vmem>>, vector<8x32xf32>
    %10 = vector.shape_cast %9 : vector<8x32xf32> to vector<8x1x32xf32>
    %11 = vector.broadcast %10 : vector<8x1x32xf32> to vector<8x8x32xf32>
    %12 = arith.addf %8, %11 : vector<8x8x32xf32>
    %cst_8 = arith.constant 0.000000e+00 : f32
    %13 = vector.broadcast %cst_8 : f32 to vector<8x8x32xf32>
    %14 = arith.maximumf %12, %13 : vector<8x8x32xf32>
    %15 = vector.shape_cast %14 : vector<8x8x32xf32> to vector<64x32xf32>
    %c0_9 = arith.constant 0 : index
    %c0_10 = arith.constant 0 : index
    %16 = vector.load %arg6[%c0_9, %c0_10] : memref<32x32xf32, #tpu.memory_space<vmem>>, vector<32x32xf32>
    %cst_11 = arith.constant dense<0.000000e+00> : vector<64x32xf32>
    %17 = tpu.matmul %15, %16, %cst_11 {dimension_numbers = #tpu.dot_dimension_numbers<[1], [0], [0], [1], [0, 0, 1, 1], [], []>} : vector<64x32xf32>, vector<32x32xf32>, vector<64x32xf32> -> vector<64x32xf32>
    %c0_12 = arith.constant 0 : index
    %c0_13 = arith.constant 0 : index
    %18 = vector.load %arg10[%c0_12, %c0_13] : memref<1x32xf32, #tpu.memory_space<vmem>>, vector<1x32xf32>
    %19 = vector.broadcast %18 : vector<1x32xf32> to vector<64x32xf32>
    %20 = arith.addf %17, %19 : vector<64x32xf32>
    %cst_14 = arith.constant 0.000000e+00 : f32
    %21 = vector.broadcast %cst_14 : f32 to vector<64x32xf32>
    %22 = arith.maximumf %20, %21 : vector<64x32xf32>
    %c0_15 = arith.constant 0 : index
    %c0_16 = arith.constant 0 : index
    %23 = vector.load %arg7[%c0_15, %c0_16] : memref<32x32xf32, #tpu.memory_space<vmem>>, vector<32x32xf32>
    %cst_17 = arith.constant dense<0.000000e+00> : vector<64x32xf32>
    %24 = tpu.matmul %22, %23, %cst_17 {dimension_numbers = #tpu.dot_dimension_numbers<[1], [0], [0], [1], [0, 0, 1, 1], [], []>} : vector<64x32xf32>, vector<32x32xf32>, vector<64x32xf32> -> vector<64x32xf32>
    %c0_18 = arith.constant 0 : index
    %c0_19 = arith.constant 0 : index
    %25 = vector.load %arg11[%c0_18, %c0_19] : memref<1x32xf32, #tpu.memory_space<vmem>>, vector<1x32xf32>
    %26 = vector.broadcast %25 : vector<1x32xf32> to vector<64x32xf32>
    %27 = arith.addf %24, %26 : vector<64x32xf32>
    %cst_20 = arith.constant 0.000000e+00 : f32
    %28 = vector.broadcast %cst_20 : f32 to vector<64x32xf32>
    %29 = arith.maximumf %27, %28 : vector<64x32xf32>
    %c0_21 = arith.constant 0 : index
    %c0_22 = arith.constant 0 : index
    %30 = vector.load %arg8[%c0_21, %c0_22] : memref<32x32xf32, #tpu.memory_space<vmem>>, vector<32x32xf32>
    %cst_23 = arith.constant dense<0.000000e+00> : vector<64x32xf32>
    %31 = tpu.matmul %29, %30, %cst_23 {dimension_numbers = #tpu.dot_dimension_numbers<[1], [0], [0], [1], [0, 0, 1, 1], [], []>} : vector<64x32xf32>, vector<32x32xf32>, vector<64x32xf32> -> vector<64x32xf32>
    %c0_24 = arith.constant 0 : index
    %c0_25 = arith.constant 0 : index
    %32 = vector.load %arg12[%c0_24, %c0_25] : memref<1x32xf32, #tpu.memory_space<vmem>>, vector<1x32xf32>
    %33 = vector.broadcast %32 : vector<1x32xf32> to vector<64x32xf32>
    %34 = arith.addf %31, %33 : vector<64x32xf32>
    %cst_26 = arith.constant 0.000000e+00 : f32
    %35 = vector.broadcast %cst_26 : f32 to vector<64x32xf32>
    %36 = arith.maximumf %34, %35 : vector<64x32xf32>
    %c0_27 = arith.constant 0 : index
    %c0_28 = arith.constant 0 : index
    %37 = vector.load %arg9[%c0_27, %c0_28] : memref<32x32xf32, #tpu.memory_space<vmem>>, vector<32x32xf32>
    %cst_29 = arith.constant dense<0.000000e+00> : vector<64x32xf32>
    %38 = tpu.matmul %36, %37, %cst_29 {dimension_numbers = #tpu.dot_dimension_numbers<[1], [0], [0], [1], [0, 0, 1, 1], [], []>} : vector<64x32xf32>, vector<32x32xf32>, vector<64x32xf32> -> vector<64x32xf32>
    %c0_30 = arith.constant 0 : index
    %c0_31 = arith.constant 0 : index
    %39 = vector.load %arg13[%c0_30, %c0_31] : memref<1x32xf32, #tpu.memory_space<vmem>>, vector<1x32xf32>
    %40 = vector.broadcast %39 : vector<1x32xf32> to vector<64x32xf32>
    %41 = arith.addf %38, %40 : vector<64x32xf32>
    %42 = vector.shape_cast %41 : vector<64x32xf32> to vector<8x8x32xf32>
    %cst_32 = arith.constant dense<0xFF800000> : vector<8x32xf32>
    %43 = vector.multi_reduction <maximumf>, %42, %cst_32 [1] : vector<8x8x32xf32> to vector<8x32xf32>
    %c0_i32 = arith.constant 0 : i32
    %44 = arith.cmpi eq, %arg1, %c0_i32 : i32
    %45 = arith.extui %44 : i1 to i32
    %c0_i32_33 = arith.constant 0 : i32
    %46 = arith.cmpi ne, %45, %c0_i32_33 : i32
    scf.if %46 {
      %cst_39 = arith.constant 0xFF800000 : f32
      %53 = vector.broadcast %cst_39 : f32 to vector<8x32xf32>
      %c0_40 = arith.constant 0 : index
      %c0_41 = arith.constant 0 : index
      %54 = vector.load %arg23[%c0_40, %c0_41] : memref<8x32xf32, #tpu.memory_space<vmem>>, vector<8x32xf32>
      tpu.vector_store %arg23[%c0_40, %c0_41], %53 {strides = array<i32>} : memref<8x32xf32, #tpu.memory_space<vmem>>, vector<8x32xf32>,
    } else {
    }
    %c0_34 = arith.constant 0 : index
    %c0_35 = arith.constant 0 : index
    %47 = vector.load %arg23[%c0_34, %c0_35] : memref<8x32xf32, #tpu.memory_space<vmem>>, vector<8x32xf32>
    %48 = arith.maximumf %47, %43 : vector<8x32xf32>
    %c0_36 = arith.constant 0 : index
    %c0_37 = arith.constant 0 : index
    %49 = vector.load %arg23[%c0_36, %c0_37] : memref<8x32xf32, #tpu.memory_space<vmem>>, vector<8x32xf32>
    tpu.vector_store %arg23[%c0_36, %c0_37], %48 {strides = array<i32>} : memref<8x32xf32, #tpu.memory_space<vmem>>, vector<8x32xf32>,
    %c1_i32 = arith.constant 1 : i32
    %50 = arith.cmpi eq, %arg1, %c1_i32 : i32
    %51 = arith.extui %50 : i1 to i32
    %c0_i32_38 = arith.constant 0 : i32
    %52 = arith.cmpi ne, %51, %c0_i32_38 : i32
    scf.if %52 {
      %c0_39 = arith.constant 0 : index
      %c0_40 = arith.constant 0 : index
      %53 = vector.load %arg23[%c0_39, %c0_40] : memref<8x32xf32, #tpu.memory_space<vmem>>, vector<8x32xf32>
      %c0_41 = arith.constant 0 : index
      %c0_42 = arith.constant 0 : index
      %54 = vector.load %arg14[%c0_41, %c0_42] : memref<32x32xf32, #tpu.memory_space<vmem>>, vector<32x32xf32>
      %cst_43 = arith.constant dense<0.000000e+00> : vector<8x32xf32>
      %55 = tpu.matmul %53, %54, %cst_43 {dimension_numbers = #tpu.dot_dimension_numbers<[1], [0], [0], [1], [0, 0, 1, 1], [], []>} : vector<8x32xf32>, vector<32x32xf32>, vector<8x32xf32> -> vector<8x32xf32>
      %c0_44 = arith.constant 0 : index
      %c0_45 = arith.constant 0 : index
      %56 = vector.load %arg18[%c0_44, %c0_45] : memref<1x32xf32, #tpu.memory_space<vmem>>, vector<1x32xf32>
      %57 = vector.broadcast %56 : vector<1x32xf32> to vector<8x32xf32>
      %58 = arith.addf %55, %57 : vector<8x32xf32>
      %cst_46 = arith.constant 0.000000e+00 : f32
      %59 = vector.broadcast %cst_46 : f32 to vector<8x32xf32>
      %60 = arith.maximumf %58, %59 : vector<8x32xf32>
      %c0_47 = arith.constant 0 : index
      %c0_48 = arith.constant 0 : index
      %61 = vector.load %arg15[%c0_47, %c0_48] : memref<32x16xf32, #tpu.memory_space<vmem>>, vector<32x16xf32>
      %cst_49 = arith.constant dense<0.000000e+00> : vector<8x16xf32>
      %62 = tpu.matmul %60, %61, %cst_49 {dimension_numbers = #tpu.dot_dimension_numbers<[1], [0], [0], [1], [0, 0, 1, 1], [], []>} : vector<8x32xf32>, vector<32x16xf32>, vector<8x16xf32> -> vector<8x16xf32>
      %c0_50 = arith.constant 0 : index
      %c0_51 = arith.constant 0 : index
      %63 = vector.load %arg19[%c0_50, %c0_51] : memref<1x16xf32, #tpu.memory_space<vmem>>, vector<1x16xf32>
      %64 = vector.broadcast %63 : vector<1x16xf32> to vector<8x16xf32>
      %65 = arith.addf %62, %64 : vector<8x16xf32>
      %cst_52 = arith.constant 0.000000e+00 : f32
      %66 = vector.broadcast %cst_52 : f32 to vector<8x16xf32>
      %67 = arith.maximumf %65, %66 : vector<8x16xf32>
      %c0_53 = arith.constant 0 : index
      %c0_54 = arith.constant 0 : index
      %68 = vector.load %arg16[%c0_53, %c0_54] : memref<16x8xf32, #tpu.memory_space<vmem>>, vector<16x8xf32>
      %cst_55 = arith.constant dense<0.000000e+00> : vector<8x8xf32>
      %69 = tpu.matmul %67, %68, %cst_55 {dimension_numbers = #tpu.dot_dimension_numbers<[1], [0], [0], [1], [0, 0, 1, 1], [], []>} : vector<8x16xf32>, vector<16x8xf32>, vector<8x8xf32> -> vector<8x8xf32>
      %c0_56 = arith.constant 0 : index
      %c0_57 = arith.constant 0 : index
      %70 = vector.load %arg20[%c0_56, %c0_57] : memref<1x8xf32, #tpu.memory_space<vmem>>, vector<1x8xf32>
      %71 = vector.broadcast %70 : vector<1x8xf32> to vector<8x8xf32>
      %72 = arith.addf %69, %71 : vector<8x8xf32>
      %cst_58 = arith.constant 0.000000e+00 : f32
      %73 = vector.broadcast %cst_58 : f32 to vector<8x8xf32>
      %74 = arith.maximumf %72, %73 : vector<8x8xf32>
      %c0_59 = arith.constant 0 : index
      %c0_60 = arith.constant 0 : index
      %75 = vector.load %arg17[%c0_59, %c0_60] : memref<8x128xf32, #tpu.memory_space<vmem>>, vector<8x128xf32>
      %cst_61 = arith.constant dense<0.000000e+00> : vector<8x128xf32>
      %76 = tpu.matmul %74, %75, %cst_61 {dimension_numbers = #tpu.dot_dimension_numbers<[1], [0], [0], [1], [0, 0, 1, 1], [], []>} : vector<8x8xf32>, vector<8x128xf32>, vector<8x128xf32> -> vector<8x128xf32>
      %c0_62 = arith.constant 0 : index
      %c0_63 = arith.constant 0 : index
      %77 = vector.load %arg21[%c0_62, %c0_63] : memref<1x128xf32, #tpu.memory_space<vmem>>, vector<1x128xf32>
      %78 = vector.broadcast %77 : vector<1x128xf32> to vector<8x128xf32>
      %79 = arith.addf %76, %78 : vector<8x128xf32>
      %c0_64 = arith.constant 0 : index
      %c0_65 = arith.constant 0 : index
      %80 = vector.load %arg22[%c0_64, %c0_65] : memref<8x128xf32, #tpu.memory_space<vmem>>, vector<8x128xf32>
      tpu.vector_store %arg22[%c0_64, %c0_65], %79 {strides = array<i32>} : memref<8x128xf32, #tpu.memory_space<vmem>>, vector<8x128xf32>,
    } else {
    }
    return
  }
  func.func @transform_0(%arg0: i32, %arg1: i32) -> (i32, i32, i32) {
    %c0_i32 = arith.constant 0 : i32
    %c0_i32_0 = arith.constant 0 : i32
    return %arg0, %arg1, %c0_i32 : i32, i32, i32
  }
  func.func @transform_1(%arg0: i32, %arg1: i32) -> (i32, i32) {
    %c0_i32 = arith.constant 0 : i32
    %c0_i32_0 = arith.constant 0 : i32
    return %arg1, %c0_i32 : i32, i32
  }
  func.func @transform_2(%arg0: i32, %arg1: i32) -> (i32, i32) {
    %c0_i32 = arith.constant 0 : i32
    %c0_i32_0 = arith.constant 0 : i32
    return %arg0, %c0_i32 : i32, i32
  }
  func.func @transform_3(%arg0: i32, %arg1: i32) -> (i32, i32) {
    %c0_i32 = arith.constant 0 : i32
    %c0_i32_0 = arith.constant 0 : i32
    %c0_i32_1 = arith.constant 0 : i32
    return %c0_i32, %c0_i32_0 : i32, i32
  }
  func.func @transform_4(%arg0: i32, %arg1: i32) -> (i32, i32) {
    %c0_i32 = arith.constant 0 : i32
    %c0_i32_0 = arith.constant 0 : i32
    %c0_i32_1 = arith.constant 0 : i32
    return %c0_i32, %c0_i32_0 : i32, i32
  }
  func.func @transform_5(%arg0: i32, %arg1: i32) -> (i32, i32) {
    %c0_i32 = arith.constant 0 : i32
    %c0_i32_0 = arith.constant 0 : i32
    %c0_i32_1 = arith.constant 0 : i32
    return %c0_i32, %c0_i32_0 : i32, i32
  }
  func.func @transform_6(%arg0: i32, %arg1: i32) -> (i32, i32) {
    %c0_i32 = arith.constant 0 : i32
    %c0_i32_0 = arith.constant 0 : i32
    %c0_i32_1 = arith.constant 0 : i32
    return %c0_i32, %c0_i32_0 : i32, i32
  }
  func.func @transform_7(%arg0: i32, %arg1: i32) -> (i32, i32) {
    %c0_i32 = arith.constant 0 : i32
    %c0_i32_0 = arith.constant 0 : i32
    %c0_i32_1 = arith.constant 0 : i32
    return %c0_i32, %c0_i32_0 : i32, i32
  }
  func.func @transform_8(%arg0: i32, %arg1: i32) -> (i32, i32) {
    %c0_i32 = arith.constant 0 : i32
    %c0_i32_0 = arith.constant 0 : i32
    %c0_i32_1 = arith.constant 0 : i32
    return %c0_i32, %c0_i32_0 : i32, i32
  }
  func.func @transform_9(%arg0: i32, %arg1: i32) -> (i32, i32) {
    %c0_i32 = arith.constant 0 : i32
    %c0_i32_0 = arith.constant 0 : i32
    %c0_i32_1 = arith.constant 0 : i32
    return %c0_i32, %c0_i32_0 : i32, i32
  }
  func.func @transform_10(%arg0: i32, %arg1: i32) -> (i32, i32) {
    %c0_i32 = arith.constant 0 : i32
    %c0_i32_0 = arith.constant 0 : i32
    %c0_i32_1 = arith.constant 0 : i32
    return %c0_i32, %c0_i32_0 : i32, i32
  }
  func.func @transform_11(%arg0: i32, %arg1: i32) -> (i32, i32) {
    %c0_i32 = arith.constant 0 : i32
    %c0_i32_0 = arith.constant 0 : i32
    %c0_i32_1 = arith.constant 0 : i32
    return %c0_i32, %c0_i32_0 : i32, i32
  }
  func.func @transform_12(%arg0: i32, %arg1: i32) -> (i32, i32) {
    %c0_i32 = arith.constant 0 : i32
    %c0_i32_0 = arith.constant 0 : i32
    %c0_i32_1 = arith.constant 0 : i32
    return %c0_i32, %c0_i32_0 : i32, i32
  }
  func.func @transform_13(%arg0: i32, %arg1: i32) -> (i32, i32) {
    %c0_i32 = arith.constant 0 : i32
    %c0_i32_0 = arith.constant 0 : i32
    %c0_i32_1 = arith.constant 0 : i32
    return %c0_i32, %c0_i32_0 : i32, i32
  }
  func.func @transform_14(%arg0: i32, %arg1: i32) -> (i32, i32) {
    %c0_i32 = arith.constant 0 : i32
    %c0_i32_0 = arith.constant 0 : i32
    %c0_i32_1 = arith.constant 0 : i32
    return %c0_i32, %c0_i32_0 : i32, i32
  }
  func.func @transform_15(%arg0: i32, %arg1: i32) -> (i32, i32) {
    %c0_i32 = arith.constant 0 : i32
    %c0_i32_0 = arith.constant 0 : i32
    %c0_i32_1 = arith.constant 0 : i32
    return %c0_i32, %c0_i32_0 : i32, i32
  }
  func.func @transform_16(%arg0: i32, %arg1: i32) -> (i32, i32) {
    %c0_i32 = arith.constant 0 : i32
    %c0_i32_0 = arith.constant 0 : i32
    %c0_i32_1 = arith.constant 0 : i32
    return %c0_i32, %c0_i32_0 : i32, i32
  }
  func.func @transform_17(%arg0: i32, %arg1: i32) -> (i32, i32) {
    %c0_i32 = arith.constant 0 : i32
    %c0_i32_0 = arith.constant 0 : i32
    %c0_i32_1 = arith.constant 0 : i32
    return %c0_i32, %c0_i32_0 : i32, i32
  }
  func.func @transform_18(%arg0: i32, %arg1: i32) -> (i32, i32) {
    %c0_i32 = arith.constant 0 : i32
    %c0_i32_0 = arith.constant 0 : i32
    %c0_i32_1 = arith.constant 0 : i32
    return %c0_i32, %c0_i32_0 : i32, i32
  }
  func.func @transform_19(%arg0: i32, %arg1: i32) -> (i32, i32) {
    %c0_i32 = arith.constant 0 : i32
    %c0_i32_0 = arith.constant 0 : i32
    %c0_i32_1 = arith.constant 0 : i32
    return %c0_i32, %c0_i32_0 : i32, i32
  }
  func.func @transform_20(%arg0: i32, %arg1: i32) -> (i32, i32) {
    %c0_i32 = arith.constant 0 : i32
    %c0_i32_0 = arith.constant 0 : i32
    return %arg0, %c0_i32 : i32, i32
  }
}

module attributes {stable_mosaic.version = 11 : i64} {
  func.func @kfe_kernel(%arg0: i32, %arg1: i32, %arg2: memref<8x8x128xf32, #tpu.memory_space<vmem>>, %arg3: memref<8x32xf32, #tpu.memory_space<vmem>>, %arg4: memref<8x32xf32, #tpu.memory_space<vmem>>, %arg5: memref<128x32xf32, #tpu.memory_space<vmem>>, %arg6: memref<32x32xf32, #tpu.memory_space<vmem>>, %arg7: memref<32x32xf32, #tpu.memory_space<vmem>>, %arg8: memref<32x32xf32, #tpu.memory_space<vmem>>, %arg9: memref<32x32xf32, #tpu.memory_space<vmem>>, %arg10: memref<1x32xf32, #tpu.memory_space<vmem>>, %arg11: memref<1x32xf32, #tpu.memory_space<vmem>>, %arg12: memref<1x32xf32, #tpu.memory_space<vmem>>, %arg13: memref<1x32xf32, #tpu.memory_space<vmem>>, %arg14: memref<32x32xf32, #tpu.memory_space<vmem>>, %arg15: memref<32x16xf32, #tpu.memory_space<vmem>>, %arg16: memref<16x8xf32, #tpu.memory_space<vmem>>, %arg17: memref<8x128xf32, #tpu.memory_space<vmem>>, %arg18: memref<1x32xf32, #tpu.memory_space<vmem>>, %arg19: memref<1x16xf32, #tpu.memory_space<vmem>>, %arg20: memref<1x8xf32, #tpu.memory_space<vmem>>, %arg21: memref<1x128xf32, #tpu.memory_space<vmem>>, %arg22: memref<8x128xf32, #tpu.memory_space<vmem>>, %arg23: memref<8x32xf32, #tpu.memory_space<vmem>>) attributes {dimension_semantics = [#tpu.dimension_semantics<parallel>, #tpu.dimension_semantics<arbitrary>], iteration_bounds = array<i64: 2, 2>, scalar_prefetch = 0 : i64, scratch_operands = 1 : i64, tpu.core_type = #tpu.core_type<tc>, window_params = [{transform_indices = @transform_0, window_bounds = array<i64: 8, 8, 128>}, {transform_indices = @transform_1, window_bounds = array<i64: 8, 32>}, {transform_indices = @transform_2, window_bounds = array<i64: 8, 32>}, {pipeline_mode = #tpu.pipeline_mode<synchronous>, transform_indices = @transform_3, window_bounds = array<i64: 128, 32>}, {pipeline_mode = #tpu.pipeline_mode<synchronous>, transform_indices = @transform_4, window_bounds = array<i64: 32, 32>}, {pipeline_mode = #tpu.pipeline_mode<synchronous>, transform_indices = @transform_5, window_bounds = array<i64: 32, 32>}, {pipeline_mode = #tpu.pipeline_mode<synchronous>, transform_indices = @transform_6, window_bounds = array<i64: 32, 32>}, {pipeline_mode = #tpu.pipeline_mode<synchronous>, transform_indices = @transform_7, window_bounds = array<i64: 32, 32>}, {pipeline_mode = #tpu.pipeline_mode<synchronous>, transform_indices = @transform_8, window_bounds = array<i64: 1, 32>}, {pipeline_mode = #tpu.pipeline_mode<synchronous>, transform_indices = @transform_9, window_bounds = array<i64: 1, 32>}, {pipeline_mode = #tpu.pipeline_mode<synchronous>, transform_indices = @transform_10, window_bounds = array<i64: 1, 32>}, {pipeline_mode = #tpu.pipeline_mode<synchronous>, transform_indices = @transform_11, window_bounds = array<i64: 1, 32>}, {pipeline_mode = #tpu.pipeline_mode<synchronous>, transform_indices = @transform_12, window_bounds = array<i64: 32, 32>}, {pipeline_mode = #tpu.pipeline_mode<synchronous>, transform_indices = @transform_13, window_bounds = array<i64: 32, 16>}, {pipeline_mode = #tpu.pipeline_mode<synchronous>, transform_indices = @transform_14, window_bounds = array<i64: 16, 8>}, {pipeline_mode = #tpu.pipeline_mode<synchronous>, transform_indices = @transform_15, window_bounds = array<i64: 8, 128>}, {pipeline_mode = #tpu.pipeline_mode<synchronous>, transform_indices = @transform_16, window_bounds = array<i64: 1, 32>}, {pipeline_mode = #tpu.pipeline_mode<synchronous>, transform_indices = @transform_17, window_bounds = array<i64: 1, 16>}, {pipeline_mode = #tpu.pipeline_mode<synchronous>, transform_indices = @transform_18, window_bounds = array<i64: 1, 8>}, {pipeline_mode = #tpu.pipeline_mode<synchronous>, transform_indices = @transform_19, window_bounds = array<i64: 1, 128>}, {transform_indices = @transform_20, window_bounds = array<i64: 8, 128>}]} {
    %c0 = arith.constant 0 : index
    %c0_0 = arith.constant 0 : index
    %c0_1 = arith.constant 0 : index
    %0 = vector.load %arg2[%c0, %c0_0, %c0_1] : memref<8x8x128xf32, #tpu.memory_space<vmem>>, vector<8x8x128xf32>
    %1 = vector.shape_cast %0 : vector<8x8x128xf32> to vector<64x128xf32>
    %c0_2 = arith.constant 0 : index
    %c0_3 = arith.constant 0 : index
    %2 = vector.load %arg5[%c0_2, %c0_3] : memref<128x32xf32, #tpu.memory_space<vmem>>, vector<128x32xf32>
    %cst = arith.constant dense<0.000000e+00> : vector<64x32xf32>
    %3 = tpu.matmul %1, %2, %cst {dimension_numbers = #tpu.dot_dimension_numbers<[1], [0], [0], [1], [0, 0, 1, 1], [], []>} : vector<64x128xf32>, vector<128x32xf32>, vector<64x32xf32> -> vector<64x32xf32>
    %4 = vector.shape_cast %3 : vector<64x32xf32> to vector<8x8x32xf32>
    %c0_4 = arith.constant 0 : index
    %c0_5 = arith.constant 0 : index
    %5 = vector.load %arg3[%c0_4, %c0_5] : memref<8x32xf32, #tpu.memory_space<vmem>>, vector<8x32xf32>
    %6 = vector.shape_cast %5 : vector<8x32xf32> to vector<1x8x32xf32>
    %7 = vector.broadcast %6 : vector<1x8x32xf32> to vector<8x8x32xf32>
    %8 = arith.addf %4, %7 : vector<8x8x32xf32>
    %c0_6 = arith.constant 0 : index
    %c0_7 = arith.constant 0 : index
    %9 = vector.load %arg4[%c0_6, %c0_7] : memref<8x32xf32, #tpu.memory_space<vmem>>, vector<8x32xf32>
    %10 = vector.shape_cast %9 : vector<8x32xf32> to vector<8x1x32xf32>
    %11 = vector.broadcast %10 : vector<8x1x32xf32> to vector<8x8x32xf32>
    %12 = arith.addf %8, %11 : vector<8x8x32xf32>
    %cst_8 = arith.constant 0.000000e+00 : f32
    %13 = vector.broadcast %cst_8 : f32 to vector<8x8x32xf32>
    %14 = arith.maximumf %12, %13 : vector<8x8x32xf32>
    %15 = vector.shape_cast %14 : vector<8x8x32xf32> to vector<64x32xf32>
    %c0_9 = arith.constant 0 : index
    %c0_10 = arith.constant 0 : index
    %16 = vector.load %arg6[%c0_9, %c0_10] : memref<32x32xf32, #tpu.memory_space<vmem>>, vector<32x32xf32>
    %cst_11 = arith.constant dense<0.000000e+00> : vector<64x32xf32>
    %17 = tpu.matmul %15, %16, %cst_11 {dimension_numbers = #tpu.dot_dimension_numbers<[1], [0], [0], [1], [0, 0, 1, 1], [], []>} : vector<64x32xf32>, vector<32x32xf32>, vector<64x32xf32> -> vector<64x32xf32>
    %c0_12 = arith.constant 0 : index
    %c0_13 = arith.constant 0 : index
    %18 = vector.load %arg10[%c0_12, %c0_13] : memref<1x32xf32, #tpu.memory_space<vmem>>, vector<1x32xf32>
    %19 = vector.broadcast %18 : vector<1x32xf32> to vector<64x32xf32>
    %20 = arith.addf %17, %19 : vector<64x32xf32>
    %cst_14 = arith.constant 0.000000e+00 : f32
    %21 = vector.broadcast %cst_14 : f32 to vector<64x32xf32>
    %22 = arith.maximumf %20, %21 : vector<64x32xf32>
    %c0_15 = arith.constant 0 : index
    %c0_16 = arith.constant 0 : index
    %23 = vector.load %arg7[%c0_15, %c0_16] : memref<32x32xf32, #tpu.memory_space<vmem>>, vector<32x32xf32>
    %cst_17 = arith.constant dense<0.000000e+00> : vector<64x32xf32>
    %24 = tpu.matmul %22, %23, %cst_17 {dimension_numbers = #tpu.dot_dimension_numbers<[1], [0], [0], [1], [0, 0, 1, 1], [], []>} : vector<64x32xf32>, vector<32x32xf32>, vector<64x32xf32> -> vector<64x32xf32>
    %c0_18 = arith.constant 0 : index
    %c0_19 = arith.constant 0 : index
    %25 = vector.load %arg11[%c0_18, %c0_19] : memref<1x32xf32, #tpu.memory_space<vmem>>, vector<1x32xf32>
    %26 = vector.broadcast %25 : vector<1x32xf32> to vector<64x32xf32>
    %27 = arith.addf %24, %26 : vector<64x32xf32>
    %cst_20 = arith.constant 0.000000e+00 : f32
    %28 = vector.broadcast %cst_20 : f32 to vector<64x32xf32>
    %29 = arith.maximumf %27, %28 : vector<64x32xf32>
    %c0_21 = arith.constant 0 : index
    %c0_22 = arith.constant 0 : index
    %30 = vector.load %arg8[%c0_21, %c0_22] : memref<32x32xf32, #tpu.memory_space<vmem>>, vector<32x32xf32>
    %cst_23 = arith.constant dense<0.000000e+00> : vector<64x32xf32>
    %31 = tpu.matmul %29, %30, %cst_23 {dimension_numbers = #tpu.dot_dimension_numbers<[1], [0], [0], [1], [0, 0, 1, 1], [], []>} : vector<64x32xf32>, vector<32x32xf32>, vector<64x32xf32> -> vector<64x32xf32>
    %c0_24 = arith.constant 0 : index
    %c0_25 = arith.constant 0 : index
    %32 = vector.load %arg12[%c0_24, %c0_25] : memref<1x32xf32, #tpu.memory_space<vmem>>, vector<1x32xf32>
    %33 = vector.broadcast %32 : vector<1x32xf32> to vector<64x32xf32>
    %34 = arith.addf %31, %33 : vector<64x32xf32>
    %cst_26 = arith.constant 0.000000e+00 : f32
    %35 = vector.broadcast %cst_26 : f32 to vector<64x32xf32>
    %36 = arith.maximumf %34, %35 : vector<64x32xf32>
    %c0_27 = arith.constant 0 : index
    %c0_28 = arith.constant 0 : index
    %37 = vector.load %arg9[%c0_27, %c0_28] : memref<32x32xf32, #tpu.memory_space<vmem>>, vector<32x32xf32>
    %cst_29 = arith.constant dense<0.000000e+00> : vector<64x32xf32>
    %38 = tpu.matmul %36, %37, %cst_29 {dimension_numbers = #tpu.dot_dimension_numbers<[1], [0], [0], [1], [0, 0, 1, 1], [], []>} : vector<64x32xf32>, vector<32x32xf32>, vector<64x32xf32> -> vector<64x32xf32>
    %c0_30 = arith.constant 0 : index
    %c0_31 = arith.constant 0 : index
    %39 = vector.load %arg13[%c0_30, %c0_31] : memref<1x32xf32, #tpu.memory_space<vmem>>, vector<1x32xf32>
    %40 = vector.broadcast %39 : vector<1x32xf32> to vector<64x32xf32>
    %41 = arith.addf %38, %40 : vector<64x32xf32>
    %42 = vector.shape_cast %41 : vector<64x32xf32> to vector<8x8x32xf32>
    %cst_32 = arith.constant dense<0xFF800000> : vector<8x32xf32>
    %43 = vector.multi_reduction <maximumf>, %42, %cst_32 [1] : vector<8x8x32xf32> to vector<8x32xf32>
    %c0_i32 = arith.constant 0 : i32
    %44 = arith.cmpi eq, %arg1, %c0_i32 : i32
    %45 = arith.extui %44 : i1 to i32
    %c0_i32_33 = arith.constant 0 : i32
    %46 = arith.cmpi ne, %45, %c0_i32_33 : i32
    scf.if %46 {
      %cst_39 = arith.constant 0xFF800000 : f32
      %53 = vector.broadcast %cst_39 : f32 to vector<8x32xf32>
      %c0_40 = arith.constant 0 : index
      %c0_41 = arith.constant 0 : index
      %54 = vector.load %arg23[%c0_40, %c0_41] : memref<8x32xf32, #tpu.memory_space<vmem>>, vector<8x32xf32>
      tpu.vector_store %arg23[%c0_40, %c0_41], %53 {strides = array<i32>} : memref<8x32xf32, #tpu.memory_space<vmem>>, vector<8x32xf32>,
    } else {
    }
    %c0_34 = arith.constant 0 : index
    %c0_35 = arith.constant 0 : index
    %47 = vector.load %arg23[%c0_34, %c0_35] : memref<8x32xf32, #tpu.memory_space<vmem>>, vector<8x32xf32>
    %48 = arith.maximumf %47, %43 : vector<8x32xf32>
    %c0_36 = arith.constant 0 : index
    %c0_37 = arith.constant 0 : index
    %49 = vector.load %arg23[%c0_36, %c0_37] : memref<8x32xf32, #tpu.memory_space<vmem>>, vector<8x32xf32>
    tpu.vector_store %arg23[%c0_36, %c0_37], %48 {strides = array<i32>} : memref<8x32xf32, #tpu.memory_space<vmem>>, vector<8x32xf32>,
    %c1_i32 = arith.constant 1 : i32
    %50 = arith.cmpi eq, %arg1, %c1_i32 : i32
    %51 = arith.extui %50 : i1 to i32
    %c0_i32_38 = arith.constant 0 : i32
    %52 = arith.cmpi ne, %51, %c0_i32_38 : i32
    scf.if %52 {
      %c0_39 = arith.constant 0 : index
      %c0_40 = arith.constant 0 : index
      %53 = vector.load %arg23[%c0_39, %c0_40] : memref<8x32xf32, #tpu.memory_space<vmem>>, vector<8x32xf32>
      %c0_41 = arith.constant 0 : index
      %c0_42 = arith.constant 0 : index
      %54 = vector.load %arg14[%c0_41, %c0_42] : memref<32x32xf32, #tpu.memory_space<vmem>>, vector<32x32xf32>
      %cst_43 = arith.constant dense<0.000000e+00> : vector<8x32xf32>
      %55 = tpu.matmul %53, %54, %cst_43 {dimension_numbers = #tpu.dot_dimension_numbers<[1], [0], [0], [1], [0, 0, 1, 1], [], []>} : vector<8x32xf32>, vector<32x32xf32>, vector<8x32xf32> -> vector<8x32xf32>
      %c0_44 = arith.constant 0 : index
      %c0_45 = arith.constant 0 : index
      %56 = vector.load %arg18[%c0_44, %c0_45] : memref<1x32xf32, #tpu.memory_space<vmem>>, vector<1x32xf32>
      %57 = vector.broadcast %56 : vector<1x32xf32> to vector<8x32xf32>
      %58 = arith.addf %55, %57 : vector<8x32xf32>
      %cst_46 = arith.constant 0.000000e+00 : f32
      %59 = vector.broadcast %cst_46 : f32 to vector<8x32xf32>
      %60 = arith.maximumf %58, %59 : vector<8x32xf32>
      %c0_47 = arith.constant 0 : index
      %c0_48 = arith.constant 0 : index
      %61 = vector.load %arg15[%c0_47, %c0_48] : memref<32x16xf32, #tpu.memory_space<vmem>>, vector<32x16xf32>
      %cst_49 = arith.constant dense<0.000000e+00> : vector<8x16xf32>
      %62 = tpu.matmul %60, %61, %cst_49 {dimension_numbers = #tpu.dot_dimension_numbers<[1], [0], [0], [1], [0, 0, 1, 1], [], []>} : vector<8x32xf32>, vector<32x16xf32>, vector<8x16xf32> -> vector<8x16xf32>
      %c0_50 = arith.constant 0 : index
      %c0_51 = arith.constant 0 : index
      %63 = vector.load %arg19[%c0_50, %c0_51] : memref<1x16xf32, #tpu.memory_space<vmem>>, vector<1x16xf32>
      %64 = vector.broadcast %63 : vector<1x16xf32> to vector<8x16xf32>
      %65 = arith.addf %62, %64 : vector<8x16xf32>
      %cst_52 = arith.constant 0.000000e+00 : f32
      %66 = vector.broadcast %cst_52 : f32 to vector<8x16xf32>
      %67 = arith.maximumf %65, %66 : vector<8x16xf32>
      %c0_53 = arith.constant 0 : index
      %c0_54 = arith.constant 0 : index
      %68 = vector.load %arg16[%c0_53, %c0_54] : memref<16x8xf32, #tpu.memory_space<vmem>>, vector<16x8xf32>
      %cst_55 = arith.constant dense<0.000000e+00> : vector<8x8xf32>
      %69 = tpu.matmul %67, %68, %cst_55 {dimension_numbers = #tpu.dot_dimension_numbers<[1], [0], [0], [1], [0, 0, 1, 1], [], []>} : vector<8x16xf32>, vector<16x8xf32>, vector<8x8xf32> -> vector<8x8xf32>
      %c0_56 = arith.constant 0 : index
      %c0_57 = arith.constant 0 : index
      %70 = vector.load %arg20[%c0_56, %c0_57] : memref<1x8xf32, #tpu.memory_space<vmem>>, vector<1x8xf32>
      %71 = vector.broadcast %70 : vector<1x8xf32> to vector<8x8xf32>
      %72 = arith.addf %69, %71 : vector<8x8xf32>
      %cst_58 = arith.constant 0.000000e+00 : f32
      %73 = vector.broadcast %cst_58 : f32 to vector<8x8xf32>
      %74 = arith.maximumf %72, %73 : vector<8x8xf32>
      %c0_59 = arith.constant 0 : index
      %c0_60 = arith.constant 0 : index
      %75 = vector.load %arg17[%c0_59, %c0_60] : memref<8x128xf32, #tpu.memory_space<vmem>>, vector<8x128xf32>
      %cst_61 = arith.constant dense<0.000000e+00> : vector<8x128xf32>
      %76 = tpu.matmul %74, %75, %cst_61 {dimension_numbers = #tpu.dot_dimension_numbers<[1], [0], [0], [1], [0, 0, 1, 1], [], []>} : vector<8x8xf32>, vector<8x128xf32>, vector<8x128xf32> -> vector<8x128xf32>
      %c0_62 = arith.constant 0 : index
      %c0_63 = arith.constant 0 : index
      %77 = vector.load %arg21[%c0_62, %c0_63] : memref<1x128xf32, #tpu.memory_space<vmem>>, vector<1x128xf32>
      %78 = vector.broadcast %77 : vector<1x128xf32> to vector<8x128xf32>
      %79 = arith.addf %76, %78 : vector<8x128xf32>
      %c0_64 = arith.constant 0 : index
      %c0_65 = arith.constant 0 : index
      %80 = vector.load %arg22[%c0_64, %c0_65] : memref<8x128xf32, #tpu.memory_space<vmem>>, vector<8x128xf32>
      tpu.vector_store %arg22[%c0_64, %c0_65], %79 {strides = array<i32>} : memref<8x128xf32, #tpu.memory_space<vmem>>, vector<8x128xf32>,
    } else {
    }
    return
  }
  func.func @transform_0(%arg0: i32, %arg1: i32) -> (i32, i32, i32) {
    %c0_i32 = arith.constant 0 : i32
    %c0_i32_0 = arith.constant 0 : i32
    return %arg0, %arg1, %c0_i32 : i32, i32, i32
  }
  func.func @transform_1(%arg0: i32, %arg1: i32) -> (i32, i32) {
    %c0_i32 = arith.constant 0 : i32
    %c0_i32_0 = arith.constant 0 : i32
    return %arg1, %c0_i32 : i32, i32
  }
  func.func @transform_2(%arg0: i32, %arg1: i32) -> (i32, i32) {
    %c0_i32 = arith.constant 0 : i32
    %c0_i32_0 = arith.constant 0 : i32
    return %arg0, %c0_i32 : i32, i32
  }
  func.func @transform_3(%arg0: i32, %arg1: i32) -> (i32, i32) {
    %c0_i32 = arith.constant 0 : i32
    %c0_i32_0 = arith.constant 0 : i32
    %c0_i32_1 = arith.constant 0 : i32
    return %c0_i32, %c0_i32_0 : i32, i32
  }
  func.func @transform_4(%arg0: i32, %arg1: i32) -> (i32, i32) {
    %c0_i32 = arith.constant 0 : i32
    %c0_i32_0 = arith.constant 0 : i32
    %c0_i32_1 = arith.constant 0 : i32
    return %c0_i32, %c0_i32_0 : i32, i32
  }
  func.func @transform_5(%arg0: i32, %arg1: i32) -> (i32, i32) {
    %c0_i32 = arith.constant 0 : i32
    %c0_i32_0 = arith.constant 0 : i32
    %c0_i32_1 = arith.constant 0 : i32
    return %c0_i32, %c0_i32_0 : i32, i32
  }
  func.func @transform_6(%arg0: i32, %arg1: i32) -> (i32, i32) {
    %c0_i32 = arith.constant 0 : i32
    %c0_i32_0 = arith.constant 0 : i32
    %c0_i32_1 = arith.constant 0 : i32
    return %c0_i32, %c0_i32_0 : i32, i32
  }
  func.func @transform_7(%arg0: i32, %arg1: i32) -> (i32, i32) {
    %c0_i32 = arith.constant 0 : i32
    %c0_i32_0 = arith.constant 0 : i32
    %c0_i32_1 = arith.constant 0 : i32
    return %c0_i32, %c0_i32_0 : i32, i32
  }
  func.func @transform_8(%arg0: i32, %arg1: i32) -> (i32, i32) {
    %c0_i32 = arith.constant 0 : i32
    %c0_i32_0 = arith.constant 0 : i32
    %c0_i32_1 = arith.constant 0 : i32
    return %c0_i32, %c0_i32_0 : i32, i32
  }
  func.func @transform_9(%arg0: i32, %arg1: i32) -> (i32, i32) {
    %c0_i32 = arith.constant 0 : i32
    %c0_i32_0 = arith.constant 0 : i32
    %c0_i32_1 = arith.constant 0 : i32
    return %c0_i32, %c0_i32_0 : i32, i32
  }
  func.func @transform_10(%arg0: i32, %arg1: i32) -> (i32, i32) {
    %c0_i32 = arith.constant 0 : i32
    %c0_i32_0 = arith.constant 0 : i32
    %c0_i32_1 = arith.constant 0 : i32
    return %c0_i32, %c0_i32_0 : i32, i32
  }
  func.func @transform_11(%arg0: i32, %arg1: i32) -> (i32, i32) {
    %c0_i32 = arith.constant 0 : i32
    %c0_i32_0 = arith.constant 0 : i32
    %c0_i32_1 = arith.constant 0 : i32
    return %c0_i32, %c0_i32_0 : i32, i32
  }
  func.func @transform_12(%arg0: i32, %arg1: i32) -> (i32, i32) {
    %c0_i32 = arith.constant 0 : i32
    %c0_i32_0 = arith.constant 0 : i32
    %c0_i32_1 = arith.constant 0 : i32
    return %c0_i32, %c0_i32_0 : i32, i32
  }
  func.func @transform_13(%arg0: i32, %arg1: i32) -> (i32, i32) {
    %c0_i32 = arith.constant 0 : i32
    %c0_i32_0 = arith.constant 0 : i32
    %c0_i32_1 = arith.constant 0 : i32
    return %c0_i32, %c0_i32_0 : i32, i32
  }
  func.func @transform_14(%arg0: i32, %arg1: i32) -> (i32, i32) {
    %c0_i32 = arith.constant 0 : i32
    %c0_i32_0 = arith.constant 0 : i32
    %c0_i32_1 = arith.constant 0 : i32
    return %c0_i32, %c0_i32_0 : i32, i32
  }
  func.func @transform_15(%arg0: i32, %arg1: i32) -> (i32, i32) {
    %c0_i32 = arith.constant 0 : i32
    %c0_i32_0 = arith.constant 0 : i32
    %c0_i32_1 = arith.constant 0 : i32
    return %c0_i32, %c0_i32_0 : i32, i32
  }
  func.func @transform_16(%arg0: i32, %arg1: i32) -> (i32, i32) {
    %c0_i32 = arith.constant 0 : i32
    %c0_i32_0 = arith.constant 0 : i32
    %c0_i32_1 = arith.constant 0 : i32
    return %c0_i32, %c0_i32_0 : i32, i32
  }
  func.func @transform_17(%arg0: i32, %arg1: i32) -> (i32, i32) {
    %c0_i32 = arith.constant 0 : i32
    %c0_i32_0 = arith.constant 0 : i32
    %c0_i32_1 = arith.constant 0 : i32
    return %c0_i32, %c0_i32_0 : i32, i32
  }
  func.func @transform_18(%arg0: i32, %arg1: i32) -> (i32, i32) {
    %c0_i32 = arith.constant 0 : i32
    %c0_i32_0 = arith.constant 0 : i32
    %c0_i32_1 = arith.constant 0 : i32
    return %c0_i32, %c0_i32_0 : i32, i32
  }
  func.func @transform_19(%arg0: i32, %arg1: i32) -> (i32, i32) {
    %c0_i32 = arith.constant 0 : i32
    %c0_i32_0 = arith.constant 0 : i32
    %c0_i32_1 = arith.constant 0 : i32
    return %c0_i32, %c0_i32_0 : i32, i32
  }
  func.func @transform_20(%arg0: i32, %arg1: i32) -> (i32, i32) {
    %c0_i32 = arith.constant 0 : i32
    %c0_i32_0 = arith.constant 0 : i32
    return %arg0, %c0_i32 : i32, i32
  }
}

</mosaic_0001>

<bundles_post_ra>
// kernel: tpu_custom_call.1
= control target key start
LH: loop header
LB: loop body
LE: loop exit
PB: predicated region body
PF: predicated region fallthrough
CT: control target
= control target key end

     0   :  { %s3444_s0 = inlined_call_operand.hbm [shape: f32[16,16,128], index: 0, kind: input, shape index: {}]   ;;  %s3445_s1 = inlined_call_operand.vmem [shape: f32[16,32], index: 1, kind: input, shape index: {}]   ;;  %s3446_s2 = inlined_call_operand.hbm [shape: f32[16,32], index: 2, kind: input, shape index: {}]   ;;  %s3447_s3 = inlined_call_operand.vmem [shape: f32[128,32], index: 3, kind: input, shape index: {}]   ;;  %s3448_s4 = inlined_call_operand.vmem [shape: f32[32,32], index: 4, kind: input, shape index: {}]   ;;  %s3449_s5 = inlined_call_operand.vmem [shape: f32[32,32], index: 5, kind: input, shape index: {}]   ;;  %s3450_s6 = inlined_call_operand.vmem [shape: f32[32,32], index: 6, kind: input, shape index: {}]   ;;  %s3451_s7 = inlined_call_operand.vmem [shape: f32[32,32], index: 7, kind: input, shape index: {}]   ;;  %s3452_s8 = inlined_call_operand.vmem [shape: f32[1,32], index: 8, kind: input, shape index: {}]   ;;  %s3453_s9 = inlined_call_operand.vmem [shape: f32[1,32], index: 9, kind: input, shape index: {}]   ;;  %s3454_s10 = inlined_call_operand.vmem [shape: f32[1,32], index: 10, kind: input, shape index: {}]   ;;  %s3455_s11 = inlined_call_operand.vmem [shape: f32[1,32], index: 11, kind: input, shape index: {}]   ;;  %s3456_s12 = inlined_call_operand.vmem [shape: f32[32,32], index: 12, kind: input, shape index: {}]   ;;  %s3457_s13 = inlined_call_operand.vmem [shape: f32[32,16], index: 13, kind: input, shape index: {}]   ;;  %s3458_s14 = inlined_call_operand.vmem [shape: f32[16,8], index: 14, kind: input, shape index: {}]   ;;  %s3459_s15 = inlined_call_operand.vmem [shape: f32[8,128], index: 15, kind: input, shape index: {}]   ;;  %s3460_s16 = inlined_call_operand.vmem [shape: f32[1,32], index: 16, kind: input, shape index: {}]   ;;  %s3461_s17 = inlined_call_operand.vmem [shape: f32[1,16], index: 17, kind: input, shape index: {}]   ;;  %s3462_s18 = inlined_call_operand.vmem [shape: f32[1,8], index: 18, kind: input, shape index: {}]   ;;  %s3463_s19 = inlined_call_operand.vmem [shape: f32[1,128], index: 19, kind: input, shape index: {}]   ;;  %s3464_s20 = inlined_call_operand.hbm [shape: f32[16,128], index: 20, kind: output, shape index: {}]  }
   0x1   :  { %3486 = sst [smem:[#allocation15_spill]] %s3444_s0 }
   0x2   :  { %3487 = sst [smem:[#allocation16_spill]] %s3445_s1 }
   0x3   :  { %3488 = sst [smem:[#allocation17_spill]] %s3446_s2 }
   0x4   :  { %3489 = sst [smem:[#allocation18_spill]] %s3447_s3 }
   0x5   :  { %3490 = sst [smem:[#allocation19_spill]] %s3448_s4 }
   0x6   :  { %3491 = sst [smem:[#allocation20_spill]] %s3449_s5 }
   0x7   :  { %3492 = sst [smem:[#allocation21_spill]] %s3450_s6 }
   0x8   :  { %3493 = sst [smem:[#allocation22_spill]] %s3451_s7 }
   0x9   :  { %3494 = sst [smem:[#allocation23_spill]] %s3452_s8 }
   0xa   :  { %3495 = sst [smem:[#allocation24_spill]] %s3453_s9 }
   0xb   :  { %3496 = sst [smem:[#allocation25_spill]] %s3454_s10 }
   0xc   :  { %3497 = sst [smem:[#allocation26_spill]] %s3455_s11 }
   0xd   :  { %3498 = sst [smem:[#allocation27_spill]] %s3456_s12 }
   0xe   :  { %3499 = sst [smem:[#allocation28_spill]] %s3457_s13 }
   0xf   :  { %3500 = sst [smem:[#allocation29_spill]] %s3458_s14 }
  0x10   :  { %3501 = sst [smem:[#allocation30_spill]] %s3459_s15 }
  0x11   :  { %3502 = sst [smem:[#allocation31_spill]] %s3460_s16 }
  0x12   :  { %3503 = sst [smem:[#allocation32_spill]] %s3461_s17 }
  0x13   :  { %3504 = sst [smem:[#allocation33_spill]] %s3462_s18 }
  0x14   :  { %3505 = sst [smem:[#allocation34_spill]] %s3463_s19 }
  0x15   :  { %3506 = sst [smem:[#allocation35_spill]] %s3464_s20 }
  0x16   :  { %25 = vsyncpa [#allocation4], 0 }
  0x17   :  { %27 = vsyncpa [#allocation4 + $0x1], 0 }
  0x18   :  { %28 = vsyncpa [#allocation7], 0 }
  0x19   :  { %30 = vsyncpa [#allocation7 + $0x1], 0 }
  0x1a   :  { %31 = vsyncpa [#allocation5], 0 }
  0x1b   :  { %33 = vsyncpa [#allocation5 + $0x1], 0  ;;  %s2924_s1 = smov 0   ;;  %s2926_s22 = smov 0  }
  0x1c   :  { %s2928_s23 = smov 0   ;;  %s2930_s24 = smov 0  }
  0x1d   :  { %s2932_s2 = smov 0   ;;  %s2934_s25 = smov 0  }
  0x1e   :  { %s2936_s3 = smov 0   ;;  %s2938_s26 = smov 0  }
  0x1f   :  { %s2940_s27 = smov 0   ;;  %s2942_s28 = smov 0  }
  0x20   :  { %s2944_s4 = smov 0  }
  0x21 LB: > { %3507 = sst [smem:[#allocation12_spill]] %s2794_s26  ;;  %s48_s29 = sadd.s32 1, %s2798_s27  ;;  %s2806_s4 = sphi %s2944_s4, %s39_s4   ;;  %s2802_s28 = sphi %s2942_s28, %s3564_s28   ;;  %s2798_s27 = sphi %s2940_s27, %s3563_s27   ;;  %s2794_s26 = sphi %s2938_s26, %s3562_s26   ;;  %s2790_s3 = sphi %s2936_s3, %s3561_s3   ;;  %s2786_s25 = sphi %s2934_s25, %s3560_s25   ;;  %s2782_s2 = sphi %s2932_s2, %s3559_s2   ;;  %s2778_s24 = sphi %s2930_s24, %s3558_s24   ;;  %s2774_s23 = sphi %s2928_s23, %s3557_s23   ;;  %s2770_s22 = sphi %s2926_s22, %s3556_s22   ;;  %s2766_s1 = sphi %s2924_s1, %s3555_s1  }
  0x22   : > { %s51_s30 = sadd.s32 1, %s2802_s28  ;;  %p49_p0 = scmp.ge.s32.totalorder %s48_s29, 2 }
  0x23   : > { %s60_s0 = sadd.s32 1, %s2786_s25  ;;  %p67_p1 = scmp.ne.s32.totalorder %s2786_s25, %s2782_s2 }
  0x24   : > { %p3476_p2 = scmp.eq.s32.totalorder %s2806_s4, 0  ;;  %s3566_s29 = smov (%p49_p0, %s48_s29), 0 }
  0x25   : > { %3508 = sst [smem:[#allocation13_spill]] %s3566_s29  ;;  %s3568_s30 = smov (!%p49_p0, %s51_s30), %s2802_s28 }
  0x26   : > { %s56_s21 = ssub.s32 %s2798_s27, %s3566_s29  ;;  %p2992_p3 = por %p3476_p2, %p67_p1 }
  0x27   : > { %p53_p4 = scmp.ge.s32.totalorder %s3568_s30, 2  ;;  %p3475_p5 = scmp.lt.s32.totalorder %s2806_s4, 4 }
  0x28   : > { %s583_s26 = sand.u32 1, %s2786_s25   ;;  %s2175_s29 = sshll.u32 %s2802_s28, 4 }
  0x29   : > { %s3570_s30 = smov (%p53_p4, %s3568_s30), 0  ;;  %s2114_s19 = sshll.u32 %s583_s26, 6 }
  0x2a   : > { %3510 = sst [smem:[#allocation14_spill]] %s3570_s30  ;;  %s3002_s18 = ssub.s32 %s2802_s28, %s3570_s30 }
  0x2b   : > { %s57_s15 = sor.u32 %s56_s21, %s3002_s18  ;;  %s593_s17 = sadd.s32 %s2798_s27, %s2175_s29 }
  0x2c   : > { %p58_p6 = scmp.eq.s32.totalorder %s57_s15, 0  ;;  %s2117_s14 = sshll.u32 %s593_s17, 7 }
  0x2d   : > { %s587_s16 = scalar_lea.vmem [#allocation3], %s2114_s19  ;;  %s3511_s9 = sld [smem:[#allocation15_spill]] }
  0x2e   : > { %s596_s13 = sshll.u32 %s587_s16, 4  ;;  %p3021_p7 = pnand %p3475_p5, %p2992_p3  ;;  %s3015_s13 = int_to_ptr.vmem [resolvable:$true] %s596_s13 }
  0x2f   : > { %s3008_s12 = scalar_select %p58_p6, %s2786_s25, %s60_s0  }
  0x30   : > { %p2120_p8 = scmp.ge.s32.totalorder %s2806_s4, 1  ;;  %s3026_s16 = scalar_lea.sflag [#allocation4], %s583_s26 }
  0x31   : > { %p2622_p10 = pneg %p3021_p7 }
  0x33   : > { %s3013_s7 = scalar_lea.hbm %s3511_s9, %s2117_s14  ;;  %s2625_s17 = scalar_lea.hbm %s3511_s9, 4096 }
  0x34   : > { %s2620_s10 = scalar_lea.hbm %s3013_s7, 1024  ;;  %p2626_p13 = scmp.lt.u32.totalorder %s3013_s7, %s3511_s9 }
  0x35   : > { %p2621_p9 = scmp.ne.s32.totalorder %s3013_s7, %s2620_s10  ;;  %p2627_p0 = scmp.lt.u32.totalorder %s2625_s17, %s2620_s10 }
  0x36   : > { %p2629_p3 = scmp.lt.u32.totalorder %s2620_s10, %s3013_s7 }
  0x37   : > { %p2623_p11 = pnand %p2622_p10, %p2621_p9  ;;  %p2628_p1 = por %p2627_p0, %p2626_p13 }
  0x39   : > { %p2624_p12 = pneg %p2623_p11  ;;  %p2630_p4 = por %p2629_p3, %p2628_p1 }
  0x3b   : > { %p2631_p6 = pnand %p2630_p4, %p2624_p12 }
  0x3d   : > { %2634 = shalt.err (!%p2631_p6)
}
  0x3e   : > { %s2635_s26 = scalar_lea.vmem %s3015_s13, 1024  ;;  %s2808_s29 = smov [#allocation3]  }
  0x3f   : > { %p2636_p9 = scmp.ne.s32.totalorder %s3015_s13, %s2635_s26  ;;  %s2640_s0 = sshll.u32 %s2808_s29, 4  ;;  %s2641_s0 = int_to_ptr.vmem [resolvable:$false] %s2640_s0 }
  0x40   : > { %s2642_s21 = scalar_lea.vmem %s2641_s0, 2048  ;;  %p2643_p2 = scmp.lt.s32.totalorder %s3015_s13, %s2641_s0 }
  0x41   : > { %p2638_p11 = pnand %p2636_p9, %p2622_p10  ;;  %p2644_p13 = scmp.lt.s32.totalorder %s2642_s21, %s2635_s26 }
  0x43   : > { %p2639_p5 = pneg %p2638_p11  ;;  %p2645_p0 = por %p2644_p13, %p2643_p2 }
  0x45   : > { %p2646_p1 = pnand %p2645_p0, %p2639_p5 }
  0x47   : > { %2649 = shalt.err (!%p2646_p1)
}
  0x48   : > { %s2809_s10 = smov 256   ;;  %s2810_s11 = smov 128  }
  0x49   : > { %s2811_s14 = smov 8   ;;  %p629_p2 = scmp.lt.s32.totalorder %s2806_s4, 5 }
  0x4a   : > { %2513 = dma.hbm_to_vmem [thread:$0]  (!%p3021_p7), %s3013_s7, 1024, %s3015_s13, %s3026_s16, %s2809_s10, %s2810_s11, %s2811_s14  }
  0x4b   : > { %p3057_p5 = pnand %p2120_p8, %p629_p2  ;;  %s2110_s19 = sadd.s32 4294967295, %s2806_s4  }
  0x4c   : > { %s2111_s20 = sadd.s32 4294967294, %s2806_s4   ;;  %p73_p10 = scmp.ne.s32.totalorder %s2782_s2, %s2778_s24 }
  0x4d   : > { %p74_p12 = scmp.eq.s32.totalorder %s2110_s19, 0  ;;  %p110_p3 = scmp.eq.s32.totalorder %s3002_s18, 0 }
  0x4e   : > { %s112_s26 = sadd.s32 1, %s2774_s23  ;;  %p119_p6 = scmp.ne.s32.totalorder %s2774_s23, %s2770_s22 }
  0x4f   : > { %p3067_p4 = por %p74_p12, %p73_p10  ;;  %p3515_p7 = scmp.eq.s32.totalorder %s2806_s4, 0 }
  0x50   : > { %s3074_s7 = scalar_select %p110_p3, %s2774_s23, %s112_s26  }
  0x51   : > { %s3514_s29 = scalar_select %p3067_p4, 1, 0 }
  0x52   : > { %p3078_p8 = por %p119_p6, %p3515_p7  ;;  %p125_p9 = scmp.ne.s32.totalorder %s2770_s22, %s2766_s1 }
  0x53   : > { %p506_p11 = scmp.eq.s32.totalorder %s2110_s19, 3  ;;  %p512_p13 = scmp.eq.s32.totalorder %s2111_s20, 3 }
  0x54   : > { %p3084_p0 = por %p125_p9, %p74_p12  ;;  %s613_s24 = sand.u32 1, %s2774_s23  }
  0x55   : > { %p3089_p1 = por %p506_p11, %p119_p6  ;;  %p3093_p2 = por %p512_p13, %p125_p9 }
  0x56   : > { %s3517_s18 = scalar_select %p3084_p0, 1, 0 }
  0x57   : > { %s3518_s15 = scalar_select %p3089_p1, 1, 0 }
  0x58   : > { %s3519_s16 = scalar_select %p3093_p2, 1, 0 }
  0x59   : > { %s2118_s0 = sshll.u32 %s613_s24, 3  ;;  %s2119_s21 = sshll.u32 %s2802_s28, 7 }
  0x5a   : > { %s3520_s14 = sld [smem:[#allocation17_spill]]  ;;  %s617_s20 = scalar_lea.vmem [#allocation6], %s2118_s0 }
  0x5b   : > { %s624_s26 = sshll.u32 %s617_s20, 4  ;;  %p3521_p10 = scmp.lt.s32.totalorder %s2806_s4, 4  ;;  %s3103_s26 = int_to_ptr.vmem [resolvable:$true] %s624_s26 }
  0x5c   : > { %s614_s30 = scalar_lea.sflag [#allocation7], %s613_s24 }
  0x5d   : > { %p3109_p12 = pnand %p3521_p10, %p3078_p8 }
  0x5f   : > { %p2652_p6 = pneg %p3109_p12 }
  0x60   : > { %s3101_s19 = scalar_lea.hbm %s3520_s14, %s2119_s21  ;;  %s2655_s13 = scalar_lea.hbm %s3520_s14, 256 }
  0x61   : > { %s2650_s10 = scalar_lea.hbm %s3101_s19, 128  ;;  %p2656_p8 = scmp.lt.u32.totalorder %s3101_s19, %s3520_s14 }
  0x62   : > { %p2651_p3 = scmp.ne.s32.totalorder %s3101_s19, %s2650_s10  ;;  %p2657_p11 = scmp.lt.u32.totalorder %s2655_s13, %s2650_s10 }
  0x63   : > { %p2659_p10 = scmp.lt.u32.totalorder %s2650_s10, %s3101_s19 }
  0x64   : > { %p2653_p7 = pnand %p2652_p6, %p2651_p3  ;;  %p2658_p13 = por %p2657_p11, %p2656_p8 }
  0x66   : > { %p2654_p9 = pneg %p2653_p7  ;;  %p2660_p2 = por %p2659_p10, %p2658_p13 }
  0x68   : > { %p2661_p1 = pnand %p2660_p2, %p2654_p9 }
  0x6a   : > { %2664 = shalt.err (!%p2661_p1)
}
  0x6b   : > { %s2665_s24 = scalar_lea.vmem %s3103_s26, 128  ;;  %s2812_s0 = smov [#allocation6]  }
  0x6c   : > { %p2666_p3 = scmp.ne.s32.totalorder %s3103_s26, %s2665_s24  ;;  %s2670_s21 = sshll.u32 %s2812_s0, 4  ;;  %s2671_s21 = int_to_ptr.vmem [resolvable:$false] %s2670_s21 }
  0x6d   : > { %s2672_s11 = scalar_lea.vmem %s2671_s21, 256  ;;  %p2673_p4 = scmp.lt.s32.totalorder %s3103_s26, %s2671_s21 }
  0x6e   : > { %p2668_p7 = pnand %p2666_p3, %p2652_p6  ;;  %p2674_p8 = scmp.lt.s32.totalorder %s2672_s11, %s2665_s24 }
  0x70   : > { %p2669_p0 = pneg %p2668_p7  ;;  %p2675_p11 = por %p2674_p8, %p2673_p4 }
  0x72   : > { %p2676_p13 = pnand %p2675_p11, %p2669_p0 }
  0x74   : > { %2679 = shalt.err (!%p2676_p13)
}
  0x75   : > { %2516 = dma.hbm_to_vmem [thread:$0]  (!%p3109_p12), %s3101_s19, 128, %s3103_s26, %s614_s30  }
  0x76   : > { %633 = sbr.rel (%p3057_p5) target bundleno = 2193 (0x891), region = 100  ;;  %s635_s10 = sand.u32 (!%p3057_p5), 1, %s2782_s2  }
  0x77   : > { %s2121_s13 = sshll.u32 (!%p3057_p5), %s635_s10, 6  ;;  %s636_s20 = scalar_lea.sflag (!%p3057_p5), [#allocation4], %s635_s10 }
  0x78   : > { %s3141_s0 = scalar_lea.vmem (!%p3057_p5), [#allocation3], %s2121_s13  ;;  %p3523_p1 = scmp.ne.s32.totalorder (!%p3057_p5), %s3514_s29, 0 }
  0x7d   : > { %2753 = dma.done.wait (%p3523_p1), %s636_s20, 1024  }
  0x7e   : > { %2755 = vsyncadd (%p3523_p1), %s636_s20, 4294966272  ;;  %s3148_s9 = sand.u32 1, %s2770_s22   ;;  %p3524_p5 = scmp.ne.s32.totalorder %s3517_s18, 0 }
  0x7f   : > { %s3482_s30 = sshll.u32 %s3148_s9, 3  ;;  %s645_s17 = scalar_lea.sflag [#allocation7], %s3148_s9 }
  0x80   : > { %s3154_s19 = scalar_lea.vmem [#allocation6], %s3482_s30 }
  0x81   : > { %2757 = dma.done.wait (%p3524_p5), %s645_s17, 128  }
  0x82   : > { %2759 = vsyncadd (%p3524_p5), %s645_s17, 4294967168  ;;  %s3525_s24 = sld [smem:[#allocation18_spill]]  ;;  %v719_v9 = vld [vmem:[%s3141_s0] sm:$0xff]  ;;  %v720_v25 = vld [vmem:[%s3141_s0 + $0x8] sm:$0xff]  ;;  %s3529_s5 = sld [smem:[#allocation20_spill]]  ;;  %v863_v43 = vlaneseq  ;;  %vm975_vm0 = vcmask 261120  }
  0x83   : > { %2295 = vmatprep.mubr.f32.mxu0 %v719_v9  ;;  %v721_v26 = vld [vmem:[%s3141_s0 + $0x10] sm:$0xff]  ;;  %v722_v27 = vld [vmem:[%s3141_s0 + $0x18] sm:$0xff]  ;;  %v723_v28 = vld [vmem:[%s3141_s0 + $0x20] sm:$0xff]  ;;  %v2813_v41 = vmov 1966171168   ;;  %p715_p4 = scmp.lt.s32.totalorder %s2790_s3, 1 }
  0x84   : > { %v724_v29 = vld [vmem:[%s3141_s0 + $0x28] sm:$0xff]  ;;  %v725_v30 = vld [vmem:[%s3141_s0 + $0x30] sm:$0xff]  ;;  %v726_v31 = vld [vmem:[%s3141_s0 + $0x38] sm:$0xff]  ;;  %v861_v42 = vunpack.c.l.s4 %v2813_v41  ;;  %v864_v45 = vshrl.u32 %v863_v43, 7  ;;  %s3530_s13 = sld [smem:[#allocation16_spill]]  ;;  %s3531_s6 = sld [smem:[#allocation21_spill]] }
  0x85   : > { %v857_v47 = vld [vmem:[%s3154_s19] sm:$0xff]  ;;  %s3532_s8 = sld [smem:[#allocation23_spill]]  ;;  %s3533_s26 = sld [smem:[#allocation22_spill]] }
  0x86   : > { %v862_v44 = vunpack.c.0.s8 %v861_v42  ;;  %v859_v49 = vcombine.high %v857_v47, %v857_v47  ;;  %v910_v53 = vsub.s32 0, %v864_v45  ;;  %s3537_s10 = sld [smem:[#allocation26_spill]]  ;;  %p2161_p0 = scmp.ne.s32.totalorder %s2790_s3, 0 }
  0x88   : > { %s3526_s21 = smov %s3525_s24  ;;  %v727_v0 = vld [vmem:[%s3525_s24] sm:$0xff]  ;;  %s3527_s24 = sld [smem:[#allocation19_spill]]  ;;  %v1114_v39 = vld [vmem:[%s3529_s5 + $0x8] sm:$0xff]  ;;  %v865_v46 = vsub.s32 %v862_v44, %v864_v45  ;;  %v1116_v9 = vld [vmem:[%s3529_s5 + $0x18] sm:$0xff] }
  0x89   : > { %v728_v1 = vld [vmem:[%s3526_s21 + $0x8] sm:$0xff]  ;;  %v729_v2 = vld [vmem:[%s3526_s21 + $0x10] sm:$0xff]  ;;  %v730_v4 = vld [vmem:[%s3526_s21 + $0x18] sm:$0xff] }
  0x8a   : > { %v2421_v3 = vpack.c.bf16 %v728_v1, %v727_v0  ;;  %v2425_v5 = vpack.c.bf16 %v730_v4, %v729_v2  ;;  %v731_v6 = vld [vmem:[%s3526_s21 + $0x20] sm:$0xff]  ;;  %v732_v7 = vld [vmem:[%s3526_s21 + $0x28] sm:$0xff]  ;;  %v733_v10 = vld [vmem:[%s3526_s21 + $0x30] sm:$0xff]  ;;  %v866_v48 = vrot.slane %v857_v47, %v865_v46  ;;  %v873_v51 = vrot.slane %v859_v49, %v865_v46 }
  0x8b   : > { %v2429_v8 = vpack.c.bf16 %v732_v7, %v731_v6  ;;  %v734_v11 = vld [vmem:[%s3526_s21 + $0x38] sm:$0xff]  ;;  %v735_v13 = vld [vmem:[%s3526_s21 + $0x40] sm:$0xff]  ;;  %v736_v14 = vld [vmem:[%s3526_s21 + $0x48] sm:$0xff]  ;;  %s3534_s29 = smov %s3533_s26 }
  0x8c   : > { %2422 = vmatprep.subr.bf16.mxu0 %v2421_v3  ;;  %v2433_v12 = vpack.c.bf16 %v734_v11, %v733_v10  ;;  %v2437_v15 = vpack.c.bf16 %v736_v14, %v735_v13  ;;  %v737_v16 = vld [vmem:[%s3526_s21 + $0x50] sm:$0xff]  ;;  %v738_v17 = vld [vmem:[%s3526_s21 + $0x58] sm:$0xff]  ;;  %v739_v19 = vld [vmem:[%s3526_s21 + $0x60] sm:$0xff]  ;;  %v874_v50 = vcombine.high %v866_v48, %v866_v48  ;;  %v882_v54 = vrot.slane %v866_v48, %v865_v46 }
  0x8d   : > { %2424 = vmatpush3.bf16.msra.mxu0 %v2421_v3  ;;  %v2441_v18 = vpack.c.bf16 %v738_v17, %v737_v16  ;;  %v740_v20 = vld [vmem:[%s3526_s21 + $0x68] sm:$0xff]  ;;  %v741_v22 = vld [vmem:[%s3526_s21 + $0x70] sm:$0xff]  ;;  %v742_v23 = vld [vmem:[%s3526_s21 + $0x78] sm:$0xff]  ;;  %v875_v56 = vcombine.high %v873_v51, %v873_v51  ;;  %v889_v7 = vrot.slane %v873_v51, %v865_v46 }
  0x8e   : > { %2426 = vmatprep.subr.bf16.mxu0 %v2425_v5  ;;  %v2445_v21 = vpack.c.bf16 %v740_v20, %v739_v19  ;;  %v2449_v24 = vpack.c.bf16 %v742_v23, %v741_v22  ;;  %s3528_s11 = smov %s3527_s24  ;;  %v964_v32 = vld [vmem:[%s3527_s24] sm:$0xff]  ;;  %v896_v52 = vrot.slane %v874_v50, %v865_v46  ;;  %v904_v60 = vcombine.high %v882_v54, %v882_v54  ;;  %v1262_v43 = vld [vmem:[%s3531_s6 + $0x8] sm:$0xff]  ;;  %v1263_v50 = vld [vmem:[%s3531_s6 + $0x10] sm:$0xff] }
  0x8f   : > { %v965_v33 = vld [vmem:[%s3528_s11 + $0x8] sm:$0xff]  ;;  %v966_v35 = vld [vmem:[%s3528_s11 + $0x10] sm:$0xff]  ;;  %v967_v36 = vld [vmem:[%s3528_s11 + $0x18] sm:$0xff]  ;;  %s716_s24 = scalar_select %p715_p4, %s2790_s3, 1  ;;  %v911_v61 = vrot.slane %v882_v54, %v910_v53  ;;  %v903_v1 = vrot.slane %v875_v56, %v865_v46  ;;  %v905_v22 = vcombine.high %v889_v7, %v889_v7 }
  0x90   : > { %v2453_v34 = vpack.c.bf16 %v965_v33, %v964_v32  ;;  %v2457_v37 = vpack.c.bf16 %v967_v36, %v966_v35  ;;  %v1113_v38 = vld [vmem:[%s3529_s5] sm:$0xff]  ;;  %v915_v57 = vrot.slane %v896_v52, %v910_v53  ;;  %v906_v58 = vcombine.high %v896_v52, %v896_v52  ;;  %v1264_v51 = vld [vmem:[%s3531_s6 + $0x18] sm:$0xff] }
  0x91   : > { %2428 = vmatpush3.bf16.msra.mxu0 %v2425_v5  ;;  %v2461_v40 = vpack.c.bf16 %v1114_v39, %v1113_v38  ;;  %s2124_s14 = sshll.u32 %s716_s24, 3  ;;  %v919_v5 = vrot.slane %v904_v60, %v910_v53  ;;  %v931_v13 = vrot.slane %v903_v1, %v910_v53  ;;  %v907_v17 = vcombine.high %v903_v1, %v903_v1  ;;  %v1261_v42 = vld [vmem:[%s3531_s6] sm:$0xff]  ;;  %s3536_s24 = sld [smem:[#allocation25_spill]] }
  0x92   : > { %2430 = vmatprep.subr.bf16.mxu0 %v2429_v8  ;;  %2454 = vmatprep.subr.bf16.mxu1 %v2453_v34  ;;  %s718_s20 = scalar_lea.vmem %s3530_s13, %s2124_s14  ;;  %v923_v3 = vrot.slane %v906_v58, %v910_v53  ;;  %v935_v32 = vrot.slane %v905_v22, %v910_v53  ;;  %v2469_v44 = vpack.c.bf16 %v1262_v43, %v1261_v42  ;;  %v2125_v45 = vld [vmem:[%s3532_s8] ss:$0 sm:$0xff]  ;;  %s3535_s13 = sld [smem:[#allocation24_spill]] }
  0x93   : > { %2456 = vmatpush3.bf16.msra.mxu1 %v2453_v34  ;;  %v848_v55 = vld [vmem:[%s718_s20] sm:$0xff] }
  0x94   : > { %2458 = vmatprep.subr.bf16.mxu1 %v2457_v37 }
  0x95   : > { %2432 = vmatpush3.bf16.msra.mxu0 %v2429_v8  ;;  %v1115_v8 = vld [vmem:[%s3529_s5 + $0x10] sm:$0xff] }
  0x96   : > { %2434 = vmatprep.subr.bf16.mxu0 %v2433_v12 }
  0x97   : > { %2460 = vmatpush3.bf16.msra.mxu1 %v2457_v37 }
  0x98   : > { %2462 = vmatprep.subr.bf16.mxu1 %v2461_v40 }
  0x99   : > { %2436 = vmatpush3.bf16.msra.mxu0 %v2433_v12 }
  0x9a   : > { %2438 = vmatprep.subr.bf16.mxu0 %v2437_v15 }
  0x9d   : > { %2440 = vmatpush3.bf16.msra.mxu0 %v2437_v15 }
  0x9e   : > { %2442 = vmatprep.subr.bf16.mxu0 %v2441_v18 }
  0xa1   : > { %2444 = vmatpush3.bf16.msra.mxu0 %v2441_v18  ;;  %v2465_v18 = vpack.c.bf16 %v1116_v9, %v1115_v8  ;;  %v1409_v9 = vld [vmem:[%s3533_s26] sm:$0xff] }
  0xa2   : > { %2446 = vmatprep.subr.bf16.mxu0 %v2445_v21 }
  0xa5   : > { %2448 = vmatpush3.bf16.msra.mxu0 %v2445_v21  ;;  %v927_v21 = vrot.slane %v889_v7, %v910_v53 }
  0xa6   : > { %2450 = vmatprep.subr.bf16.mxu0 %v2449_v24 }
  0xa9   : > { %2452 = vmatpush3.bf16.msra.mxu0 %v2449_v24 }
  0xac   : > { %2296 = vmatmul.mubr.f32.vlgmr.msra.gmra.mrb[0].mxu0 %v720_v25 }
  0xad   : > { %2298 = vmatprep.mubr.f32.mxu0 %v721_v26 }
  0xb0   : > { %2299 = vmatmul.mubr.f32.gmra.mrb[2].mxu0 %v722_v27 }
  0xb1   : > { %2301 = vmatprep.mubr.f32.mxu0 %v723_v28 }
  0xb4   : > { %2302 = vmatmul.mubr.f32.gmra.mrb[4].mxu0 %v724_v29  ;;  %v939_v29 = vrot.slane %v907_v17, %v910_v53 }
  0xb5   : > { %2304 = vmatprep.mubr.f32.mxu0 %v725_v30 }
  0xb8   : > { %2305 = vmatmul.mubr.f32.gmra.mrb[6].mxu0 %v726_v31 }
 0x17f   : > { %v2297_v59 = vpop.f32.mrb[0].mxu0 }
 0x180   : > { %v850_v62 = vadd.f32 %v2297_v59, %v848_v55  ;;  %v809_v63 = vpop.f32.mrb[1].mxu0 }
 0x181   : > { %v849_v0 = vadd.f32 %v848_v55, %v809_v63 }
 0x182   : > { %v949_v2 = vadd.f32 %v915_v57, %v850_v62  ;;  %v2473_v57 = vpack.c.bf16 %v1264_v51, %v1263_v50 }
 0x183   : > { %v2300_v4 = vpop.f32.mrb[2].mxu0  ;;  %v948_v6 = vadd.f32 %v911_v61, %v849_v0 }
 0x184   : > { %v852_v10 = vadd.f32 %v2300_v4, %v848_v55  ;;  %v819_v11 = vpop.f32.mrb[3].mxu0  ;;  %v957_v15 = vmax.f32 %v949_v2, 0.0 }
 0x185   : > { %v851_v12 = vadd.f32 %v848_v55, %v819_v11  ;;  %v956_v14 = vmax.f32 %v948_v6, 0.0 }
 0x186   : > { %v951_v16 = vadd.f32 %v923_v3, %v852_v10  ;;  %v1410_v10 = vld [vmem:[%s3534_s29 + $0x8] sm:$0xff] }
 0x187   : > { %v950_v19 = vadd.f32 %v919_v5, %v851_v12  ;;  %v2303_v20 = vpop.f32.mrb[4].mxu0  ;;  %2315 = vmatprep.mubr.msk.f32.mxu1 %vm975_vm0, %v956_v14  ;;  %v2477_v11 = vpack.c.bf16 %v1410_v10, %v1409_v9  ;;  %v2134_v12 = vld [vmem:[%s3535_s13] ss:$0 sm:$0xff]  ;;  %s3538_s13 = sshll.u32 %s3148_s9, 3 }
 0x188   : > { %v854_v23 = vadd.f32 %v2303_v20, %v848_v55  ;;  %v829_v24 = vpop.f32.mrb[5].mxu0  ;;  %2316 = vmatmul.mubr.msk.f32.vlgmr.msra.gmra.mrb[0].mxu1 %vm975_vm0, %v957_v15  ;;  %v959_v27 = vmax.f32 %v951_v16, 0.0  ;;  %s3324_s20 = scalar_lea.vmem [#allocation8], %s3538_s13 }
 0x189   : > { %v958_v25 = vmax.f32 %v950_v19, 0.0  ;;  %v853_v26 = vadd.f32 %v848_v55, %v829_v24  ;;  %2464 = vmatpush3.bf16.msra.mxu1 %v2461_v40  ;;  %2478 = vmatprep.subr.bf16.mxu0 %v2477_v11 }
 0x18a   : > { %v953_v28 = vadd.f32 %v931_v13, %v854_v23  ;;  %2466 = vmatprep.subr.bf16.mxu1 %v2465_v18  ;;  %2480 = vmatpush3.bf16.msra.mxu0 %v2477_v11 }
 0x18b   : > { %v952_v30 = vadd.f32 %v927_v21, %v853_v26  ;;  %v2306_v31 = vpop.f32.mrb[6].mxu0  ;;  %2318 = vmatprep.mubr.msk.f32.mxu1 %vm975_vm0, %v958_v25 }
 0x18c   : > { %v856_v33 = vadd.f32 %v2306_v31, %v848_v55  ;;  %v839_v34 = vpop.f32.mrb[7].mxu0  ;;  %2319 = vmatmul.mubr.msk.f32.gmra.mrb[2].mxu1 %vm975_vm0, %v959_v27  ;;  %v961_v37 = vmax.f32 %v953_v28, 0.0 }
 0x18d   : > { %v960_v35 = vmax.f32 %v952_v30, 0.0  ;;  %v855_v36 = vadd.f32 %v848_v55, %v839_v34  ;;  %2468 = vmatpush3.bf16.msra.mxu1 %v2465_v18 }
 0x18e   : > { %v955_v38 = vadd.f32 %v939_v29, %v856_v33  ;;  %2470 = vmatprep.subr.bf16.mxu1 %v2469_v44 }
 0x18f   : > { %v954_v39 = vadd.f32 %v935_v32, %v855_v36  ;;  %2321 = vmatprep.mubr.msk.f32.mxu1 %vm975_vm0, %v960_v35 }
 0x190   : > { %2322 = vmatmul.mubr.msk.f32.gmra.mrb[4].mxu1 %vm975_vm0, %v961_v37  ;;  %v963_v41 = vmax.f32 %v955_v38, 0.0  ;;  %v1411_v37 = vld [vmem:[%s3534_s29 + $0x10] sm:$0xff]  ;;  %v1412_v38 = vld [vmem:[%s3534_s29 + $0x18] sm:$0xff] }
 0x191   : > { %v962_v40 = vmax.f32 %v954_v39, 0.0  ;;  %v2481_v39 = vpack.c.bf16 %v1412_v38, %v1411_v37 }
 0x193   : > { %2324 = vmatprep.mubr.msk.f32.mxu1 %vm975_vm0, %v962_v40  ;;  %2482 = vmatprep.subr.bf16.mxu0 %v2481_v39  ;;  %v2143_v40 = vld [vmem:[%s3536_s24] ss:$0 sm:$0xff] }
 0x194   : > { %2325 = vmatmul.mubr.msk.f32.gmra.mrb[6].mxu1 %vm975_vm0, %v963_v41  ;;  %2484 = vmatpush3.bf16.msra.mxu0 %v2481_v39 }
 0x25b   : > { %v2317_v46 = vpop.f32.mrb[0].mxu1 }
 0x25c   : > { %v1072_v47 = vadd.f32 %v2317_v46, %v2125_v45  ;;  %v1066_v48 = vpop.f32.mrb[1].mxu1 }
 0x25d   : > { %v1067_v49 = vadd.f32 %v2125_v45, %v1066_v48 }
 0x25e   : > { %v1106_v54 = vmax.f32 %v1072_v47, 0.0 }
 0x25f   : > { %v1105_v52 = vmax.f32 %v1067_v49, 0.0  ;;  %v2320_v53 = vpop.f32.mrb[2].mxu1 }
 0x260   : > { %v1082_v55 = vadd.f32 %v2320_v53, %v2125_v45  ;;  %v1076_v56 = vpop.f32.mrb[3].mxu1 }
 0x261   : > { %v1077_v58 = vadd.f32 %v2125_v45, %v1076_v56  ;;  %2335 = vmatprep.mubr.msk.f32.mxu1 %vm975_vm0, %v1105_v52 }
 0x262   : > { %2336 = vmatmul.mubr.msk.f32.vlgmr.msra.gmra.mrb[8].mxu1 %vm975_vm0, %v1106_v54  ;;  %v1108_v61 = vmax.f32 %v1082_v55, 0.0 }
 0x263   : > { %v1107_v59 = vmax.f32 %v1077_v58, 0.0  ;;  %v2323_v60 = vpop.f32.mrb[4].mxu1  ;;  %2472 = vmatpush3.bf16.msra.mxu1 %v2469_v44 }
 0x264   : > { %v1092_v62 = vadd.f32 %v2323_v60, %v2125_v45  ;;  %v1086_v63 = vpop.f32.mrb[5].mxu1  ;;  %2474 = vmatprep.subr.bf16.mxu1 %v2473_v57 }
 0x265   : > { %v1087_v0 = vadd.f32 %v2125_v45, %v1086_v63  ;;  %2338 = vmatprep.mubr.msk.f32.mxu1 %vm975_vm0, %v1107_v59 }
 0x266   : > { %2339 = vmatmul.mubr.msk.f32.gmra.mrb[10].mxu1 %vm975_vm0, %v1108_v61  ;;  %v1110_v3 = vmax.f32 %v1092_v62, 0.0 }
 0x267   : > { %v1109_v1 = vmax.f32 %v1087_v0, 0.0  ;;  %v2326_v2 = vpop.f32.mrb[6].mxu1  ;;  %2476 = vmatpush3.bf16.msra.mxu1 %v2473_v57 }
 0x268   : > { %v1102_v4 = vadd.f32 %v2326_v2, %v2125_v45  ;;  %v1096_v5 = vpop.f32.mrb[7].mxu1  ;;  %2500 = vmatprep.subr.bf16.mxu1 %v2477_v11 }
 0x269   : > { %v1097_v6 = vadd.f32 %v2125_v45, %v1096_v5  ;;  %2341 = vmatprep.mubr.msk.f32.mxu1 %vm975_vm0, %v1109_v1  ;;  %v2152_v1 = vld [vmem:[%s3537_s10] ss:$0 sm:$0xff] }
 0x26a   : > { %2342 = vmatmul.mubr.msk.f32.gmra.mrb[12].mxu1 %vm975_vm0, %v1110_v3  ;;  %v1112_v8 = vmax.f32 %v1102_v4, 0.0 }
 0x26b   : > { %v1111_v7 = vmax.f32 %v1097_v6, 0.0 }
 0x26d   : > { %2344 = vmatprep.mubr.msk.f32.mxu1 %vm975_vm0, %v1111_v7 }
 0x26e   : > { %2345 = vmatmul.mubr.msk.f32.gmra.mrb[14].mxu1 %vm975_vm0, %v1112_v8 }
 0x335   : > { %v2337_v13 = vpop.f32.mrb[8].mxu1 }
 0x336   : > { %v1220_v14 = vadd.f32 %v2337_v13, %v2134_v12  ;;  %v1214_v15 = vpop.f32.mrb[9].mxu1 }
 0x337   : > { %v1215_v16 = vadd.f32 %v2134_v12, %v1214_v15 }
 0x338   : > { %v1254_v19 = vmax.f32 %v1220_v14, 0.0 }
 0x339   : > { %v1253_v17 = vmax.f32 %v1215_v16, 0.0  ;;  %v2340_v18 = vpop.f32.mrb[10].mxu1 }
 0x33a   : > { %v1230_v20 = vadd.f32 %v2340_v18, %v2134_v12  ;;  %v1224_v21 = vpop.f32.mrb[11].mxu1 }
 0x33b   : > { %v1225_v22 = vadd.f32 %v2134_v12, %v1224_v21  ;;  %2355 = vmatprep.mubr.msk.f32.mxu1 %vm975_vm0, %v1253_v17 }
 0x33c   : > { %2356 = vmatmul.mubr.msk.f32.vlgmr.msra.gmra.mrb[16].mxu1 %vm975_vm0, %v1254_v19  ;;  %v1256_v25 = vmax.f32 %v1230_v20, 0.0 }
 0x33d   : > { %v1255_v23 = vmax.f32 %v1225_v22, 0.0  ;;  %v2343_v24 = vpop.f32.mrb[12].mxu1  ;;  %2502 = vmatpush3.bf16.msra.mxu1 %v2477_v11 }
 0x33e   : > { %v1240_v26 = vadd.f32 %v2343_v24, %v2134_v12  ;;  %v1234_v27 = vpop.f32.mrb[13].mxu1  ;;  %2501 = vmatprep.subr.bf16.mxu1 %v2481_v39 }
 0x33f   : > { %v1235_v28 = vadd.f32 %v2134_v12, %v1234_v27  ;;  %2358 = vmatprep.mubr.msk.f32.mxu1 %vm975_vm0, %v1255_v23 }
 0x340   : > { %2359 = vmatmul.mubr.msk.f32.gmra.mrb[18].mxu1 %vm975_vm0, %v1256_v25  ;;  %v1258_v31 = vmax.f32 %v1240_v26, 0.0 }
 0x341   : > { %v1257_v29 = vmax.f32 %v1235_v28, 0.0  ;;  %v2346_v30 = vpop.f32.mrb[14].mxu1  ;;  %2503 = vmatpush3.bf16.msra.mxu1 %v2481_v39 }
 0x342   : > { %v1250_v32 = vadd.f32 %v2346_v30, %v2134_v12  ;;  %v1244_v33 = vpop.f32.mrb[15].mxu1 }
 0x343   : > { %v1245_v34 = vadd.f32 %v2134_v12, %v1244_v33  ;;  %2361 = vmatprep.mubr.msk.f32.mxu1 %vm975_vm0, %v1257_v29 }
 0x344   : > { %2362 = vmatmul.mubr.msk.f32.gmra.mrb[20].mxu1 %vm975_vm0, %v1258_v31  ;;  %v1260_v36 = vmax.f32 %v1250_v32, 0.0 }
 0x345   : > { %v1259_v35 = vmax.f32 %v1245_v34, 0.0 }
 0x347   : > { %2364 = vmatprep.mubr.msk.f32.mxu1 %vm975_vm0, %v1259_v35 }
 0x348   : > { %2365 = vmatmul.mubr.msk.f32.gmra.mrb[22].mxu1 %vm975_vm0, %v1260_v36 }
 0x40f   : > { %v2357_v41 = vpop.f32.mrb[16].mxu1 }
 0x410   : > { %v1368_v42 = vadd.f32 %v2357_v41, %v2143_v40  ;;  %v1362_v43 = vpop.f32.mrb[17].mxu1 }
 0x411   : > { %v1363_v44 = vadd.f32 %v2143_v40, %v1362_v43 }
 0x412   : > { %v1402_v47 = vmax.f32 %v1368_v42, 0.0 }
 0x413   : > { %v1401_v45 = vmax.f32 %v1363_v44, 0.0  ;;  %v2360_v46 = vpop.f32.mrb[18].mxu1 }
 0x414   : > { %v1378_v48 = vadd.f32 %v2360_v46, %v2143_v40  ;;  %v1372_v49 = vpop.f32.mrb[19].mxu1 }
 0x415   : > { %v1373_v50 = vadd.f32 %v2143_v40, %v1372_v49  ;;  %2375 = vmatprep.mubr.msk.f32.mxu0 %vm975_vm0, %v1401_v45 }
 0x416   : > { %2376 = vmatmul.mubr.msk.f32.vlgmr.msra.gmra.mrb[8].mxu0 %vm975_vm0, %v1402_v47  ;;  %v1404_v53 = vmax.f32 %v1378_v48, 0.0 }
 0x417   : > { %v1403_v51 = vmax.f32 %v1373_v50, 0.0  ;;  %v2363_v52 = vpop.f32.mrb[20].mxu1 }
 0x418   : > { %v1388_v54 = vadd.f32 %v2363_v52, %v2143_v40  ;;  %v1382_v55 = vpop.f32.mrb[21].mxu1 }
 0x419   : > { %v1383_v56 = vadd.f32 %v2143_v40, %v1382_v55  ;;  %2378 = vmatprep.mubr.msk.f32.mxu0 %vm975_vm0, %v1403_v51 }
 0x41a   : > { %2379 = vmatmul.mubr.msk.f32.gmra.mrb[10].mxu0 %vm975_vm0, %v1404_v53  ;;  %v1406_v59 = vmax.f32 %v1388_v54, 0.0 }
 0x41b   : > { %v1405_v57 = vmax.f32 %v1383_v56, 0.0  ;;  %v2366_v58 = vpop.f32.mrb[22].mxu1 }
 0x41c   : > { %v1398_v60 = vadd.f32 %v2366_v58, %v2143_v40  ;;  %v1392_v61 = vpop.f32.mrb[23].mxu1 }
 0x41d   : > { %v1393_v62 = vadd.f32 %v2143_v40, %v1392_v61  ;;  %2381 = vmatprep.mubr.msk.f32.mxu0 %vm975_vm0, %v1405_v57 }
 0x41e   : > { %2382 = vmatmul.mubr.msk.f32.gmra.mrb[12].mxu0 %vm975_vm0, %v1406_v59  ;;  %v1408_v0 = vmax.f32 %v1398_v60, 0.0 }
 0x41f   : > { %v1407_v63 = vmax.f32 %v1393_v62, 0.0 }
 0x421   : > { %2384 = vmatprep.mubr.msk.f32.mxu1 %vm975_vm0, %v1407_v63 }
 0x422   : > { %2385 = vmatmul.mubr.msk.f32.vlgmr.msra.gmra.mrb[24].mxu1 %vm975_vm0, %v1408_v0 }
 0x4e9   : > { %v2377_v2 = vpop.f32.mrb[8].mxu0 }
 0x4ea   : > { %v1516_v3 = vadd.f32 %v2377_v2, %v2152_v1  ;;  %v1510_v4 = vpop.f32.mrb[9].mxu0 }
 0x4eb   : > { %v1511_v5 = vadd.f32 %v2152_v1, %v1510_v4 }
 0x4ec   : > { %v1556_v6 = vsel %vm975_vm0, %v1516_v3, -inf }
 0x4ed   : > { %v1557_v7 = vrot.slane %v1556_v6, 4  ;;  %v1549_v8 = vsel %vm975_vm0, %v1511_v5, -inf  ;;  %v2380_v9 = vpop.f32.mrb[10].mxu0 }
 0x4ee   : > { %v1550_v10 = vrot.slane %v1549_v8, 4  ;;  %v1526_v11 = vadd.f32 %v2380_v9, %v2152_v1  ;;  %v1520_v12 = vpop.f32.mrb[11].mxu0 }
 0x4ef   : > { %v1558_v13 = vmax.f32 %v1556_v6, %v1557_v7  ;;  %v1521_v14 = vadd.f32 %v2152_v1, %v1520_v12 }
 0x4f0   : > { %v1551_v15 = vmax.f32 %v1549_v8, %v1550_v10  ;;  %v1570_v16 = vsel %vm975_vm0, %v1526_v11, -inf  ;;  %v2814_v10 = vmov (!%p2161_p0), -inf  }
 0x4f1   : > { %v1559_v17 = vrot.slane %v1558_v13, 2  ;;  %v1571_v18 = vrot.slane %v1570_v16, 4  ;;  %v1563_v19 = vsel %vm975_vm0, %v1521_v14, -inf  ;;  %v2383_v20 = vpop.f32.mrb[12].mxu0  ;;  %1609 = vst.msk [vmem:[#allocation2] sm:$0xff] (!%p2161_p0), %vm975_vm0, %v2814_v10 }
 0x4f2   : > { %v1552_v21 = vrot.slane %v1551_v15, 2  ;;  %v1564_v22 = vrot.slane %v1563_v19, 4  ;;  %v1536_v23 = vadd.f32 %v2383_v20, %v2152_v1  ;;  %v1530_v24 = vpop.f32.mrb[13].mxu0 }
 0x4f3   : > { %v1560_v25 = vmax.f32 %v1558_v13, %v1559_v17  ;;  %v1572_v26 = vmax.f32 %v1570_v16, %v1571_v18  ;;  %v1531_v27 = vadd.f32 %v2152_v1, %v1530_v24 }
 0x4f4   : > { %v1553_v28 = vmax.f32 %v1551_v15, %v1552_v21  ;;  %v1565_v29 = vmax.f32 %v1563_v19, %v1564_v22  ;;  %v1584_v30 = vsel %vm975_vm0, %v1536_v23, -inf }
 0x4f5   : > { %v1561_v31 = vrot.slane %v1560_v25, 1  ;;  %v1573_v32 = vrot.slane %v1572_v26, 2  ;;  %v1585_v33 = vrot.slane %v1584_v30, 4  ;;  %v1577_v34 = vsel %vm975_vm0, %v1531_v27, -inf  ;;  %v2386_v35 = vpop.f32.mrb[24].mxu1 }
 0x4f6   : > { %v1554_v36 = vrot.slane %v1553_v28, 1  ;;  %v1566_v37 = vrot.slane %v1565_v29, 2  ;;  %v1578_v38 = vrot.slane %v1577_v34, 4  ;;  %v1546_v39 = vadd.f32 %v2386_v35, %v2152_v1  ;;  %v1540_v40 = vpop.f32.mrb[25].mxu1 }
 0x4f7   : > { %v1562_v41 = vmax.f32 %v1560_v25, %v1561_v31  ;;  %v1574_v42 = vmax.f32 %v1572_v26, %v1573_v32  ;;  %v1586_v43 = vmax.f32 %v1584_v30, %v1585_v33  ;;  %v1541_v44 = vadd.f32 %v2152_v1, %v1540_v40 }
 0x4f8   : > { %v1555_v45 = vmax.f32 %v1553_v28, %v1554_v36  ;;  %v1567_v46 = vmax.f32 %v1565_v29, %v1566_v37  ;;  %v1579_v47 = vmax.f32 %v1577_v34, %v1578_v38  ;;  %v1598_v48 = vsel %vm975_vm0, %v1546_v39, -inf }
 0x4f9   : > { %v1575_v49 = vrot.slane %v1574_v42, 1  ;;  %v1587_v50 = vrot.slane %v1586_v43, 2  ;;  %v1599_v51 = vrot.slane %v1598_v48, 4  ;;  %v1591_v52 = vsel %vm975_vm0, %v1541_v44, -inf }
 0x4fa   : > { %v1568_v53 = vrot.slane %v1567_v46, 1  ;;  %v1580_v54 = vrot.slane %v1579_v47, 2  ;;  %v1592_v55 = vrot.slane %v1591_v52, 4 }
 0x4fb   : > { %v1576_v56 = vmax.f32 %v1574_v42, %v1575_v49  ;;  %v1588_v57 = vmax.f32 %v1586_v43, %v1587_v50  ;;  %v1600_v58 = vmax.f32 %v1598_v48, %v1599_v51 }
 0x4fc   : > { %v1569_v59 = vmax.f32 %v1567_v46, %v1568_v53  ;;  %v1581_v60 = vmax.f32 %v1579_v47, %v1580_v54  ;;  %v1593_v61 = vmax.f32 %v1591_v52, %v1592_v55 }
 0x4fd   : > { %v1589_v62 = vrot.slane %v1588_v57, 1  ;;  %v1601_v63 = vrot.slane %v1600_v58, 2 }
 0x4fe   : > { %v1582_v0 = vrot.slane %v1581_v60, 1  ;;  %v1594_v1 = vrot.slane %v1593_v61, 2  ;;  %1608 = sbr.rel (%p2161_p0) target bundleno = 1285 (0x505), region = 112 }
 0x4ff   : > { %v1590_v2 = vmax.f32 %v1588_v57, %v1589_v62  ;;  %v1602_v3 = vmax.f32 %v1600_v58, %v1601_v63 }
 0x500   : > { %v1583_v4 = vmax.f32 %v1581_v60, %v1582_v0  ;;  %v1595_v5 = vmax.f32 %v1593_v61, %v1594_v1 }
 0x501   : > { %v1603_v6 = vrot.slane %v1602_v3, 1 }
 0x502   : > { %v1596_v7 = vrot.slane %v1595_v5, 1 }
 0x503   : > { %v1604_v8 = vmax.f32 %v1602_v3, %v1603_v6 }
 0x504   : > { %v1597_v9 = vmax.f32 %v1595_v5, %v1596_v7 }
 0x505 PF: > { %vm1619_vm1 = vcmask 1041409   ;;  %vm1621_vm2 = vcmask 1042434   ;;  %vm1623_vm3 = vcmask 1043459   ;;  %vm1625_vm4 = vcmask 1044484   ;;  %v1610_v15 = vld [vmem:[#allocation2] sm:$0xff]  ;;  %p2162_p2 = scmp.ne.s32.totalorder %s2790_s3, 1 }
 0x506   : > { %v1620_v11 = vsel %vm1619_vm1, %v1562_v41, %v1555_v45  ;;  %vm1627_vm5 = vcmask 1045509   ;;  %vm1629_vm6 = vcmask 1046534   ;;  %vm1631_vm7 = vcmask 1047559   ;;  %s3539_s0 = sld [smem:[#allocation27_spill]] (!%p2162_p2)  ;;  %s3540_s19 = sld [smem:[#allocation28_spill]] (!%p2162_p2) }
 0x507   : > { %v1622_v12 = vsel %vm1621_vm2, %v1569_v59, %v1620_v11  ;;  %v2815_v23 = vmov (!%p2162_p2), 0.0|0.0   ;;  %vm2816_vm8 = vmmov (!%p2162_p2), 0   ;;  %v2817_v26 = vmov (!%p2162_p2), 0.0   ;;  %s3541_s13 = sld [smem:[#allocation31_spill]] (!%p2162_p2)  ;;  %s3542_s26 = sld [smem:[#allocation29_spill]] (!%p2162_p2) }
 0x508   : > { %v1624_v13 = vsel %vm1623_vm3, %v1576_v56, %v1622_v12  ;;  %2485 = vmatprep.subr.bf16.mxu0 (!%p2162_p2), %v2815_v23  ;;  %2395 = vmatprep.mubr.msk.f32.mxu0 (!%p2162_p2), %vm2816_vm8, %v2817_v26  ;;  %s3544_s3 = sld [smem:[#allocation32_spill]] (!%p2162_p2)  ;;  %vm1820_vm9 = vcmask (!%p2162_p2), 130048   ;;  %s3545_s17 = sld [smem:[#allocation30_spill]] (!%p2162_p2)  ;;  %vm1903_vm10 = vcmask (!%p2162_p2), 64512  }
 0x509   : > { %v1626_v14 = vsel %vm1625_vm4, %v1583_v4, %v1624_v13  ;;  %1639 = sbr.rel (%p2162_p2) target bundleno = 2166 (0x876), region = 116  ;;  %2491 = vmatprep.subr.bf16.mxu1 (!%p2162_p2), %v2815_v23  ;;  %2406 = vmatprep.mubr.msk.f32.mxu1 (!%p2162_p2), %vm2816_vm8, %v2817_v26  ;;  %s3546_s14 = sld [smem:[#allocation33_spill]] (!%p2162_p2) }
 0x50a   : > { %v1628_v16 = vsel %vm1627_vm5, %v1590_v2, %v1626_v14 }
 0x50b   : > { %v1630_v17 = vsel %vm1629_vm6, %v1597_v9, %v1628_v16 }
 0x50c   : > { %v1632_v18 = vsel %vm1631_vm7, %v1604_v8, %v1630_v17  ;;  %v1641_v20 = vld [vmem:[%s3539_s0] sm:$0xff] (!%p2162_p2)  ;;  %v1642_v21 = vld [vmem:[%s3539_s0 + $0x8] sm:$0xff] (!%p2162_p2)  ;;  %v1643_v22 = vld [vmem:[%s3539_s0 + $0x10] sm:$0xff] (!%p2162_p2) }
 0x50d   : > { %v1634_v19 = vmax.f32 %v1610_v15, %v1632_v18  ;;  %v2486_v24 = vpack.c.bf16 (!%p2162_p2), %v1642_v21, %v1641_v20  ;;  %v1644_v25 = vld [vmem:[%s3539_s0 + $0x18] sm:$0xff] (!%p2162_p2)  ;;  %v1726_v27 = vld [vmem:[%s3540_s19] sm:$0xff] (!%p2162_p2)  ;;  %v1727_v28 = vld [vmem:[%s3540_s19 + $0x8] sm:$0xff] (!%p2162_p2)  ;;  %s3543_s0 = smov (!%p2162_p2), %s3542_s26 }
 0x50e   : > { %v2489_v29 = vpack.c.bf16 (!%p2162_p2), %v1644_v25, %v1643_v22  ;;  %v2492_v30 = vpack.c.bf16 (!%p2162_p2), %v1727_v28, %v1726_v27  ;;  %v1728_v32 = vld [vmem:[%s3540_s19 + $0x10] sm:$0xff] (!%p2162_p2)  ;;  %v1729_v33 = vld [vmem:[%s3540_s19 + $0x18] sm:$0xff] (!%p2162_p2)  ;;  %v2163_v35 = vld [vmem:[%s3541_s13] ss:$0 sm:$0xff] (!%p2162_p2) }
 0x50f   : > { %1635 = vst.msk [vmem:[#allocation2] sm:$0xff] %vm975_vm0, %v1634_v19  ;;  %2487 = vmatpush3.bf16.msra.mxu0 (!%p2162_p2), %v2486_v24  ;;  %v2495_v34 = vpack.c.bf16 (!%p2162_p2), %v1729_v33, %v1728_v32  ;;  %v1811_v40 = vld [vmem:[%s3542_s26] sm:$0xff] (!%p2162_p2)  ;;  %v1812_v41 = vld [vmem:[%s3543_s0 + $0x8] sm:$0xff] (!%p2162_p2) }
 0x510   : > { %2488 = vmatprep.subr.bf16.mxu0 %v2815_v23  ;;  %2493 = vmatpush3.bf16.msra.mxu1 %v2492_v30  ;;  %v2498_v42 = vpack.c.bf16 %v1812_v41, %v1811_v40  ;;  %v2165_v43 = vld [vmem:[%s3544_s3] ss:$0 sm:$0xff]  ;;  %s3547_s3 = sld [smem:[#allocation34_spill]] }
 0x511   : > { %2494 = vmatprep.subr.bf16.mxu1 %v2815_v23  ;;  %v1895_v48 = vld [vmem:[%s3545_s17] sm:$0xff] }
 0x512   : > { %v2167_v49 = vld [vmem:[%s3546_s14] ss:$0 sm:$0xff] }
 0x513   : > { %2490 = vmatpush3.bf16.msra.mxu0 %v2489_v29 }
 0x514   : > { %2497 = vmatprep.subr.bf16.mxu0 %v2815_v23  ;;  %2496 = vmatpush3.bf16.msra.mxu1 %v2495_v34 }
 0x515   : > { %2416 = vmatprep.subr.mxu1 %v2817_v26 }
 0x516   : > { %v1640_v31 = vld [vmem:[#allocation2] sm:$0xff] }
 0x517   : > { %2396 = vmatmul.mubr.msk.f32.vlgmr.msra.gmra.mrb[0].mxu0 %vm975_vm0, %v1640_v31  ;;  %v2169_v54 = vld [vmem:[%s3547_s3] ss:$0 sm:$0xff] }
 0x518   : > { %2413 = vmatprep.mubr.msk.f32.mxu0 %vm2816_vm8, %v2817_v26  ;;  %2499 = vmatpush3.bf16.msra.mxu0 %v2498_v42 }
 0x5ea   : > { %v1721_v36 = vpop.f32.mrb[0].mxu0 }
 0x5eb   : > { %v1722_v37 = vadd.f32 %v2163_v35, %v1721_v36  ;;  %v2397_v38 = vpop.f32.mrb[1].mxu0 }
 0x5ed   : > { %v1725_v39 = vmax.f32 %v1722_v37, 0.0 }
 0x5ef   : > { %2407 = vmatmul.mubr.msk.f32.vlgmr.msra.gmra.mrb[0].mxu1 %vm975_vm0, %v1725_v39 }
 0x5f0   : > { %2418 = vmatprep.mubr.msk.f32.mxu1 %vm2816_vm8, %v2817_v26  ;;  %2417 = vmatpush3.msra.mxu1 %v1895_v48 }
 0x6c2   : > { %v1806_v44 = vpop.f32.mrb[0].mxu1 }
 0x6c3   : > { %v1807_v45 = vadd.f32 %v2165_v43, %v1806_v44  ;;  %v2408_v46 = vpop.f32.mrb[1].mxu1 }
 0x6c5   : > { %v1810_v47 = vmax.f32 %v1807_v45, 0.0 }
 0x6c7   : > { %2414 = vmatmul.mubr.msk.f32.vlgmr.msra.gmra.mrb[2].mxu0 %vm1820_vm9, %v1810_v47 }
 0x79a   : > { %v1890_v50 = vpop.f32.mrb[2].mxu0 }
 0x79b   : > { %v1891_v51 = vadd.f32 %v2167_v49, %v1890_v50  ;;  %v2415_v52 = vpop.f32.mrb[3].mxu0 }
 0x79d   : > { %v1894_v53 = vmax.f32 %v1891_v51, 0.0 }
 0x79f   : > { %2419 = vmatmul.mubr.msk.f32.vlgmr.msra.gmra.mrb[2].mxu1 %vm1903_vm10, %v1894_v53 }
 0x872   : > { %v1973_v55 = vpop.f32.mrb[2].mxu1 }
 0x873   : > { %v1974_v56 = vadd.f32 %v2169_v54, %v1973_v55  ;;  %v2420_v57 = vpop.f32.mrb[3].mxu1 }
 0x875   : > { %1977 = vst [vmem:[%s3324_s20] sm:$0xff] %v1974_v56 }
 0x876 PF: > { %s3548_s13 = sld [smem:[#allocation12_spill]]  ;;  %s3549_s24 = sld [smem:[#allocation35_spill]] }
 0x877   : > { %s1992_s5 = sshll.u32 %s3324_s20, 4  ;;  %s1979_s6 = scalar_lea.sflag [#allocation5], %s3148_s9  ;;  %s1993_s5 = int_to_ptr.vmem [resolvable:$true] %s1992_s5 }
 0x878   : > { %s2680_s30 = scalar_lea.vmem %s1993_s5, 128  ;;  %p3551_p6 = scmp.ne.s32.totalorder %s3518_s15, 0 }
 0x879   : > { %p2681_p12 = scmp.ne.s32.totalorder %s1993_s5, %s2680_s30  ;;  %s2818_s10 = smov [#allocation8]  }
 0x87a   : > { %s2684_s3 = sshll.u32 %s2818_s10, 4  ;;  %s2685_s3 = int_to_ptr.vmem [resolvable:$false] %s2684_s3 }
 0x87b   : > { %p2682_p9 = pnand %p2681_p12, %p3551_p6  ;;  %s2686_s8 = scalar_lea.vmem %s2685_s3, 256 }
 0x87c   : > { %s2172_s18 = sshll.u32 %s3548_s13, 7  ;;  %s3550_s14 = smov %s3549_s24 }
 0x87d   : > { %s3386_s0 = scalar_lea.hbm %s3549_s24, %s2172_s18  ;;  %p2683_p10 = pneg %p2682_p9 }
 0x87e   : > { %p2687_p3 = scmp.lt.s32.totalorder %s1993_s5, %s2685_s3  ;;  %p2688_p7 = scmp.lt.s32.totalorder %s2686_s8, %s2680_s30 }
 0x880   : > { %p2689_p8 = por %p2688_p7, %p2687_p3 }
 0x882   : > { %p2690_p11 = pnand %p2689_p8, %p2683_p10 }
 0x884   : > { %2693 = shalt.err (!%p2690_p11)
}
 0x885   : > { %s2694_s9 = scalar_lea.hbm %s3386_s0, 128  ;;  %s2698_s18 = scalar_lea.hbm %s3550_s14, 256 }
 0x886   : > { %p2695_p13 = scmp.ne.s32.totalorder %s3386_s0, %s2694_s9  ;;  %p2699_p4 = scmp.lt.u32.totalorder %s3386_s0, %s3550_s14 }
 0x887   : > { %p2700_p0 = scmp.lt.u32.totalorder %s2698_s18, %s2694_s9  ;;  %p2702_p12 = scmp.lt.u32.totalorder %s2694_s9, %s3386_s0 }
 0x888   : > { %p2696_p1 = pnand %p2695_p13, %p3551_p6 }
 0x889   : > { %p2701_p2 = por %p2700_p0, %p2699_p4 }
 0x88a   : > { %p2697_p5 = pneg %p2696_p1 }
 0x88b   : > { %p2703_p9 = por %p2702_p12, %p2701_p2 }
 0x88d   : > { %p2704_p10 = pnand %p2703_p9, %p2697_p5 }
 0x88f   : > { %2707 = shalt.err (!%p2704_p10)
}
 0x890   : > { %2508 = dma.vmem_to_hbm [thread:$0]  (%p3551_p6), %s1993_s5, 128, %s3386_s0, %s1979_s6  }
 0x891 PF: > { %p2522_p3 = scmp.ge.s32.totalorder %s2806_s4, 2  ;;  %s2004_s8 = sand.u32 1, %s2766_s1  }
 0x892   : > { %p3552_p7 = scmp.ne.s32.totalorder %s3519_s16, 0  ;;  %s2005_s24 = scalar_lea.sflag [#allocation5], %s2004_s8 }
 0x894   : > { %p2518_p8 = pnand %p2522_p3, %p3552_p7 }
 0x896   : > { %2761 = dma.done.wait (!%p2518_p8), %s2005_s24, 128  }
 0x897   : > { %2763 = vsyncadd (!%p2518_p8), %s2005_s24, 4294967168  ;;  %s39_s4 = sadd.s32 1, %s2806_s4   ;;  %s3553_s5 = sld [smem:[#allocation13_spill]] }
 0x898   : > { %p36_p11 = scmp.ge.s32.totalorder %s39_s4, 6   ;;  %s3554_s6 = sld [smem:[#allocation14_spill]] }
 0x899   : > { %s3555_s1 = smov %s2770_s22  ;;  %s3556_s22 = smov %s2774_s23 }
 0x89a   : > { %s3557_s23 = smov %s3074_s7  ;;  %s3558_s24 = smov %s2782_s2 }
 0x89b   : > { %s3559_s2 = smov %s2786_s25  ;;  %s3560_s25 = smov %s3008_s12 }
 0x89c   : > { %s3561_s3 = smov %s2798_s27  ;;  %s3562_s26 = smov %s2802_s28 }
 0x89d   : > { %s3563_s27 = smov %s3553_s5  ;;  %38 = sbr.rel (!%p36_p11) target bundleno = 33 (0x21), region = 169 }
 0x89e   : > { %s3564_s28 = smov %s3554_s6 }
 0x8a4   :  { %2010 = vsyncpa [#allocation4], 1 }
 0x8a5   :  { %2012 = vsyncpa [#allocation4 + $0x1], 1 }
 0x8a6   :  { %2013 = vsyncpa [#allocation7], 1 }
 0x8a7   :  { %2015 = vsyncpa [#allocation7 + $0x1], 1 }
 0x8a8   :  { %2016 = vsyncpa [#allocation5], 1 }
 0x8a9   :  { %2018 = vsyncpa [#allocation5 + $0x1], 1 }

// kernel: tpu_custom_call.1
= control target key start
LH: loop header
LB: loop body
LE: loop exit
PB: predicated region body
PF: predicated region fallthrough
CT: control target
= control target key end

     0   :  { %s3444_s0 = inlined_call_operand.hbm [shape: f32[16,16,128], index: 0, kind: input, shape index: {}]   ;;  %s3445_s1 = inlined_call_operand.vmem [shape: f32[16,32], index: 1, kind: input, shape index: {}]   ;;  %s3446_s2 = inlined_call_operand.hbm [shape: f32[16,32], index: 2, kind: input, shape index: {}]   ;;  %s3447_s3 = inlined_call_operand.vmem [shape: f32[128,32], index: 3, kind: input, shape index: {}]   ;;  %s3448_s4 = inlined_call_operand.vmem [shape: f32[32,32], index: 4, kind: input, shape index: {}]   ;;  %s3449_s5 = inlined_call_operand.vmem [shape: f32[32,32], index: 5, kind: input, shape index: {}]   ;;  %s3450_s6 = inlined_call_operand.vmem [shape: f32[32,32], index: 6, kind: input, shape index: {}]   ;;  %s3451_s7 = inlined_call_operand.vmem [shape: f32[32,32], index: 7, kind: input, shape index: {}]   ;;  %s3452_s8 = inlined_call_operand.vmem [shape: f32[1,32], index: 8, kind: input, shape index: {}]   ;;  %s3453_s9 = inlined_call_operand.vmem [shape: f32[1,32], index: 9, kind: input, shape index: {}]   ;;  %s3454_s10 = inlined_call_operand.vmem [shape: f32[1,32], index: 10, kind: input, shape index: {}]   ;;  %s3455_s11 = inlined_call_operand.vmem [shape: f32[1,32], index: 11, kind: input, shape index: {}]   ;;  %s3456_s12 = inlined_call_operand.vmem [shape: f32[32,32], index: 12, kind: input, shape index: {}]   ;;  %s3457_s13 = inlined_call_operand.vmem [shape: f32[32,16], index: 13, kind: input, shape index: {}]   ;;  %s3458_s14 = inlined_call_operand.vmem [shape: f32[16,8], index: 14, kind: input, shape index: {}]   ;;  %s3459_s15 = inlined_call_operand.vmem [shape: f32[8,128], index: 15, kind: input, shape index: {}]   ;;  %s3460_s16 = inlined_call_operand.vmem [shape: f32[1,32], index: 16, kind: input, shape index: {}]   ;;  %s3461_s17 = inlined_call_operand.vmem [shape: f32[1,16], index: 17, kind: input, shape index: {}]   ;;  %s3462_s18 = inlined_call_operand.vmem [shape: f32[1,8], index: 18, kind: input, shape index: {}]   ;;  %s3463_s19 = inlined_call_operand.vmem [shape: f32[1,128], index: 19, kind: input, shape index: {}]   ;;  %s3464_s20 = inlined_call_operand.hbm [shape: f32[16,128], index: 20, kind: output, shape index: {}]  }
   0x1   :  { %3486 = sst [smem:[#allocation15_spill]] %s3444_s0 }
   0x2   :  { %3487 = sst [smem:[#allocation16_spill]] %s3445_s1 }
   0x3   :  { %3488 = sst [smem:[#allocation17_spill]] %s3446_s2 }
   0x4   :  { %3489 = sst [smem:[#allocation18_spill]] %s3447_s3 }
   0x5   :  { %3490 = sst [smem:[#allocation19_spill]] %s3448_s4 }
   0x6   :  { %3491 = sst [smem:[#allocation20_spill]] %s3449_s5 }
   0x7   :  { %3492 = sst [smem:[#allocation21_spill]] %s3450_s6 }
   0x8   :  { %3493 = sst [smem:[#allocation22_spill]] %s3451_s7 }
   0x9   :  { %3494 = sst [smem:[#allocation23_spill]] %s3452_s8 }
   0xa   :  { %3495 = sst [smem:[#allocation24_spill]] %s3453_s9 }
   0xb   :  { %3496 = sst [smem:[#allocation25_spill]] %s3454_s10 }
   0xc   :  { %3497 = sst [smem:[#allocation26_spill]] %s3455_s11 }
   0xd   :  { %3498 = sst [smem:[#allocation27_spill]] %s3456_s12 }
   0xe   :  { %3499 = sst [smem:[#allocation28_spill]] %s3457_s13 }
   0xf   :  { %3500 = sst [smem:[#allocation29_spill]] %s3458_s14 }
  0x10   :  { %3501 = sst [smem:[#allocation30_spill]] %s3459_s15 }
  0x11   :  { %3502 = sst [smem:[#allocation31_spill]] %s3460_s16 }
  0x12   :  { %3503 = sst [smem:[#allocation32_spill]] %s3461_s17 }
  0x13   :  { %3504 = sst [smem:[#allocation33_spill]] %s3462_s18 }
  0x14   :  { %3505 = sst [smem:[#allocation34_spill]] %s3463_s19 }
  0x15   :  { %3506 = sst [smem:[#allocation35_spill]] %s3464_s20 }
  0x16   :  { %25 = vsyncpa [#allocation4], 0 }
  0x17   :  { %27 = vsyncpa [#allocation4 + $0x1], 0 }
  0x18   :  { %28 = vsyncpa [#allocation7], 0 }
  0x19   :  { %30 = vsyncpa [#allocation7 + $0x1], 0 }
  0x1a   :  { %31 = vsyncpa [#allocation5], 0 }
  0x1b   :  { %33 = vsyncpa [#allocation5 + $0x1], 0  ;;  %s2924_s1 = smov 0   ;;  %s2926_s22 = smov 0  }
  0x1c   :  { %s2928_s23 = smov 0   ;;  %s2930_s24 = smov 0  }
  0x1d   :  { %s2932_s2 = smov 0   ;;  %s2934_s25 = smov 0  }
  0x1e   :  { %s2936_s3 = smov 0   ;;  %s2938_s26 = smov 0  }
  0x1f   :  { %s2940_s27 = smov 0   ;;  %s2942_s28 = smov 0  }
  0x20   :  { %s2944_s4 = smov 0  }
  0x21 LB: > { %3507 = sst [smem:[#allocation12_spill]] %s2794_s26  ;;  %s48_s29 = sadd.s32 1, %s2798_s27  ;;  %s2806_s4 = sphi %s2944_s4, %s39_s4   ;;  %s2802_s28 = sphi %s2942_s28, %s3564_s28   ;;  %s2798_s27 = sphi %s2940_s27, %s3563_s27   ;;  %s2794_s26 = sphi %s2938_s26, %s3562_s26   ;;  %s2790_s3 = sphi %s2936_s3, %s3561_s3   ;;  %s2786_s25 = sphi %s2934_s25, %s3560_s25   ;;  %s2782_s2 = sphi %s2932_s2, %s3559_s2   ;;  %s2778_s24 = sphi %s2930_s24, %s3558_s24   ;;  %s2774_s23 = sphi %s2928_s23, %s3557_s23   ;;  %s2770_s22 = sphi %s2926_s22, %s3556_s22   ;;  %s2766_s1 = sphi %s2924_s1, %s3555_s1  }
  0x22   : > { %s51_s30 = sadd.s32 1, %s2802_s28  ;;  %p49_p0 = scmp.ge.s32.totalorder %s48_s29, 2 }
  0x23   : > { %s60_s0 = sadd.s32 1, %s2786_s25  ;;  %p67_p1 = scmp.ne.s32.totalorder %s2786_s25, %s2782_s2 }
  0x24   : > { %p3476_p2 = scmp.eq.s32.totalorder %s2806_s4, 0  ;;  %s3566_s29 = smov (%p49_p0, %s48_s29), 0 }
  0x25   : > { %3508 = sst [smem:[#allocation13_spill]] %s3566_s29  ;;  %s3568_s30 = smov (!%p49_p0, %s51_s30), %s2802_s28 }
  0x26   : > { %s56_s21 = ssub.s32 %s2798_s27, %s3566_s29  ;;  %p2992_p3 = por %p3476_p2, %p67_p1 }
  0x27   : > { %p53_p4 = scmp.ge.s32.totalorder %s3568_s30, 2  ;;  %p3475_p5 = scmp.lt.s32.totalorder %s2806_s4, 4 }
  0x28   : > { %s583_s26 = sand.u32 1, %s2786_s25   ;;  %s2175_s29 = sshll.u32 %s2802_s28, 4 }
  0x29   : > { %s3570_s30 = smov (%p53_p4, %s3568_s30), 0  ;;  %s2114_s19 = sshll.u32 %s583_s26, 6 }
  0x2a   : > { %3510 = sst [smem:[#allocation14_spill]] %s3570_s30  ;;  %s3002_s18 = ssub.s32 %s2802_s28, %s3570_s30 }
  0x2b   : > { %s57_s15 = sor.u32 %s56_s21, %s3002_s18  ;;  %s593_s17 = sadd.s32 %s2798_s27, %s2175_s29 }
  0x2c   : > { %p58_p6 = scmp.eq.s32.totalorder %s57_s15, 0  ;;  %s2117_s14 = sshll.u32 %s593_s17, 7 }
  0x2d   : > { %s587_s16 = scalar_lea.vmem [#allocation3], %s2114_s19  ;;  %s3511_s9 = sld [smem:[#allocation15_spill]] }
  0x2e   : > { %s596_s13 = sshll.u32 %s587_s16, 4  ;;  %p3021_p7 = pnand %p3475_p5, %p2992_p3  ;;  %s3015_s13 = int_to_ptr.vmem [resolvable:$true] %s596_s13 }
  0x2f   : > { %s3008_s12 = scalar_select %p58_p6, %s2786_s25, %s60_s0  }
  0x30   : > { %p2120_p8 = scmp.ge.s32.totalorder %s2806_s4, 1  ;;  %s3026_s16 = scalar_lea.sflag [#allocation4], %s583_s26 }
  0x31   : > { %p2622_p10 = pneg %p3021_p7 }
  0x33   : > { %s3013_s7 = scalar_lea.hbm %s3511_s9, %s2117_s14  ;;  %s2625_s17 = scalar_lea.hbm %s3511_s9, 4096 }
  0x34   : > { %s2620_s10 = scalar_lea.hbm %s3013_s7, 1024  ;;  %p2626_p13 = scmp.lt.u32.totalorder %s3013_s7, %s3511_s9 }
  0x35   : > { %p2621_p9 = scmp.ne.s32.totalorder %s3013_s7, %s2620_s10  ;;  %p2627_p0 = scmp.lt.u32.totalorder %s2625_s17, %s2620_s10 }
  0x36   : > { %p2629_p3 = scmp.lt.u32.totalorder %s2620_s10, %s3013_s7 }
  0x37   : > { %p2623_p11 = pnand %p2622_p10, %p2621_p9  ;;  %p2628_p1 = por %p2627_p0, %p2626_p13 }
  0x39   : > { %p2624_p12 = pneg %p2623_p11  ;;  %p2630_p4 = por %p2629_p3, %p2628_p1 }
  0x3b   : > { %p2631_p6 = pnand %p2630_p4, %p2624_p12 }
  0x3d   : > { %2634 = shalt.err (!%p2631_p6)
}
  0x3e   : > { %s2635_s26 = scalar_lea.vmem %s3015_s13, 1024  ;;  %s2808_s29 = smov [#allocation3]  }
  0x3f   : > { %p2636_p9 = scmp.ne.s32.totalorder %s3015_s13, %s2635_s26  ;;  %s2640_s0 = sshll.u32 %s2808_s29, 4  ;;  %s2641_s0 = int_to_ptr.vmem [resolvable:$false] %s2640_s0 }
  0x40   : > { %s2642_s21 = scalar_lea.vmem %s2641_s0, 2048  ;;  %p2643_p2 = scmp.lt.s32.totalorder %s3015_s13, %s2641_s0 }
  0x41   : > { %p2638_p11 = pnand %p2636_p9, %p2622_p10  ;;  %p2644_p13 = scmp.lt.s32.totalorder %s2642_s21, %s2635_s26 }
  0x43   : > { %p2639_p5 = pneg %p2638_p11  ;;  %p2645_p0 = por %p2644_p13, %p2643_p2 }
  0x45   : > { %p2646_p1 = pnand %p2645_p0, %p2639_p5 }
  0x47   : > { %2649 = shalt.err (!%p2646_p1)
}
  0x48   : > { %s2809_s10 = smov 256   ;;  %s2810_s11 = smov 128  }
  0x49   : > { %s2811_s14 = smov 8   ;;  %p629_p2 = scmp.lt.s32.totalorder %s2806_s4, 5 }
  0x4a   : > { %2513 = dma.hbm_to_vmem [thread:$0]  (!%p3021_p7), %s3013_s7, 1024, %s3015_s13, %s3026_s16, %s2809_s10, %s2810_s11, %s2811_s14  }
  0x4b   : > { %p3057_p5 = pnand %p2120_p8, %p629_p2  ;;  %s2110_s19 = sadd.s32 4294967295, %s2806_s4  }
  0x4c   : > { %s2111_s20 = sadd.s32 4294967294, %s2806_s4   ;;  %p73_p10 = scmp.ne.s32.totalorder %s2782_s2, %s2778_s24 }
  0x4d   : > { %p74_p12 = scmp.eq.s32.totalorder %s2110_s19, 0  ;;  %p110_p3 = scmp.eq.s32.totalorder %s3002_s18, 0 }
  0x4e   : > { %s112_s26 = sadd.s32 1, %s2774_s23  ;;  %p119_p6 = scmp.ne.s32.totalorder %s2774_s23, %s2770_s22 }
  0x4f   : > { %p3067_p4 = por %p74_p12, %p73_p10  ;;  %p3515_p7 = scmp.eq.s32.totalorder %s2806_s4, 0 }
  0x50   : > { %s3074_s7 = scalar_select %p110_p3, %s2774_s23, %s112_s26  }
  0x51   : > { %s3514_s29 = scalar_select %p3067_p4, 1, 0 }
  0x52   : > { %p3078_p8 = por %p119_p6, %p3515_p7  ;;  %p125_p9 = scmp.ne.s32.totalorder %s2770_s22, %s2766_s1 }
  0x53   : > { %p506_p11 = scmp.eq.s32.totalorder %s2110_s19, 3  ;;  %p512_p13 = scmp.eq.s32.totalorder %s2111_s20, 3 }
  0x54   : > { %p3084_p0 = por %p125_p9, %p74_p12  ;;  %s613_s24 = sand.u32 1, %s2774_s23  }
  0x55   : > { %p3089_p1 = por %p506_p11, %p119_p6  ;;  %p3093_p2 = por %p512_p13, %p125_p9 }
  0x56   : > { %s3517_s18 = scalar_select %p3084_p0, 1, 0 }
  0x57   : > { %s3518_s15 = scalar_select %p3089_p1, 1, 0 }
  0x58   : > { %s3519_s16 = scalar_select %p3093_p2, 1, 0 }
  0x59   : > { %s2118_s0 = sshll.u32 %s613_s24, 3  ;;  %s2119_s21 = sshll.u32 %s2802_s28, 7 }
  0x5a   : > { %s3520_s14 = sld [smem:[#allocation17_spill]]  ;;  %s617_s20 = scalar_lea.vmem [#allocation6], %s2118_s0 }
  0x5b   : > { %s624_s26 = sshll.u32 %s617_s20, 4  ;;  %p3521_p10 = scmp.lt.s32.totalorder %s2806_s4, 4  ;;  %s3103_s26 = int_to_ptr.vmem [resolvable:$true] %s624_s26 }
  0x5c   : > { %s614_s30 = scalar_lea.sflag [#allocation7], %s613_s24 }
  0x5d   : > { %p3109_p12 = pnand %p3521_p10, %p3078_p8 }
  0x5f   : > { %p2652_p6 = pneg %p3109_p12 }
  0x60   : > { %s3101_s19 = scalar_lea.hbm %s3520_s14, %s2119_s21  ;;  %s2655_s13 = scalar_lea.hbm %s3520_s14, 256 }
  0x61   : > { %s2650_s10 = scalar_lea.hbm %s3101_s19, 128  ;;  %p2656_p8 = scmp.lt.u32.totalorder %s3101_s19, %s3520_s14 }
  0x62   : > { %p2651_p3 = scmp.ne.s32.totalorder %s3101_s19, %s2650_s10  ;;  %p2657_p11 = scmp.lt.u32.totalorder %s2655_s13, %s2650_s10 }
  0x63   : > { %p2659_p10 = scmp.lt.u32.totalorder %s2650_s10, %s3101_s19 }
  0x64   : > { %p2653_p7 = pnand %p2652_p6, %p2651_p3  ;;  %p2658_p13 = por %p2657_p11, %p2656_p8 }
  0x66   : > { %p2654_p9 = pneg %p2653_p7  ;;  %p2660_p2 = por %p2659_p10, %p2658_p13 }
  0x68   : > { %p2661_p1 = pnand %p2660_p2, %p2654_p9 }
  0x6a   : > { %2664 = shalt.err (!%p2661_p1)
}
  0x6b   : > { %s2665_s24 = scalar_lea.vmem %s3103_s26, 128  ;;  %s2812_s0 = smov [#allocation6]  }
  0x6c   : > { %p2666_p3 = scmp.ne.s32.totalorder %s3103_s26, %s2665_s24  ;;  %s2670_s21 = sshll.u32 %s2812_s0, 4  ;;  %s2671_s21 = int_to_ptr.vmem [resolvable:$false] %s2670_s21 }
  0x6d   : > { %s2672_s11 = scalar_lea.vmem %s2671_s21, 256  ;;  %p2673_p4 = scmp.lt.s32.totalorder %s3103_s26, %s2671_s21 }
  0x6e   : > { %p2668_p7 = pnand %p2666_p3, %p2652_p6  ;;  %p2674_p8 = scmp.lt.s32.totalorder %s2672_s11, %s2665_s24 }
  0x70   : > { %p2669_p0 = pneg %p2668_p7  ;;  %p2675_p11 = por %p2674_p8, %p2673_p4 }
  0x72   : > { %p2676_p13 = pnand %p2675_p11, %p2669_p0 }
  0x74   : > { %2679 = shalt.err (!%p2676_p13)
}
  0x75   : > { %2516 = dma.hbm_to_vmem [thread:$0]  (!%p3109_p12), %s3101_s19, 128, %s3103_s26, %s614_s30  }
  0x76   : > { %633 = sbr.rel (%p3057_p5) target bundleno = 2193 (0x891), region = 100  ;;  %s635_s10 = sand.u32 (!%p3057_p5), 1, %s2782_s2  }
  0x77   : > { %s2121_s13 = sshll.u32 (!%p3057_p5), %s635_s10, 6  ;;  %s636_s20 = scalar_lea.sflag (!%p3057_p5), [#allocation4], %s635_s10 }
  0x78   : > { %s3141_s0 = scalar_lea.vmem (!%p3057_p5), [#allocation3], %s2121_s13  ;;  %p3523_p1 = scmp.ne.s32.totalorder (!%p3057_p5), %s3514_s29, 0 }
  0x7d   : > { %2753 = dma.done.wait (%p3523_p1), %s636_s20, 1024  }
  0x7e   : > { %2755 = vsyncadd (%p3523_p1), %s636_s20, 4294966272  ;;  %s3148_s9 = sand.u32 1, %s2770_s22   ;;  %p3524_p5 = scmp.ne.s32.totalorder %s3517_s18, 0 }
  0x7f   : > { %s3482_s30 = sshll.u32 %s3148_s9, 3  ;;  %s645_s17 = scalar_lea.sflag [#allocation7], %s3148_s9 }
  0x80   : > { %s3154_s19 = scalar_lea.vmem [#allocation6], %s3482_s30 }
  0x81   : > { %2757 = dma.done.wait (%p3524_p5), %s645_s17, 128  }
  0x82   : > { %2759 = vsyncadd (%p3524_p5), %s645_s17, 4294967168  ;;  %s3525_s24 = sld [smem:[#allocation18_spill]]  ;;  %v719_v9 = vld [vmem:[%s3141_s0] sm:$0xff]  ;;  %v720_v25 = vld [vmem:[%s3141_s0 + $0x8] sm:$0xff]  ;;  %s3529_s5 = sld [smem:[#allocation20_spill]]  ;;  %v863_v43 = vlaneseq  ;;  %vm975_vm0 = vcmask 261120  }
  0x83   : > { %2295 = vmatprep.mubr.f32.mxu0 %v719_v9  ;;  %v721_v26 = vld [vmem:[%s3141_s0 + $0x10] sm:$0xff]  ;;  %v722_v27 = vld [vmem:[%s3141_s0 + $0x18] sm:$0xff]  ;;  %v723_v28 = vld [vmem:[%s3141_s0 + $0x20] sm:$0xff]  ;;  %v2813_v41 = vmov 1966171168   ;;  %p715_p4 = scmp.lt.s32.totalorder %s2790_s3, 1 }
  0x84   : > { %v724_v29 = vld [vmem:[%s3141_s0 + $0x28] sm:$0xff]  ;;  %v725_v30 = vld [vmem:[%s3141_s0 + $0x30] sm:$0xff]  ;;  %v726_v31 = vld [vmem:[%s3141_s0 + $0x38] sm:$0xff]  ;;  %v861_v42 = vunpack.c.l.s4 %v2813_v41  ;;  %v864_v45 = vshrl.u32 %v863_v43, 7  ;;  %s3530_s13 = sld [smem:[#allocation16_spill]]  ;;  %s3531_s6 = sld [smem:[#allocation21_spill]] }
  0x85   : > { %v857_v47 = vld [vmem:[%s3154_s19] sm:$0xff]  ;;  %s3532_s8 = sld [smem:[#allocation23_spill]]  ;;  %s3533_s26 = sld [smem:[#allocation22_spill]] }
  0x86   : > { %v862_v44 = vunpack.c.0.s8 %v861_v42  ;;  %v859_v49 = vcombine.high %v857_v47, %v857_v47  ;;  %v910_v53 = vsub.s32 0, %v864_v45  ;;  %s3537_s10 = sld [smem:[#allocation26_spill]]  ;;  %p2161_p0 = scmp.ne.s32.totalorder %s2790_s3, 0 }
  0x88   : > { %s3526_s21 = smov %s3525_s24  ;;  %v727_v0 = vld [vmem:[%s3525_s24] sm:$0xff]  ;;  %s3527_s24 = sld [smem:[#allocation19_spill]]  ;;  %v1114_v39 = vld [vmem:[%s3529_s5 + $0x8] sm:$0xff]  ;;  %v865_v46 = vsub.s32 %v862_v44, %v864_v45  ;;  %v1116_v9 = vld [vmem:[%s3529_s5 + $0x18] sm:$0xff] }
  0x89   : > { %v728_v1 = vld [vmem:[%s3526_s21 + $0x8] sm:$0xff]  ;;  %v729_v2 = vld [vmem:[%s3526_s21 + $0x10] sm:$0xff]  ;;  %v730_v4 = vld [vmem:[%s3526_s21 + $0x18] sm:$0xff] }
  0x8a   : > { %v2421_v3 = vpack.c.bf16 %v728_v1, %v727_v0  ;;  %v2425_v5 = vpack.c.bf16 %v730_v4, %v729_v2  ;;  %v731_v6 = vld [vmem:[%s3526_s21 + $0x20] sm:$0xff]  ;;  %v732_v7 = vld [vmem:[%s3526_s21 + $0x28] sm:$0xff]  ;;  %v733_v10 = vld [vmem:[%s3526_s21 + $0x30] sm:$0xff]  ;;  %v866_v48 = vrot.slane %v857_v47, %v865_v46  ;;  %v873_v51 = vrot.slane %v859_v49, %v865_v46 }
  0x8b   : > { %v2429_v8 = vpack.c.bf16 %v732_v7, %v731_v6  ;;  %v734_v11 = vld [vmem:[%s3526_s21 + $0x38] sm:$0xff]  ;;  %v735_v13 = vld [vmem:[%s3526_s21 + $0x40] sm:$0xff]  ;;  %v736_v14 = vld [vmem:[%s3526_s21 + $0x48] sm:$0xff]  ;;  %s3534_s29 = smov %s3533_s26 }
  0x8c   : > { %2422 = vmatprep.subr.bf16.mxu0 %v2421_v3  ;;  %v2433_v12 = vpack.c.bf16 %v734_v11, %v733_v10  ;;  %v2437_v15 = vpack.c.bf16 %v736_v14, %v735_v13  ;;  %v737_v16 = vld [vmem:[%s3526_s21 + $0x50] sm:$0xff]  ;;  %v738_v17 = vld [vmem:[%s3526_s21 + $0x58] sm:$0xff]  ;;  %v739_v19 = vld [vmem:[%s3526_s21 + $0x60] sm:$0xff]  ;;  %v874_v50 = vcombine.high %v866_v48, %v866_v48  ;;  %v882_v54 = vrot.slane %v866_v48, %v865_v46 }
  0x8d   : > { %2424 = vmatpush3.bf16.msra.mxu0 %v2421_v3  ;;  %v2441_v18 = vpack.c.bf16 %v738_v17, %v737_v16  ;;  %v740_v20 = vld [vmem:[%s3526_s21 + $0x68] sm:$0xff]  ;;  %v741_v22 = vld [vmem:[%s3526_s21 + $0x70] sm:$0xff]  ;;  %v742_v23 = vld [vmem:[%s3526_s21 + $0x78] sm:$0xff]  ;;  %v875_v56 = vcombine.high %v873_v51, %v873_v51  ;;  %v889_v7 = vrot.slane %v873_v51, %v865_v46 }
  0x8e   : > { %2426 = vmatprep.subr.bf16.mxu0 %v2425_v5  ;;  %v2445_v21 = vpack.c.bf16 %v740_v20, %v739_v19  ;;  %v2449_v24 = vpack.c.bf16 %v742_v23, %v741_v22  ;;  %s3528_s11 = smov %s3527_s24  ;;  %v964_v32 = vld [vmem:[%s3527_s24] sm:$0xff]  ;;  %v896_v52 = vrot.slane %v874_v50, %v865_v46  ;;  %v904_v60 = vcombine.high %v882_v54, %v882_v54  ;;  %v1262_v43 = vld [vmem:[%s3531_s6 + $0x8] sm:$0xff]  ;;  %v1263_v50 = vld [vmem:[%s3531_s6 + $0x10] sm:$0xff] }
  0x8f   : > { %v965_v33 = vld [vmem:[%s3528_s11 + $0x8] sm:$0xff]  ;;  %v966_v35 = vld [vmem:[%s3528_s11 + $0x10] sm:$0xff]  ;;  %v967_v36 = vld [vmem:[%s3528_s11 + $0x18] sm:$0xff]  ;;  %s716_s24 = scalar_select %p715_p4, %s2790_s3, 1  ;;  %v911_v61 = vrot.slane %v882_v54, %v910_v53  ;;  %v903_v1 = vrot.slane %v875_v56, %v865_v46  ;;  %v905_v22 = vcombine.high %v889_v7, %v889_v7 }
  0x90   : > { %v2453_v34 = vpack.c.bf16 %v965_v33, %v964_v32  ;;  %v2457_v37 = vpack.c.bf16 %v967_v36, %v966_v35  ;;  %v1113_v38 = vld [vmem:[%s3529_s5] sm:$0xff]  ;;  %v915_v57 = vrot.slane %v896_v52, %v910_v53  ;;  %v906_v58 = vcombine.high %v896_v52, %v896_v52  ;;  %v1264_v51 = vld [vmem:[%s3531_s6 + $0x18] sm:$0xff] }
  0x91   : > { %2428 = vmatpush3.bf16.msra.mxu0 %v2425_v5  ;;  %v2461_v40 = vpack.c.bf16 %v1114_v39, %v1113_v38  ;;  %s2124_s14 = sshll.u32 %s716_s24, 3  ;;  %v919_v5 = vrot.slane %v904_v60, %v910_v53  ;;  %v931_v13 = vrot.slane %v903_v1, %v910_v53  ;;  %v907_v17 = vcombine.high %v903_v1, %v903_v1  ;;  %v1261_v42 = vld [vmem:[%s3531_s6] sm:$0xff]  ;;  %s3536_s24 = sld [smem:[#allocation25_spill]] }
  0x92   : > { %2430 = vmatprep.subr.bf16.mxu0 %v2429_v8  ;;  %2454 = vmatprep.subr.bf16.mxu1 %v2453_v34  ;;  %s718_s20 = scalar_lea.vmem %s3530_s13, %s2124_s14  ;;  %v923_v3 = vrot.slane %v906_v58, %v910_v53  ;;  %v935_v32 = vrot.slane %v905_v22, %v910_v53  ;;  %v2469_v44 = vpack.c.bf16 %v1262_v43, %v1261_v42  ;;  %v2125_v45 = vld [vmem:[%s3532_s8] ss:$0 sm:$0xff]  ;;  %s3535_s13 = sld [smem:[#allocation24_spill]] }
  0x93   : > { %2456 = vmatpush3.bf16.msra.mxu1 %v2453_v34  ;;  %v848_v55 = vld [vmem:[%s718_s20] sm:$0xff] }
  0x94   : > { %2458 = vmatprep.subr.bf16.mxu1 %v2457_v37 }
  0x95   : > { %2432 = vmatpush3.bf16.msra.mxu0 %v2429_v8  ;;  %v1115_v8 = vld [vmem:[%s3529_s5 + $0x10] sm:$0xff] }
  0x96   : > { %2434 = vmatprep.subr.bf16.mxu0 %v2433_v12 }
  0x97   : > { %2460 = vmatpush3.bf16.msra.mxu1 %v2457_v37 }
  0x98   : > { %2462 = vmatprep.subr.bf16.mxu1 %v2461_v40 }
  0x99   : > { %2436 = vmatpush3.bf16.msra.mxu0 %v2433_v12 }
  0x9a   : > { %2438 = vmatprep.subr.bf16.mxu0 %v2437_v15 }
  0x9d   : > { %2440 = vmatpush3.bf16.msra.mxu0 %v2437_v15 }
  0x9e   : > { %2442 = vmatprep.subr.bf16.mxu0 %v2441_v18 }
  0xa1   : > { %2444 = vmatpush3.bf16.msra.mxu0 %v2441_v18  ;;  %v2465_v18 = vpack.c.bf16 %v1116_v9, %v1115_v8  ;;  %v1409_v9 = vld [vmem:[%s3533_s26] sm:$0xff] }
  0xa2   : > { %2446 = vmatprep.subr.bf16.mxu0 %v2445_v21 }
  0xa5   : > { %2448 = vmatpush3.bf16.msra.mxu0 %v2445_v21  ;;  %v927_v21 = vrot.slane %v889_v7, %v910_v53 }
  0xa6   : > { %2450 = vmatprep.subr.bf16.mxu0 %v2449_v24 }
  0xa9   : > { %2452 = vmatpush3.bf16.msra.mxu0 %v2449_v24 }
  0xac   : > { %2296 = vmatmul.mubr.f32.vlgmr.msra.gmra.mrb[0].mxu0 %v720_v25 }
  0xad   : > { %2298 = vmatprep.mubr.f32.mxu0 %v721_v26 }
  0xb0   : > { %2299 = vmatmul.mubr.f32.gmra.mrb[2].mxu0 %v722_v27 }
  0xb1   : > { %2301 = vmatprep.mubr.f32.mxu0 %v723_v28 }
  0xb4   : > { %2302 = vmatmul.mubr.f32.gmra.mrb[4].mxu0 %v724_v29  ;;  %v939_v29 = vrot.slane %v907_v17, %v910_v53 }
  0xb5   : > { %2304 = vmatprep.mubr.f32.mxu0 %v725_v30 }
  0xb8   : > { %2305 = vmatmul.mubr.f32.gmra.mrb[6].mxu0 %v726_v31 }
 0x17f   : > { %v2297_v59 = vpop.f32.mrb[0].mxu0 }
 0x180   : > { %v850_v62 = vadd.f32 %v2297_v59, %v848_v55  ;;  %v809_v63 = vpop.f32.mrb[1].mxu0 }
 0x181   : > { %v849_v0 = vadd.f32 %v848_v55, %v809_v63 }
 0x182   : > { %v949_v2 = vadd.f32 %v915_v57, %v850_v62  ;;  %v2473_v57 = vpack.c.bf16 %v1264_v51, %v1263_v50 }
 0x183   : > { %v2300_v4 = vpop.f32.mrb[2].mxu0  ;;  %v948_v6 = vadd.f32 %v911_v61, %v849_v0 }
 0x184   : > { %v852_v10 = vadd.f32 %v2300_v4, %v848_v55  ;;  %v819_v11 = vpop.f32.mrb[3].mxu0  ;;  %v957_v15 = vmax.f32 %v949_v2, 0.0 }
 0x185   : > { %v851_v12 = vadd.f32 %v848_v55, %v819_v11  ;;  %v956_v14 = vmax.f32 %v948_v6, 0.0 }
 0x186   : > { %v951_v16 = vadd.f32 %v923_v3, %v852_v10  ;;  %v1410_v10 = vld [vmem:[%s3534_s29 + $0x8] sm:$0xff] }
 0x187   : > { %v950_v19 = vadd.f32 %v919_v5, %v851_v12  ;;  %v2303_v20 = vpop.f32.mrb[4].mxu0  ;;  %2315 = vmatprep.mubr.msk.f32.mxu1 %vm975_vm0, %v956_v14  ;;  %v2477_v11 = vpack.c.bf16 %v1410_v10, %v1409_v9  ;;  %v2134_v12 = vld [vmem:[%s3535_s13] ss:$0 sm:$0xff]  ;;  %s3538_s13 = sshll.u32 %s3148_s9, 3 }
 0x188   : > { %v854_v23 = vadd.f32 %v2303_v20, %v848_v55  ;;  %v829_v24 = vpop.f32.mrb[5].mxu0  ;;  %2316 = vmatmul.mubr.msk.f32.vlgmr.msra.gmra.mrb[0].mxu1 %vm975_vm0, %v957_v15  ;;  %v959_v27 = vmax.f32 %v951_v16, 0.0  ;;  %s3324_s20 = scalar_lea.vmem [#allocation8], %s3538_s13 }
 0x189   : > { %v958_v25 = vmax.f32 %v950_v19, 0.0  ;;  %v853_v26 = vadd.f32 %v848_v55, %v829_v24  ;;  %2464 = vmatpush3.bf16.msra.mxu1 %v2461_v40  ;;  %2478 = vmatprep.subr.bf16.mxu0 %v2477_v11 }
 0x18a   : > { %v953_v28 = vadd.f32 %v931_v13, %v854_v23  ;;  %2466 = vmatprep.subr.bf16.mxu1 %v2465_v18  ;;  %2480 = vmatpush3.bf16.msra.mxu0 %v2477_v11 }
 0x18b   : > { %v952_v30 = vadd.f32 %v927_v21, %v853_v26  ;;  %v2306_v31 = vpop.f32.mrb[6].mxu0  ;;  %2318 = vmatprep.mubr.msk.f32.mxu1 %vm975_vm0, %v958_v25 }
 0x18c   : > { %v856_v33 = vadd.f32 %v2306_v31, %v848_v55  ;;  %v839_v34 = vpop.f32.mrb[7].mxu0  ;;  %2319 = vmatmul.mubr.msk.f32.gmra.mrb[2].mxu1 %vm975_vm0, %v959_v27  ;;  %v961_v37 = vmax.f32 %v953_v28, 0.0 }
 0x18d   : > { %v960_v35 = vmax.f32 %v952_v30, 0.0  ;;  %v855_v36 = vadd.f32 %v848_v55, %v839_v34  ;;  %2468 = vmatpush3.bf16.msra.mxu1 %v2465_v18 }
 0x18e   : > { %v955_v38 = vadd.f32 %v939_v29, %v856_v33  ;;  %2470 = vmatprep.subr.bf16.mxu1 %v2469_v44 }
 0x18f   : > { %v954_v39 = vadd.f32 %v935_v32, %v855_v36  ;;  %2321 = vmatprep.mubr.msk.f32.mxu1 %vm975_vm0, %v960_v35 }
 0x190   : > { %2322 = vmatmul.mubr.msk.f32.gmra.mrb[4].mxu1 %vm975_vm0, %v961_v37  ;;  %v963_v41 = vmax.f32 %v955_v38, 0.0  ;;  %v1411_v37 = vld [vmem:[%s3534_s29 + $0x10] sm:$0xff]  ;;  %v1412_v38 = vld [vmem:[%s3534_s29 + $0x18] sm:$0xff] }
 0x191   : > { %v962_v40 = vmax.f32 %v954_v39, 0.0  ;;  %v2481_v39 = vpack.c.bf16 %v1412_v38, %v1411_v37 }
 0x193   : > { %2324 = vmatprep.mubr.msk.f32.mxu1 %vm975_vm0, %v962_v40  ;;  %2482 = vmatprep.subr.bf16.mxu0 %v2481_v39  ;;  %v2143_v40 = vld [vmem:[%s3536_s24] ss:$0 sm:$0xff] }
 0x194   : > { %2325 = vmatmul.mubr.msk.f32.gmra.mrb[6].mxu1 %vm975_vm0, %v963_v41  ;;  %2484 = vmatpush3.bf16.msra.mxu0 %v2481_v39 }
 0x25b   : > { %v2317_v46 = vpop.f32.mrb[0].mxu1 }
 0x25c   : > { %v1072_v47 = vadd.f32 %v2317_v46, %v2125_v45  ;;  %v1066_v48 = vpop.f32.mrb[1].mxu1 }
 0x25d   : > { %v1067_v49 = vadd.f32 %v2125_v45, %v1066_v48 }
 0x25e   : > { %v1106_v54 = vmax.f32 %v1072_v47, 0.0 }
 0x25f   : > { %v1105_v52 = vmax.f32 %v1067_v49, 0.0  ;;  %v2320_v53 = vpop.f32.mrb[2].mxu1 }
 0x260   : > { %v1082_v55 = vadd.f32 %v2320_v53, %v2125_v45  ;;  %v1076_v56 = vpop.f32.mrb[3].mxu1 }
 0x261   : > { %v1077_v58 = vadd.f32 %v2125_v45, %v1076_v56  ;;  %2335 = vmatprep.mubr.msk.f32.mxu1 %vm975_vm0, %v1105_v52 }
 0x262   : > { %2336 = vmatmul.mubr.msk.f32.vlgmr.msra.gmra.mrb[8].mxu1 %vm975_vm0, %v1106_v54  ;;  %v1108_v61 = vmax.f32 %v1082_v55, 0.0 }
 0x263   : > { %v1107_v59 = vmax.f32 %v1077_v58, 0.0  ;;  %v2323_v60 = vpop.f32.mrb[4].mxu1  ;;  %2472 = vmatpush3.bf16.msra.mxu1 %v2469_v44 }
 0x264   : > { %v1092_v62 = vadd.f32 %v2323_v60, %v2125_v45  ;;  %v1086_v63 = vpop.f32.mrb[5].mxu1  ;;  %2474 = vmatprep.subr.bf16.mxu1 %v2473_v57 }
 0x265   : > { %v1087_v0 = vadd.f32 %v2125_v45, %v1086_v63  ;;  %2338 = vmatprep.mubr.msk.f32.mxu1 %vm975_vm0, %v1107_v59 }
 0x266   : > { %2339 = vmatmul.mubr.msk.f32.gmra.mrb[10].mxu1 %vm975_vm0, %v1108_v61  ;;  %v1110_v3 = vmax.f32 %v1092_v62, 0.0 }
 0x267   : > { %v1109_v1 = vmax.f32 %v1087_v0, 0.0  ;;  %v2326_v2 = vpop.f32.mrb[6].mxu1  ;;  %2476 = vmatpush3.bf16.msra.mxu1 %v2473_v57 }
 0x268   : > { %v1102_v4 = vadd.f32 %v2326_v2, %v2125_v45  ;;  %v1096_v5 = vpop.f32.mrb[7].mxu1  ;;  %2500 = vmatprep.subr.bf16.mxu1 %v2477_v11 }
 0x269   : > { %v1097_v6 = vadd.f32 %v2125_v45, %v1096_v5  ;;  %2341 = vmatprep.mubr.msk.f32.mxu1 %vm975_vm0, %v1109_v1  ;;  %v2152_v1 = vld [vmem:[%s3537_s10] ss:$0 sm:$0xff] }
 0x26a   : > { %2342 = vmatmul.mubr.msk.f32.gmra.mrb[12].mxu1 %vm975_vm0, %v1110_v3  ;;  %v1112_v8 = vmax.f32 %v1102_v4, 0.0 }
 0x26b   : > { %v1111_v7 = vmax.f32 %v1097_v6, 0.0 }
 0x26d   : > { %2344 = vmatprep.mubr.msk.f32.mxu1 %vm975_vm0, %v1111_v7 }
 0x26e   : > { %2345 = vmatmul.mubr.msk.f32.gmra.mrb[14].mxu1 %vm975_vm0, %v1112_v8 }
 0x335   : > { %v2337_v13 = vpop.f32.mrb[8].mxu1 }
 0x336   : > { %v1220_v14 = vadd.f32 %v2337_v13, %v2134_v12  ;;  %v1214_v15 = vpop.f32.mrb[9].mxu1 }
 0x337   : > { %v1215_v16 = vadd.f32 %v2134_v12, %v1214_v15 }
 0x338   : > { %v1254_v19 = vmax.f32 %v1220_v14, 0.0 }
 0x339   : > { %v1253_v17 = vmax.f32 %v1215_v16, 0.0  ;;  %v2340_v18 = vpop.f32.mrb[10].mxu1 }
 0x33a   : > { %v1230_v20 = vadd.f32 %v2340_v18, %v2134_v12  ;;  %v1224_v21 = vpop.f32.mrb[11].mxu1 }
 0x33b   : > { %v1225_v22 = vadd.f32 %v2134_v12, %v1224_v21  ;;  %2355 = vmatprep.mubr.msk.f32.mxu1 %vm975_vm0, %v1253_v17 }
 0x33c   : > { %2356 = vmatmul.mubr.msk.f32.vlgmr.msra.gmra.mrb[16].mxu1 %vm975_vm0, %v1254_v19  ;;  %v1256_v25 = vmax.f32 %v1230_v20, 0.0 }
 0x33d   : > { %v1255_v23 = vmax.f32 %v1225_v22, 0.0  ;;  %v2343_v24 = vpop.f32.mrb[12].mxu1  ;;  %2502 = vmatpush3.bf16.msra.mxu1 %v2477_v11 }
 0x33e   : > { %v1240_v26 = vadd.f32 %v2343_v24, %v2134_v12  ;;  %v1234_v27 = vpop.f32.mrb[13].mxu1  ;;  %2501 = vmatprep.subr.bf16.mxu1 %v2481_v39 }
 0x33f   : > { %v1235_v28 = vadd.f32 %v2134_v12, %v1234_v27  ;;  %2358 = vmatprep.mubr.msk.f32.mxu1 %vm975_vm0, %v1255_v23 }
 0x340   : > { %2359 = vmatmul.mubr.msk.f32.gmra.mrb[18].mxu1 %vm975_vm0, %v1256_v25  ;;  %v1258_v31 = vmax.f32 %v1240_v26, 0.0 }
 0x341   : > { %v1257_v29 = vmax.f32 %v1235_v28, 0.0  ;;  %v2346_v30 = vpop.f32.mrb[14].mxu1  ;;  %2503 = vmatpush3.bf16.msra.mxu1 %v2481_v39 }
 0x342   : > { %v1250_v32 = vadd.f32 %v2346_v30, %v2134_v12  ;;  %v1244_v33 = vpop.f32.mrb[15].mxu1 }
 0x343   : > { %v1245_v34 = vadd.f32 %v2134_v12, %v1244_v33  ;;  %2361 = vmatprep.mubr.msk.f32.mxu1 %vm975_vm0, %v1257_v29 }
 0x344   : > { %2362 = vmatmul.mubr.msk.f32.gmra.mrb[20].mxu1 %vm975_vm0, %v1258_v31  ;;  %v1260_v36 = vmax.f32 %v1250_v32, 0.0 }
 0x345   : > { %v1259_v35 = vmax.f32 %v1245_v34, 0.0 }
 0x347   : > { %2364 = vmatprep.mubr.msk.f32.mxu1 %vm975_vm0, %v1259_v35 }
 0x348   : > { %2365 = vmatmul.mubr.msk.f32.gmra.mrb[22].mxu1 %vm975_vm0, %v1260_v36 }
 0x40f   : > { %v2357_v41 = vpop.f32.mrb[16].mxu1 }
 0x410   : > { %v1368_v42 = vadd.f32 %v2357_v41, %v2143_v40  ;;  %v1362_v43 = vpop.f32.mrb[17].mxu1 }
 0x411   : > { %v1363_v44 = vadd.f32 %v2143_v40, %v1362_v43 }
 0x412   : > { %v1402_v47 = vmax.f32 %v1368_v42, 0.0 }
 0x413   : > { %v1401_v45 = vmax.f32 %v1363_v44, 0.0  ;;  %v2360_v46 = vpop.f32.mrb[18].mxu1 }
 0x414   : > { %v1378_v48 = vadd.f32 %v2360_v46, %v2143_v40  ;;  %v1372_v49 = vpop.f32.mrb[19].mxu1 }
 0x415   : > { %v1373_v50 = vadd.f32 %v2143_v40, %v1372_v49  ;;  %2375 = vmatprep.mubr.msk.f32.mxu0 %vm975_vm0, %v1401_v45 }
 0x416   : > { %2376 = vmatmul.mubr.msk.f32.vlgmr.msra.gmra.mrb[8].mxu0 %vm975_vm0, %v1402_v47  ;;  %v1404_v53 = vmax.f32 %v1378_v48, 0.0 }
 0x417   : > { %v1403_v51 = vmax.f32 %v1373_v50, 0.0  ;;  %v2363_v52 = vpop.f32.mrb[20].mxu1 }
 0x418   : > { %v1388_v54 = vadd.f32 %v2363_v52, %v2143_v40  ;;  %v1382_v55 = vpop.f32.mrb[21].mxu1 }
 0x419   : > { %v1383_v56 = vadd.f32 %v2143_v40, %v1382_v55  ;;  %2378 = vmatprep.mubr.msk.f32.mxu0 %vm975_vm0, %v1403_v51 }
 0x41a   : > { %2379 = vmatmul.mubr.msk.f32.gmra.mrb[10].mxu0 %vm975_vm0, %v1404_v53  ;;  %v1406_v59 = vmax.f32 %v1388_v54, 0.0 }
 0x41b   : > { %v1405_v57 = vmax.f32 %v1383_v56, 0.0  ;;  %v2366_v58 = vpop.f32.mrb[22].mxu1 }
 0x41c   : > { %v1398_v60 = vadd.f32 %v2366_v58, %v2143_v40  ;;  %v1392_v61 = vpop.f32.mrb[23].mxu1 }
 0x41d   : > { %v1393_v62 = vadd.f32 %v2143_v40, %v1392_v61  ;;  %2381 = vmatprep.mubr.msk.f32.mxu0 %vm975_vm0, %v1405_v57 }
 0x41e   : > { %2382 = vmatmul.mubr.msk.f32.gmra.mrb[12].mxu0 %vm975_vm0, %v1406_v59  ;;  %v1408_v0 = vmax.f32 %v1398_v60, 0.0 }
 0x41f   : > { %v1407_v63 = vmax.f32 %v1393_v62, 0.0 }
 0x421   : > { %2384 = vmatprep.mubr.msk.f32.mxu1 %vm975_vm0, %v1407_v63 }
 0x422   : > { %2385 = vmatmul.mubr.msk.f32.vlgmr.msra.gmra.mrb[24].mxu1 %vm975_vm0, %v1408_v0 }
 0x4e9   : > { %v2377_v2 = vpop.f32.mrb[8].mxu0 }
 0x4ea   : > { %v1516_v3 = vadd.f32 %v2377_v2, %v2152_v1  ;;  %v1510_v4 = vpop.f32.mrb[9].mxu0 }
 0x4eb   : > { %v1511_v5 = vadd.f32 %v2152_v1, %v1510_v4 }
 0x4ec   : > { %v1556_v6 = vsel %vm975_vm0, %v1516_v3, -inf }
 0x4ed   : > { %v1557_v7 = vrot.slane %v1556_v6, 4  ;;  %v1549_v8 = vsel %vm975_vm0, %v1511_v5, -inf  ;;  %v2380_v9 = vpop.f32.mrb[10].mxu0 }
 0x4ee   : > { %v1550_v10 = vrot.slane %v1549_v8, 4  ;;  %v1526_v11 = vadd.f32 %v2380_v9, %v2152_v1  ;;  %v1520_v12 = vpop.f32.mrb[11].mxu0 }
 0x4ef   : > { %v1558_v13 = vmax.f32 %v1556_v6, %v1557_v7  ;;  %v1521_v14 = vadd.f32 %v2152_v1, %v1520_v12 }
 0x4f0   : > { %v1551_v15 = vmax.f32 %v1549_v8, %v1550_v10  ;;  %v1570_v16 = vsel %vm975_vm0, %v1526_v11, -inf  ;;  %v2814_v10 = vmov (!%p2161_p0), -inf  }
 0x4f1   : > { %v1559_v17 = vrot.slane %v1558_v13, 2  ;;  %v1571_v18 = vrot.slane %v1570_v16, 4  ;;  %v1563_v19 = vsel %vm975_vm0, %v1521_v14, -inf  ;;  %v2383_v20 = vpop.f32.mrb[12].mxu0  ;;  %1609 = vst.msk [vmem:[#allocation2] sm:$0xff] (!%p2161_p0), %vm975_vm0, %v2814_v10 }
 0x4f2   : > { %v1552_v21 = vrot.slane %v1551_v15, 2  ;;  %v1564_v22 = vrot.slane %v1563_v19, 4  ;;  %v1536_v23 = vadd.f32 %v2383_v20, %v2152_v1  ;;  %v1530_v24 = vpop.f32.mrb[13].mxu0 }
 0x4f3   : > { %v1560_v25 = vmax.f32 %v1558_v13, %v1559_v17  ;;  %v1572_v26 = vmax.f32 %v1570_v16, %v1571_v18  ;;  %v1531_v27 = vadd.f32 %v2152_v1, %v1530_v24 }
 0x4f4   : > { %v1553_v28 = vmax.f32 %v1551_v15, %v1552_v21  ;;  %v1565_v29 = vmax.f32 %v1563_v19, %v1564_v22  ;;  %v1584_v30 = vsel %vm975_vm0, %v1536_v23, -inf }
 0x4f5   : > { %v1561_v31 = vrot.slane %v1560_v25, 1  ;;  %v1573_v32 = vrot.slane %v1572_v26, 2  ;;  %v1585_v33 = vrot.slane %v1584_v30, 4  ;;  %v1577_v34 = vsel %vm975_vm0, %v1531_v27, -inf  ;;  %v2386_v35 = vpop.f32.mrb[24].mxu1 }
 0x4f6   : > { %v1554_v36 = vrot.slane %v1553_v28, 1  ;;  %v1566_v37 = vrot.slane %v1565_v29, 2  ;;  %v1578_v38 = vrot.slane %v1577_v34, 4  ;;  %v1546_v39 = vadd.f32 %v2386_v35, %v2152_v1  ;;  %v1540_v40 = vpop.f32.mrb[25].mxu1 }
 0x4f7   : > { %v1562_v41 = vmax.f32 %v1560_v25, %v1561_v31  ;;  %v1574_v42 = vmax.f32 %v1572_v26, %v1573_v32  ;;  %v1586_v43 = vmax.f32 %v1584_v30, %v1585_v33  ;;  %v1541_v44 = vadd.f32 %v2152_v1, %v1540_v40 }
 0x4f8   : > { %v1555_v45 = vmax.f32 %v1553_v28, %v1554_v36  ;;  %v1567_v46 = vmax.f32 %v1565_v29, %v1566_v37  ;;  %v1579_v47 = vmax.f32 %v1577_v34, %v1578_v38  ;;  %v1598_v48 = vsel %vm975_vm0, %v1546_v39, -inf }
 0x4f9   : > { %v1575_v49 = vrot.slane %v1574_v42, 1  ;;  %v1587_v50 = vrot.slane %v1586_v43, 2  ;;  %v1599_v51 = vrot.slane %v1598_v48, 4  ;;  %v1591_v52 = vsel %vm975_vm0, %v1541_v44, -inf }
 0x4fa   : > { %v1568_v53 = vrot.slane %v1567_v46, 1  ;;  %v1580_v54 = vrot.slane %v1579_v47, 2  ;;  %v1592_v55 = vrot.slane %v1591_v52, 4 }
 0x4fb   : > { %v1576_v56 = vmax.f32 %v1574_v42, %v1575_v49  ;;  %v1588_v57 = vmax.f32 %v1586_v43, %v1587_v50  ;;  %v1600_v58 = vmax.f32 %v1598_v48, %v1599_v51 }
 0x4fc   : > { %v1569_v59 = vmax.f32 %v1567_v46, %v1568_v53  ;;  %v1581_v60 = vmax.f32 %v1579_v47, %v1580_v54  ;;  %v1593_v61 = vmax.f32 %v1591_v52, %v1592_v55 }
 0x4fd   : > { %v1589_v62 = vrot.slane %v1588_v57, 1  ;;  %v1601_v63 = vrot.slane %v1600_v58, 2 }
 0x4fe   : > { %v1582_v0 = vrot.slane %v1581_v60, 1  ;;  %v1594_v1 = vrot.slane %v1593_v61, 2  ;;  %1608 = sbr.rel (%p2161_p0) target bundleno = 1285 (0x505), region = 112 }
 0x4ff   : > { %v1590_v2 = vmax.f32 %v1588_v57, %v1589_v62  ;;  %v1602_v3 = vmax.f32 %v1600_v58, %v1601_v63 }
 0x500   : > { %v1583_v4 = vmax.f32 %v1581_v60, %v1582_v0  ;;  %v1595_v5 = vmax.f32 %v1593_v61, %v1594_v1 }
 0x501   : > { %v1603_v6 = vrot.slane %v1602_v3, 1 }
 0x502   : > { %v1596_v7 = vrot.slane %v1595_v5, 1 }
 0x503   : > { %v1604_v8 = vmax.f32 %v1602_v3, %v1603_v6 }
 0x504   : > { %v1597_v9 = vmax.f32 %v1595_v5, %v1596_v7 }
 0x505 PF: > { %vm1619_vm1 = vcmask 1041409   ;;  %vm1621_vm2 = vcmask 1042434   ;;  %vm1623_vm3 = vcmask 1043459   ;;  %vm1625_vm4 = vcmask 1044484   ;;  %v1610_v15 = vld [vmem:[#allocation2] sm:$0xff]  ;;  %p2162_p2 = scmp.ne.s32.totalorder %s2790_s3, 1 }
 0x506   : > { %v1620_v11 = vsel %vm1619_vm1, %v1562_v41, %v1555_v45  ;;  %vm1627_vm5 = vcmask 1045509   ;;  %vm1629_vm6 = vcmask 1046534   ;;  %vm1631_vm7 = vcmask 1047559   ;;  %s3539_s0 = sld [smem:[#allocation27_spill]] (!%p2162_p2)  ;;  %s3540_s19 = sld [smem:[#allocation28_spill]] (!%p2162_p2) }
 0x507   : > { %v1622_v12 = vsel %vm1621_vm2, %v1569_v59, %v1620_v11  ;;  %v2815_v23 = vmov (!%p2162_p2), 0.0|0.0   ;;  %vm2816_vm8 = vmmov (!%p2162_p2), 0   ;;  %v2817_v26 = vmov (!%p2162_p2), 0.0   ;;  %s3541_s13 = sld [smem:[#allocation31_spill]] (!%p2162_p2)  ;;  %s3542_s26 = sld [smem:[#allocation29_spill]] (!%p2162_p2) }
 0x508   : > { %v1624_v13 = vsel %vm1623_vm3, %v1576_v56, %v1622_v12  ;;  %2485 = vmatprep.subr.bf16.mxu0 (!%p2162_p2), %v2815_v23  ;;  %2395 = vmatprep.mubr.msk.f32.mxu0 (!%p2162_p2), %vm2816_vm8, %v2817_v26  ;;  %s3544_s3 = sld [smem:[#allocation32_spill]] (!%p2162_p2)  ;;  %vm1820_vm9 = vcmask (!%p2162_p2), 130048   ;;  %s3545_s17 = sld [smem:[#allocation30_spill]] (!%p2162_p2)  ;;  %vm1903_vm10 = vcmask (!%p2162_p2), 64512  }
 0x509   : > { %v1626_v14 = vsel %vm1625_vm4, %v1583_v4, %v1624_v13  ;;  %1639 = sbr.rel (%p2162_p2) target bundleno = 2166 (0x876), region = 116  ;;  %2491 = vmatprep.subr.bf16.mxu1 (!%p2162_p2), %v2815_v23  ;;  %2406 = vmatprep.mubr.msk.f32.mxu1 (!%p2162_p2), %vm2816_vm8, %v2817_v26  ;;  %s3546_s14 = sld [smem:[#allocation33_spill]] (!%p2162_p2) }
 0x50a   : > { %v1628_v16 = vsel %vm1627_vm5, %v1590_v2, %v1626_v14 }
 0x50b   : > { %v1630_v17 = vsel %vm1629_vm6, %v1597_v9, %v1628_v16 }
 0x50c   : > { %v1632_v18 = vsel %vm1631_vm7, %v1604_v8, %v1630_v17  ;;  %v1641_v20 = vld [vmem:[%s3539_s0] sm:$0xff] (!%p2162_p2)  ;;  %v1642_v21 = vld [vmem:[%s3539_s0 + $0x8] sm:$0xff] (!%p2162_p2)  ;;  %v1643_v22 = vld [vmem:[%s3539_s0 + $0x10] sm:$0xff] (!%p2162_p2) }
 0x50d   : > { %v1634_v19 = vmax.f32 %v1610_v15, %v1632_v18  ;;  %v2486_v24 = vpack.c.bf16 (!%p2162_p2), %v1642_v21, %v1641_v20  ;;  %v1644_v25 = vld [vmem:[%s3539_s0 + $0x18] sm:$0xff] (!%p2162_p2)  ;;  %v1726_v27 = vld [vmem:[%s3540_s19] sm:$0xff] (!%p2162_p2)  ;;  %v1727_v28 = vld [vmem:[%s3540_s19 + $0x8] sm:$0xff] (!%p2162_p2)  ;;  %s3543_s0 = smov (!%p2162_p2), %s3542_s26 }
 0x50e   : > { %v2489_v29 = vpack.c.bf16 (!%p2162_p2), %v1644_v25, %v1643_v22  ;;  %v2492_v30 = vpack.c.bf16 (!%p2162_p2), %v1727_v28, %v1726_v27  ;;  %v1728_v32 = vld [vmem:[%s3540_s19 + $0x10] sm:$0xff] (!%p2162_p2)  ;;  %v1729_v33 = vld [vmem:[%s3540_s19 + $0x18] sm:$0xff] (!%p2162_p2)  ;;  %v2163_v35 = vld [vmem:[%s3541_s13] ss:$0 sm:$0xff] (!%p2162_p2) }
 0x50f   : > { %1635 = vst.msk [vmem:[#allocation2] sm:$0xff] %vm975_vm0, %v1634_v19  ;;  %2487 = vmatpush3.bf16.msra.mxu0 (!%p2162_p2), %v2486_v24  ;;  %v2495_v34 = vpack.c.bf16 (!%p2162_p2), %v1729_v33, %v1728_v32  ;;  %v1811_v40 = vld [vmem:[%s3542_s26] sm:$0xff] (!%p2162_p2)  ;;  %v1812_v41 = vld [vmem:[%s3543_s0 + $0x8] sm:$0xff] (!%p2162_p2) }
 0x510   : > { %2488 = vmatprep.subr.bf16.mxu0 %v2815_v23  ;;  %2493 = vmatpush3.bf16.msra.mxu1 %v2492_v30  ;;  %v2498_v42 = vpack.c.bf16 %v1812_v41, %v1811_v40  ;;  %v2165_v43 = vld [vmem:[%s3544_s3] ss:$0 sm:$0xff]  ;;  %s3547_s3 = sld [smem:[#allocation34_spill]] }
 0x511   : > { %2494 = vmatprep.subr.bf16.mxu1 %v2815_v23  ;;  %v1895_v48 = vld [vmem:[%s3545_s17] sm:$0xff] }
 0x512   : > { %v2167_v49 = vld [vmem:[%s3546_s14] ss:$0 sm:$0xff] }
 0x513   : > { %2490 = vmatpush3.bf16.msra.mxu0 %v2489_v29 }
 0x514   : > { %2497 = vmatprep.subr.bf16.mxu0 %v2815_v23  ;;  %2496 = vmatpush3.bf16.msra.mxu1 %v2495_v34 }
 0x515   : > { %2416 = vmatprep.subr.mxu1 %v2817_v26 }
 0x516   : > { %v1640_v31 = vld [vmem:[#allocation2] sm:$0xff] }
 0x517   : > { %2396 = vmatmul.mubr.msk.f32.vlgmr.msra.gmra.mrb[0].mxu0 %vm975_vm0, %v1640_v31  ;;  %v2169_v54 = vld [vmem:[%s3547_s3] ss:$0 sm:$0xff] }
 0x518   : > { %2413 = vmatprep.mubr.msk.f32.mxu0 %vm2816_vm8, %v2817_v26  ;;  %2499 = vmatpush3.bf16.msra.mxu0 %v2498_v42 }
 0x5ea   : > { %v1721_v36 = vpop.f32.mrb[0].mxu0 }
 0x5eb   : > { %v1722_v37 = vadd.f32 %v2163_v35, %v1721_v36  ;;  %v2397_v38 = vpop.f32.mrb[1].mxu0 }
 0x5ed   : > { %v1725_v39 = vmax.f32 %v1722_v37, 0.0 }
 0x5ef   : > { %2407 = vmatmul.mubr.msk.f32.vlgmr.msra.gmra.mrb[0].mxu1 %vm975_vm0, %v1725_v39 }
 0x5f0   : > { %2418 = vmatprep.mubr.msk.f32.mxu1 %vm2816_vm8, %v2817_v26  ;;  %2417 = vmatpush3.msra.mxu1 %v1895_v48 }
 0x6c2   : > { %v1806_v44 = vpop.f32.mrb[0].mxu1 }
 0x6c3   : > { %v1807_v45 = vadd.f32 %v2165_v43, %v1806_v44  ;;  %v2408_v46 = vpop.f32.mrb[1].mxu1 }
 0x6c5   : > { %v1810_v47 = vmax.f32 %v1807_v45, 0.0 }
 0x6c7   : > { %2414 = vmatmul.mubr.msk.f32.vlgmr.msra.gmra.mrb[2].mxu0 %vm1820_vm9, %v1810_v47 }
 0x79a   : > { %v1890_v50 = vpop.f32.mrb[2].mxu0 }
 0x79b   : > { %v1891_v51 = vadd.f32 %v2167_v49, %v1890_v50  ;;  %v2415_v52 = vpop.f32.mrb[3].mxu0 }
 0x79d   : > { %v1894_v53 = vmax.f32 %v1891_v51, 0.0 }
 0x79f   : > { %2419 = vmatmul.mubr.msk.f32.vlgmr.msra.gmra.mrb[2].mxu1 %vm1903_vm10, %v1894_v53 }
 0x872   : > { %v1973_v55 = vpop.f32.mrb[2].mxu1 }
 0x873   : > { %v1974_v56 = vadd.f32 %v2169_v54, %v1973_v55  ;;  %v2420_v57 = vpop.f32.mrb[3].mxu1 }
 0x875   : > { %1977 = vst [vmem:[%s3324_s20] sm:$0xff] %v1974_v56 }
 0x876 PF: > { %s3548_s13 = sld [smem:[#allocation12_spill]]  ;;  %s3549_s24 = sld [smem:[#allocation35_spill]] }
 0x877   : > { %s1992_s5 = sshll.u32 %s3324_s20, 4  ;;  %s1979_s6 = scalar_lea.sflag [#allocation5], %s3148_s9  ;;  %s1993_s5 = int_to_ptr.vmem [resolvable:$true] %s1992_s5 }
 0x878   : > { %s2680_s30 = scalar_lea.vmem %s1993_s5, 128  ;;  %p3551_p6 = scmp.ne.s32.totalorder %s3518_s15, 0 }
 0x879   : > { %p2681_p12 = scmp.ne.s32.totalorder %s1993_s5, %s2680_s30  ;;  %s2818_s10 = smov [#allocation8]  }
 0x87a   : > { %s2684_s3 = sshll.u32 %s2818_s10, 4  ;;  %s2685_s3 = int_to_ptr.vmem [resolvable:$false] %s2684_s3 }
 0x87b   : > { %p2682_p9 = pnand %p2681_p12, %p3551_p6  ;;  %s2686_s8 = scalar_lea.vmem %s2685_s3, 256 }
 0x87c   : > { %s2172_s18 = sshll.u32 %s3548_s13, 7  ;;  %s3550_s14 = smov %s3549_s24 }
 0x87d   : > { %s3386_s0 = scalar_lea.hbm %s3549_s24, %s2172_s18  ;;  %p2683_p10 = pneg %p2682_p9 }
 0x87e   : > { %p2687_p3 = scmp.lt.s32.totalorder %s1993_s5, %s2685_s3  ;;  %p2688_p7 = scmp.lt.s32.totalorder %s2686_s8, %s2680_s30 }
 0x880   : > { %p2689_p8 = por %p2688_p7, %p2687_p3 }
 0x882   : > { %p2690_p11 = pnand %p2689_p8, %p2683_p10 }
 0x884   : > { %2693 = shalt.err (!%p2690_p11)
}
 0x885   : > { %s2694_s9 = scalar_lea.hbm %s3386_s0, 128  ;;  %s2698_s18 = scalar_lea.hbm %s3550_s14, 256 }
 0x886   : > { %p2695_p13 = scmp.ne.s32.totalorder %s3386_s0, %s2694_s9  ;;  %p2699_p4 = scmp.lt.u32.totalorder %s3386_s0, %s3550_s14 }
 0x887   : > { %p2700_p0 = scmp.lt.u32.totalorder %s2698_s18, %s2694_s9  ;;  %p2702_p12 = scmp.lt.u32.totalorder %s2694_s9, %s3386_s0 }
 0x888   : > { %p2696_p1 = pnand %p2695_p13, %p3551_p6 }
 0x889   : > { %p2701_p2 = por %p2700_p0, %p2699_p4 }
 0x88a   : > { %p2697_p5 = pneg %p2696_p1 }
 0x88b   : > { %p2703_p9 = por %p2702_p12, %p2701_p2 }
 0x88d   : > { %p2704_p10 = pnand %p2703_p9, %p2697_p5 }
 0x88f   : > { %2707 = shalt.err (!%p2704_p10)
}
 0x890   : > { %2508 = dma.vmem_to_hbm [thread:$0]  (%p3551_p6), %s1993_s5, 128, %s3386_s0, %s1979_s6  }
 0x891 PF: > { %p2522_p3 = scmp.ge.s32.totalorder %s2806_s4, 2  ;;  %s2004_s8 = sand.u32 1, %s2766_s1  }
 0x892   : > { %p3552_p7 = scmp.ne.s32.totalorder %s3519_s16, 0  ;;  %s2005_s24 = scalar_lea.sflag [#allocation5], %s2004_s8 }
 0x894   : > { %p2518_p8 = pnand %p2522_p3, %p3552_p7 }
 0x896   : > { %2761 = dma.done.wait (!%p2518_p8), %s2005_s24, 128  }
 0x897   : > { %2763 = vsyncadd (!%p2518_p8), %s2005_s24, 4294967168  ;;  %s39_s4 = sadd.s32 1, %s2806_s4   ;;  %s3553_s5 = sld [smem:[#allocation13_spill]] }
 0x898   : > { %p36_p11 = scmp.ge.s32.totalorder %s39_s4, 6   ;;  %s3554_s6 = sld [smem:[#allocation14_spill]] }
 0x899   : > { %s3555_s1 = smov %s2770_s22  ;;  %s3556_s22 = smov %s2774_s23 }
 0x89a   : > { %s3557_s23 = smov %s3074_s7  ;;  %s3558_s24 = smov %s2782_s2 }
 0x89b   : > { %s3559_s2 = smov %s2786_s25  ;;  %s3560_s25 = smov %s3008_s12 }
 0x89c   : > { %s3561_s3 = smov %s2798_s27  ;;  %s3562_s26 = smov %s2802_s28 }
 0x89d   : > { %s3563_s27 = smov %s3553_s5  ;;  %38 = sbr.rel (!%p36_p11) target bundleno = 33 (0x21), region = 169 }
 0x89e   : > { %s3564_s28 = smov %s3554_s6 }
 0x8a4   :  { %2010 = vsyncpa [#allocation4], 1 }
 0x8a5   :  { %2012 = vsyncpa [#allocation4 + $0x1], 1 }
 0x8a6   :  { %2013 = vsyncpa [#allocation7], 1 }
 0x8a7   :  { %2015 = vsyncpa [#allocation7 + $0x1], 1 }
 0x8a8   :  { %2016 = vsyncpa [#allocation5], 1 }
 0x8a9   :  { %2018 = vsyncpa [#allocation5 + $0x1], 1 }

</bundles_post_ra>
